<compile_context>
chip_gen: v7x
topology: tpu7x:2x2x1
jax: 0.10.0
libtpu: 0.0.40
codegen_flags: <defaults>
</compile_context>

<pallas_src>
import functools

import jax
import jax.numpy as jnp
import numpy as np
from jax import lax
from jax.experimental import pallas as pl
from jax.experimental.pallas import tpu as pltpu

# ---- module hyper-parameters (fixed by the PyTorch module) ----
d_model = 512
d_ff = 2048
LN_EPS = 1e-5

# d_ff is consumed in chunks so the full (tm, d_ff) hidden never exists.
_FF_CHUNK = 512
_N_FF_CHUNKS = d_ff // _FF_CHUNK


# =====================  fused FFN Pallas kernel  =====================

def _ffn_kernel(x_ref, w1_ref, b1_ref, w2_ref, b2_ref, o_ref):
    """One row-tile of the full FFN sub-layer.

    x_ref : (tm, 512)   f32   input rows (also the residual)
    w1_ref: (512, 2048) bf16  resident (single-buffered)
    b1_ref: (1, 2048)   f32
    w2_ref: (2048, 512) bf16  resident (single-buffered)
    b2_ref: (1, 512)    f32
    o_ref : (tm, 512)   f32   LayerNorm(ffn(x) + x)
    """
    x = x_ref[...]                               # f32 (tm, 512) -- residual
    x_bf = x.astype(jnp.bfloat16)                # MXU operand

    # y = relu(x @ W1 + b1) @ W2, accumulated chunk-by-chunk over d_ff.
    # The hidden activation only ever exists as a (tm, _FF_CHUNK) in-flight
    # value (no VMEM scratch round trip).  All MXU accumulation is f32.
    acc = jnp.zeros((x.shape[0], d_model), jnp.float32)
    for ci in range(_N_FF_CHUNKS):
        k0, k1 = ci * _FF_CHUNK, (ci + 1) * _FF_CHUNK
        h = jnp.dot(x_bf, w1_ref[:, k0:k1],
                    preferred_element_type=jnp.float32)        # (tm, 512) f32
        h = jnp.maximum(h + b1_ref[:, k0:k1], 0.0)
        acc = acc + jnp.dot(h.astype(jnp.bfloat16), w2_ref[k0:k1, :],
                            preferred_element_type=jnp.float32)

    y = acc + b2_ref[...] + x                    # bias + residual (f32)

    # LayerNorm(d_model): fresh nn.LayerNorm each forward => weight=1, bias=0.
    mean = jnp.mean(y, axis=-1, keepdims=True)
    c = y - mean
    var = jnp.mean(c * c, axis=-1, keepdims=True)
    o_ref[...] = (c * lax.rsqrt(var + LN_EPS)).astype(o_ref.dtype)


@functools.lru_cache(maxsize=None)
def _ffn_call(Mp, tm):
    # Weights/biases have constant block indices -> DMAed once; Buffered(1)
    # avoids allocating a dead second pipeline buffer for them.
    resident = dict(pipeline_mode=pl.Buffered(1))
    return pl.pallas_call(
        _ffn_kernel,
        out_shape=jax.ShapeDtypeStruct((Mp, d_model), jnp.float32),
        grid_spec=pltpu.PrefetchScalarGridSpec(
            num_scalar_prefetch=0,
            grid=(Mp // tm,),
            in_specs=[
                pl.BlockSpec((tm, d_model), lambda i: (i, 0)),               # x rows
                pl.BlockSpec((d_model, d_ff), lambda i: (0, 0), **resident),  # w1
                pl.BlockSpec((1, d_ff), lambda i: (0, 0), **resident),        # b1
                pl.BlockSpec((d_ff, d_model), lambda i: (0, 0), **resident),  # w2
                pl.BlockSpec((1, d_model), lambda i: (0, 0), **resident),     # b2
            ],
            out_specs=pl.BlockSpec((tm, d_model), lambda i: (i, 0)),
        ),
        compiler_params=pltpu.CompilerParams(
            dimension_semantics=("parallel",),
            vmem_limit_bytes=48 * 1024 * 1024,
        ),
    )


def _round_up(x, m):
    return (x + m - 1) // m * m


def _choose_tm(M, tm_max=1024):
    """Row-tile heuristic: big tiles for MXU efficiency, >=2 grid steps when
    possible (keeps both v7x TensorCores busy), bounded padding waste."""
    Mp8 = _round_up(max(M, 1), 8)
    best_key, best_t = None, 8
    for t in (1024, 512, 256, 128, 64, 32, 16, 8):
        if t > tm_max:
            continue
        Mp = _round_up(Mp8, t)
        low_waste = (Mp - Mp8) * 4 <= Mp          # <= ~25% padded rows
        two_steps = (Mp // t) >= 2                # megacore: both TCs get work
        key = (low_waste, two_steps, t)
        if best_key is None or key > best_key:
            best_key, best_t = key, t
    return best_t


def positionwise_feed_forward(x, w1_bf16, b1, w2_bf16, b2, *, tm_max=1024):
    """x: [batch, seq, d_model] f32 -> [batch, seq, d_model] f32."""
    B, S, dm = x.shape
    assert dm == d_model
    M = B * S
    x2 = x.reshape(M, d_model).astype(jnp.float32)

    tm = _choose_tm(M, tm_max)
    Mp = _round_up(M, tm)
    if Mp != M:
        # Zero padded rows -> LayerNorm gives finite values there; sliced off.
        x2 = jnp.pad(x2, ((0, Mp - M), (0, 0)))

    y = _ffn_call(Mp, tm)(x2, w1_bf16, b1, w2_bf16, b2)
    return y[:M].reshape(B, S, d_model)


# =====================  parameter init (matches nn.Linear defaults)  =====================

def init_linear_params(key, d_in, d_out):
    k1, k2 = jax.random.split(key)
    bound = 1.0 / np.sqrt(d_in)
    w = jax.random.uniform(k1, (d_in, d_out), jnp.float32, -bound, bound)
    b = jax.random.uniform(k2, (1, d_out), jnp.float32, -bound, bound)
    return w, b


def init_ffn_params(key):
    k1, k2 = jax.random.split(key)
    w1, b1 = init_linear_params(k1, d_model, d_ff)
    w2, b2 = init_linear_params(k2, d_ff, d_model)
    # Weights stored bf16 (MXU-native, halves weight DMA); biases stay f32.
    return {
        "w1": w1.astype(jnp.bfloat16), "b1": b1,
        "w2": w2.astype(jnp.bfloat16), "b2": b2,
    }


# =====================  pure-JAX reference (for validation)  =====================

def ffn_reference(x, w1_bf16, b1, w2_bf16, b2):
    w1 = w1_bf16.astype(jnp.float32)
    w2 = w2_bf16.astype(jnp.float32)
    h = jnp.maximum(jnp.einsum("bsk,kn->bsn", x, w1) + b1, 0.0)
    y = jnp.einsum("bsk,kn->bsn", h, w2) + b2 + x
    mean = jnp.mean(y, axis=-1, keepdims=True)
    var = jnp.mean((y - mean) ** 2, axis=-1, keepdims=True)
    return (y - mean) / jnp.sqrt(var + LN_EPS)


# =====================  main  =====================

if __name__ == "__main__":
    key = jax.random.PRNGKey(0)
    k_param, k_x = jax.random.split(key)

    batch, seq = 2, 8
    params = init_ffn_params(k_param)
    x = jax.random.normal(k_x, (batch, seq, d_model), jnp.float32)

    # One jit over the whole forward: single XLA program, no per-call host overhead.
    fwd = jax.jit(positionwise_feed_forward)
    out = fwd(x, params["w1"], params["b1"], params["w2"], params["b2"])
    out = jax.block_until_ready(out)

    assert out.shape == (batch, seq, d_model)
    assert bool(jnp.all(jnp.isfinite(out)))

    # Loose tolerance: matmul operands are bf16 (f32 accumulate) by design.
    ref = ffn_reference(x, params["w1"], params["b1"], params["w2"], params["b2"])
    max_err = float(jnp.max(jnp.abs(out - ref)))
    assert max_err < 5e-2, f"max abs error {max_err}"

    print("KERNEL_OK")
</pallas_src>

<mosaic_0001>
module attributes {stable_mosaic.version = 11 : i64} {
  func.func @_ffn_kernel(%arg0: i32, %arg1: memref<8x512xf32, #tpu.memory_space<vmem>>, %arg2: memref<512x2048xbf16, #tpu.memory_space<vmem>>, %arg3: memref<1x2048xf32, #tpu.memory_space<vmem>>, %arg4: memref<2048x512xbf16, #tpu.memory_space<vmem>>, %arg5: memref<1x512xf32, #tpu.memory_space<vmem>>, %arg6: memref<8x512xf32, #tpu.memory_space<vmem>>) attributes {dimension_semantics = [#tpu.dimension_semantics<parallel>], iteration_bounds = array<i64: 2>, scalar_prefetch = 0 : i64, scratch_operands = 0 : i64, tpu.core_type = #tpu.core_type<tc>, window_params = [{transform_indices = @transform_0, window_bounds = array<i64: 8, 512>}, {pipeline_mode = #tpu.pipeline_mode<synchronous>, transform_indices = @transform_1, window_bounds = array<i64: 512, 2048>}, {pipeline_mode = #tpu.pipeline_mode<synchronous>, transform_indices = @transform_2, window_bounds = array<i64: 1, 2048>}, {pipeline_mode = #tpu.pipeline_mode<synchronous>, transform_indices = @transform_3, window_bounds = array<i64: 2048, 512>}, {pipeline_mode = #tpu.pipeline_mode<synchronous>, transform_indices = @transform_4, window_bounds = array<i64: 1, 512>}, {transform_indices = @transform_5, window_bounds = array<i64: 8, 512>}]} {
    %c0 = arith.constant 0 : index
    %c0_0 = arith.constant 0 : index
    %0 = vector.load %arg1[%c0, %c0_0] : memref<8x512xf32, #tpu.memory_space<vmem>>, vector<8x512xf32>
    %1 = arith.truncf %0 : vector<8x512xf32> to vector<8x512xbf16>
    %cst = arith.constant 0.000000e+00 : f32
    %2 = vector.broadcast %cst : f32 to vector<8x512xf32>
    %c0_1 = arith.constant 0 : index
    %c0_2 = arith.constant 0 : index
    %3 = vector.load %arg2[%c0_1, %c0_2] : memref<512x2048xbf16, #tpu.memory_space<vmem>>, vector<512x512xbf16>
    %cst_3 = arith.constant dense<0.000000e+00> : vector<8x512xf32>
    %4 = tpu.matmul %1, %3, %cst_3 {dimension_numbers = #tpu.dot_dimension_numbers<[1], [0], [0], [1], [0, 0, 1, 1], [], []>} : vector<8x512xbf16>, vector<512x512xbf16>, vector<8x512xf32> -> vector<8x512xf32>
    %c0_4 = arith.constant 0 : index
    %c0_5 = arith.constant 0 : index
    %5 = vector.load %arg3[%c0_4, %c0_5] : memref<1x2048xf32, #tpu.memory_space<vmem>>, vector<1x512xf32>
    %6 = vector.broadcast %5 : vector<1x512xf32> to vector<8x512xf32>
    %7 = arith.addf %4, %6 : vector<8x512xf32>
    %cst_6 = arith.constant 0.000000e+00 : f32
    %8 = vector.broadcast %cst_6 : f32 to vector<8x512xf32>
    %9 = arith.maximumf %7, %8 : vector<8x512xf32>
    %10 = arith.truncf %9 : vector<8x512xf32> to vector<8x512xbf16>
    %c0_7 = arith.constant 0 : index
    %c0_8 = arith.constant 0 : index
    %11 = vector.load %arg4[%c0_7, %c0_8] : memref<2048x512xbf16, #tpu.memory_space<vmem>>, vector<512x512xbf16>
    %cst_9 = arith.constant dense<0.000000e+00> : vector<8x512xf32>
    %12 = tpu.matmul %10, %11, %cst_9 {dimension_numbers = #tpu.dot_dimension_numbers<[1], [0], [0], [1], [0, 0, 1, 1], [], []>} : vector<8x512xbf16>, vector<512x512xbf16>, vector<8x512xf32> -> vector<8x512xf32>
    %13 = arith.addf %2, %12 : vector<8x512xf32>
    %c0_10 = arith.constant 0 : index
    %c512 = arith.constant 512 : index
    %14 = vector.load %arg2[%c0_10, %c512] : memref<512x2048xbf16, #tpu.memory_space<vmem>>, vector<512x512xbf16>
    %cst_11 = arith.constant dense<0.000000e+00> : vector<8x512xf32>
    %15 = tpu.matmul %1, %14, %cst_11 {dimension_numbers = #tpu.dot_dimension_numbers<[1], [0], [0], [1], [0, 0, 1, 1], [], []>} : vector<8x512xbf16>, vector<512x512xbf16>, vector<8x512xf32> -> vector<8x512xf32>
    %c0_12 = arith.constant 0 : index
    %c512_13 = arith.constant 512 : index
    %16 = vector.load %arg3[%c0_12, %c512_13] : memref<1x2048xf32, #tpu.memory_space<vmem>>, vector<1x512xf32>
    %17 = vector.broadcast %16 : vector<1x512xf32> to vector<8x512xf32>
    %18 = arith.addf %15, %17 : vector<8x512xf32>
    %cst_14 = arith.constant 0.000000e+00 : f32
    %19 = vector.broadcast %cst_14 : f32 to vector<8x512xf32>
    %20 = arith.maximumf %18, %19 : vector<8x512xf32>
    %21 = arith.truncf %20 : vector<8x512xf32> to vector<8x512xbf16>
    %c512_15 = arith.constant 512 : index
    %c0_16 = arith.constant 0 : index
    %22 = vector.load %arg4[%c512_15, %c0_16] : memref<2048x512xbf16, #tpu.memory_space<vmem>>, vector<512x512xbf16>
    %cst_17 = arith.constant dense<0.000000e+00> : vector<8x512xf32>
    %23 = tpu.matmul %21, %22, %cst_17 {dimension_numbers = #tpu.dot_dimension_numbers<[1], [0], [0], [1], [0, 0, 1, 1], [], []>} : vector<8x512xbf16>, vector<512x512xbf16>, vector<8x512xf32> -> vector<8x512xf32>
    %24 = arith.addf %13, %23 : vector<8x512xf32>
    %c0_18 = arith.constant 0 : index
    %c1024 = arith.constant 1024 : index
    %25 = vector.load %arg2[%c0_18, %c1024] : memref<512x2048xbf16, #tpu.memory_space<vmem>>, vector<512x512xbf16>
    %cst_19 = arith.constant dense<0.000000e+00> : vector<8x512xf32>
    %26 = tpu.matmul %1, %25, %cst_19 {dimension_numbers = #tpu.dot_dimension_numbers<[1], [0], [0], [1], [0, 0, 1, 1], [], []>} : vector<8x512xbf16>, vector<512x512xbf16>, vector<8x512xf32> -> vector<8x512xf32>
    %c0_20 = arith.constant 0 : index
    %c1024_21 = arith.constant 1024 : index
    %27 = vector.load %arg3[%c0_20, %c1024_21] : memref<1x2048xf32, #tpu.memory_space<vmem>>, vector<1x512xf32>
    %28 = vector.broadcast %27 : vector<1x512xf32> to vector<8x512xf32>
    %29 = arith.addf %26, %28 : vector<8x512xf32>
    %cst_22 = arith.constant 0.000000e+00 : f32
    %30 = vector.broadcast %cst_22 : f32 to vector<8x512xf32>
    %31 = arith.maximumf %29, %30 : vector<8x512xf32>
    %32 = arith.truncf %31 : vector<8x512xf32> to vector<8x512xbf16>
    %c1024_23 = arith.constant 1024 : index
    %c0_24 = arith.constant 0 : index
    %33 = vector.load %arg4[%c1024_23, %c0_24] : memref<2048x512xbf16, #tpu.memory_space<vmem>>, vector<512x512xbf16>
    %cst_25 = arith.constant dense<0.000000e+00> : vector<8x512xf32>
    %34 = tpu.matmul %32, %33, %cst_25 {dimension_numbers = #tpu.dot_dimension_numbers<[1], [0], [0], [1], [0, 0, 1, 1], [], []>} : vector<8x512xbf16>, vector<512x512xbf16>, vector<8x512xf32> -> vector<8x512xf32>
    %35 = arith.addf %24, %34 : vector<8x512xf32>
    %c0_26 = arith.constant 0 : index
    %c1536 = arith.constant 1536 : index
    %36 = vector.load %arg2[%c0_26, %c1536] : memref<512x2048xbf16, #tpu.memory_space<vmem>>, vector<512x512xbf16>
    %cst_27 = arith.constant dense<0.000000e+00> : vector<8x512xf32>
    %37 = tpu.matmul %1, %36, %cst_27 {dimension_numbers = #tpu.dot_dimension_numbers<[1], [0], [0], [1], [0, 0, 1, 1], [], []>} : vector<8x512xbf16>, vector<512x512xbf16>, vector<8x512xf32> -> vector<8x512xf32>
    %c0_28 = arith.constant 0 : index
    %c1536_29 = arith.constant 1536 : index
    %38 = vector.load %arg3[%c0_28, %c1536_29] : memref<1x2048xf32, #tpu.memory_space<vmem>>, vector<1x512xf32>
    %39 = vector.broadcast %38 : vector<1x512xf32> to vector<8x512xf32>
    %40 = arith.addf %37, %39 : vector<8x512xf32>
    %cst_30 = arith.constant 0.000000e+00 : f32
    %41 = vector.broadcast %cst_30 : f32 to vector<8x512xf32>
    %42 = arith.maximumf %40, %41 : vector<8x512xf32>
    %43 = arith.truncf %42 : vector<8x512xf32> to vector<8x512xbf16>
    %c1536_31 = arith.constant 1536 : index
    %c0_32 = arith.constant 0 : index
    %44 = vector.load %arg4[%c1536_31, %c0_32] : memref<2048x512xbf16, #tpu.memory_space<vmem>>, vector<512x512xbf16>
    %cst_33 = arith.constant dense<0.000000e+00> : vector<8x512xf32>
    %45 = tpu.matmul %43, %44, %cst_33 {dimension_numbers = #tpu.dot_dimension_numbers<[1], [0], [0], [1], [0, 0, 1, 1], [], []>} : vector<8x512xbf16>, vector<512x512xbf16>, vector<8x512xf32> -> vector<8x512xf32>
    %46 = arith.addf %35, %45 : vector<8x512xf32>
    %c0_34 = arith.constant 0 : index
    %c0_35 = arith.constant 0 : index
    %47 = vector.load %arg5[%c0_34, %c0_35] : memref<1x512xf32, #tpu.memory_space<vmem>>, vector<1x512xf32>
    %48 = vector.broadcast %47 : vector<1x512xf32> to vector<8x512xf32>
    %49 = arith.addf %46, %48 : vector<8x512xf32>
    %50 = arith.addf %49, %0 : vector<8x512xf32>
    %cst_36 = arith.constant dense<0.000000e+00> : vector<8xf32>
    %51 = vector.multi_reduction <add>, %50, %cst_36 [1] : vector<8x512xf32> to vector<8xf32>
    %52 = vector.shape_cast %51 : vector<8xf32> to vector<8x1xf32>
    %cst_37 = arith.constant 5.120000e+02 : f32
    %53 = vector.broadcast %cst_37 : f32 to vector<8x1xf32>
    %54 = arith.divf %52, %53 : vector<8x1xf32>
    %55 = vector.broadcast %54 : vector<8x1xf32> to vector<8x512xf32>
    %56 = arith.subf %50, %55 : vector<8x512xf32>
    %57 = arith.mulf %56, %56 : vector<8x512xf32>
    %cst_38 = arith.constant dense<0.000000e+00> : vector<8xf32>
    %58 = vector.multi_reduction <add>, %57, %cst_38 [1] : vector<8x512xf32> to vector<8xf32>
    %59 = vector.shape_cast %58 : vector<8xf32> to vector<8x1xf32>
    %cst_39 = arith.constant 5.120000e+02 : f32
    %60 = vector.broadcast %cst_39 : f32 to vector<8x1xf32>
    %61 = arith.divf %59, %60 : vector<8x1xf32>
    %cst_40 = arith.constant 9.99999974E-6 : f32
    %62 = vector.broadcast %cst_40 : f32 to vector<8x1xf32>
    %63 = arith.addf %61, %62 : vector<8x1xf32>
    %64 = math.rsqrt %63 : vector<8x1xf32>
    %65 = vector.broadcast %64 : vector<8x1xf32> to vector<8x512xf32>
    %66 = arith.mulf %56, %65 : vector<8x512xf32>
    %c0_41 = arith.constant 0 : index
    %c0_42 = arith.constant 0 : index
    %67 = vector.load %arg6[%c0_41, %c0_42] : memref<8x512xf32, #tpu.memory_space<vmem>>, vector<8x512xf32>
    tpu.vector_store %arg6[%c0_41, %c0_42], %66 {strides = array<i32>} : memref<8x512xf32, #tpu.memory_space<vmem>>, vector<8x512xf32>,
    return
  }
  func.func @transform_0(%arg0: i32) -> (i32, i32) {
    %c0_i32 = arith.constant 0 : i32
    %c0_i32_0 = arith.constant 0 : i32
    return %arg0, %c0_i32 : i32, i32
  }
  func.func @transform_1(%arg0: i32) -> (i32, i32) {
    %c0_i32 = arith.constant 0 : i32
    %c0_i32_0 = arith.constant 0 : i32
    %c0_i32_1 = arith.constant 0 : i32
    return %c0_i32, %c0_i32_0 : i32, i32
  }
  func.func @transform_2(%arg0: i32) -> (i32, i32) {
    %c0_i32 = arith.constant 0 : i32
    %c0_i32_0 = arith.constant 0 : i32
    %c0_i32_1 = arith.constant 0 : i32
    return %c0_i32, %c0_i32_0 : i32, i32
  }
  func.func @transform_3(%arg0: i32) -> (i32, i32) {
    %c0_i32 = arith.constant 0 : i32
    %c0_i32_0 = arith.constant 0 : i32
    %c0_i32_1 = arith.constant 0 : i32
    return %c0_i32, %c0_i32_0 : i32, i32
  }
  func.func @transform_4(%arg0: i32) -> (i32, i32) {
    %c0_i32 = arith.constant 0 : i32
    %c0_i32_0 = arith.constant 0 : i32
    %c0_i32_1 = arith.constant 0 : i32
    return %c0_i32, %c0_i32_0 : i32, i32
  }
  func.func @transform_5(%arg0: i32) -> (i32, i32) {
    %c0_i32 = arith.constant 0 : i32
    %c0_i32_0 = arith.constant 0 : i32
    return %arg0, %c0_i32 : i32, i32
  }
}

</mosaic_0001>

<bundles_post_ra>
// kernel: positionwise_feed_forward.1
= control target key start
LH: loop header
LB: loop body
LE: loop exit
PB: predicated region body
PF: predicated region fallthrough
CT: control target
= control target key end

     0   :  { %10 = vsyncpa [#allocation3], 0  ;;  %s10742_s0 = inlined_call_operand.hbm [shape: f32[16,512], index: 0, kind: input, shape index: {}]   ;;  %s10743_s1 = inlined_call_operand.hbm [shape: bf16[512,2048], index: 1, kind: input, shape index: {}]   ;;  %s10744_s2 = inlined_call_operand.hbm [shape: f32[1,2048], index: 2, kind: input, shape index: {}]   ;;  %s10745_s3 = inlined_call_operand.hbm [shape: bf16[2048,512], index: 3, kind: input, shape index: {}]   ;;  %s10746_s4 = inlined_call_operand.hbm [shape: f32[1,512], index: 4, kind: input, shape index: {}]   ;;  %s10747_s5 = inlined_call_operand.hbm [shape: f32[16,512], index: 5, kind: output, shape index: {}]  }
   0x1   :  { %12 = vsyncpa [#allocation3 + $0x1], 0 }
   0x2   :  { %13 = vsyncpa [#allocation6], 0 }
   0x3   :  { %14 = vsyncpa [#allocation9], 0 }
   0x4   :  { %15 = vsyncpa [#allocation4], 0 }
   0x5   :  { %17 = vsyncpa [#allocation4 + $0x1], 0  ;;  %s10290_s18 = smov 0   ;;  %s10292_s19 = smov 0  }
   0x6   :  { %s10294_s20 = smov 0   ;;  %s10296_s21 = smov 0  }
   0x7 LB: > { %s10250_s22 = smov [#allocation5]   ;;  %s10311_s24 = sadd.s32 4294967295, %s10248_s21   ;;  %s10248_s21 = sphi %s10296_s21, %s10771_s21   ;;  %s10244_s20 = sphi %s10294_s20, %s10770_s20   ;;  %s10240_s19 = sphi %s10292_s19, %s10769_s19   ;;  %s10236_s18 = sphi %s10290_s18, %s10768_s18  }
   0x8   : > { %s176_s23 = sshll.u32 %s10250_s22, 4  ;;  %p8072_p0 = scmp.ge.s32.totalorder %s10248_s21, 1  ;;  %s10316_s23 = int_to_ptr.vmem [resolvable:$true] %s176_s23 }
   0x9   : > { %p10748_p1 = scmp.eq.s32.totalorder %s10311_s24, 0  ;;  %p164_p2 = scmp.lt.s32.totalorder %s10248_s21, 3 }
   0xa   : > { %s10251_s26 = smov [#allocation8]   ;;  %s10252_s29 = smov [#allocation7]  }
   0xb   : > { %p10318_p3 = pnand %p8072_p0, %p164_p2  ;;  %s200_s27 = sshll.u32 %s10251_s26, 4  ;;  %s10331_s27 = int_to_ptr.vmem [resolvable:$true] %s200_s27 }
   0xc   : > { %s10333_s30 = sshll.u32 %s10252_s29, 4  ;;  %s10032_s8 = scalar_lea.hbm %s10743_s1, 65536  ;;  %s191_s30 = int_to_ptr.vmem [resolvable:$true] %s10333_s30 }
   0xd   : > { %s10751_s25 = scalar_select %p10318_p3, 1, 0 }
   0xe   : > { %p9187_p5 = pneg %p10318_p3  ;;  %p10033_p7 = scmp.ne.s32.totalorder %s10743_s1, %s10032_s8 }
   0xf   : > { %p10039_p11 = scmp.lt.u32.totalorder %s10032_s8, %s10743_s1 }
  0x10   : > { %p10327_p6 = pnand %p9187_p5, %p10748_p1 }
  0x12   : > { %p10343_p8 = pneg %p10327_p6 }
  0x14   : > { %p10035_p9 = pnand %p10343_p8, %p10033_p7 }
  0x16   : > { %p10036_p10 = pneg %p10035_p9 }
  0x18   : > { %p10041_p12 = pnand %p10039_p11, %p10036_p10 }
  0x1a   : > { %10044 = shalt.err (!%p10041_p12)
}
  0x1b   : > { %s10045_s14 = scalar_lea.vmem %s10316_s23, 65536  ;;  %p10053_p5 = scmp.lt.s32.totalorder %s10316_s23, %s10316_s23 }
  0x1c   : > { %p10046_p13 = scmp.ne.s32.totalorder %s10316_s23, %s10045_s14  ;;  %p10054_p4 = scmp.lt.s32.totalorder %s10045_s14, %s10045_s14 }
  0x1e   : > { %p10048_p0 = pnand %p10046_p13, %p10343_p8  ;;  %p10055_p7 = por %p10054_p4, %p10053_p5 }
  0x20   : > { %p10049_p2 = pneg %p10048_p0 }
  0x22   : > { %p10056_p9 = pnand %p10055_p7, %p10049_p2 }
  0x24   : > { %10059 = shalt.err (!%p10056_p9)
}
  0x25   : > { %s10253_s15 = smov 1024   ;;  %s10254_s16 = smov 64  }
  0x26   : > { %9190 = dma.hbm_to_vmem [thread:$0]  (!%p10327_p6), %s10743_s1, 65536, %s10316_s23, [#allocation6], %s10253_s15, %s10253_s15, %s10254_s16  }
  0x27   : > { %s10060_s6 = scalar_lea.hbm %s10745_s3, 65536 }
  0x28   : > { %p10061_p4 = scmp.ne.s32.totalorder %s10745_s3, %s10060_s6  ;;  %p10067_p12 = scmp.lt.u32.totalorder %s10060_s6, %s10745_s3 }
  0x2a   : > { %p10063_p10 = pnand %p10061_p4, %p10343_p8 }
  0x2c   : > { %p10064_p11 = pneg %p10063_p10 }
  0x2e   : > { %p10069_p13 = pnand %p10067_p12, %p10064_p11 }
  0x30   : > { %10072 = shalt.err (!%p10069_p13)
}
  0x31   : > { %s10073_s23 = scalar_lea.vmem %s10331_s27, 65536  ;;  %p10081_p7 = scmp.lt.s32.totalorder %s10331_s27, %s10331_s27 }
  0x32   : > { %p10074_p0 = scmp.ne.s32.totalorder %s10331_s27, %s10073_s23  ;;  %p10082_p9 = scmp.lt.s32.totalorder %s10073_s23, %s10073_s23 }
  0x34   : > { %p10076_p2 = pnand %p10074_p0, %p10343_p8  ;;  %p10083_p4 = por %p10082_p9, %p10081_p7 }
  0x36   : > { %p10077_p5 = pneg %p10076_p2 }
  0x38   : > { %p10084_p10 = pnand %p10083_p4, %p10077_p5 }
  0x3a   : > { %10087 = shalt.err (!%p10084_p10)
}
  0x3b   : > { %s10255_s12 = smov 256   ;;  %s10256_s13 = smov 16  }
  0x3c   : > { %9196 = dma.hbm_to_vmem [thread:$0]  (!%p10327_p6), %s10745_s3, 65536, %s10331_s27, [#allocation9], %s10255_s12, %s10255_s12, %s10256_s13  }
  0x3d   : > { %s10088_s22 = scalar_lea.hbm %s10744_s2, 256 }
  0x3e   : > { %p10089_p11 = scmp.ne.s32.totalorder %s10744_s2, %s10088_s22  ;;  %p10095_p0 = scmp.lt.u32.totalorder %s10088_s22, %s10744_s2 }
  0x40   : > { %p10091_p12 = pnand %p10089_p11, %p10343_p8 }
  0x42   : > { %p10092_p13 = pneg %p10091_p12 }
  0x44   : > { %p10097_p2 = pnand %p10095_p0, %p10092_p13 }
  0x46   : > { %10100 = shalt.err (!%p10097_p2)
}
  0x47   : > { %s10101_s8 = scalar_lea.vmem %s191_s30, 256  ;;  %p10109_p4 = scmp.lt.s32.totalorder %s191_s30, %s191_s30 }
  0x48   : > { %p10102_p5 = scmp.ne.s32.totalorder %s191_s30, %s10101_s8  ;;  %p10110_p10 = scmp.lt.s32.totalorder %s10101_s8, %s10101_s8 }
  0x4a   : > { %p10104_p7 = pnand %p10102_p5, %p10343_p8  ;;  %p10111_p1 = por %p10110_p10, %p10109_p4 }
  0x4c   : > { %p10105_p9 = pneg %p10104_p7 }
  0x4e   : > { %p10112_p3 = pnand %p10111_p1, %p10105_p9 }
  0x50   : > { %10115 = shalt.err (!%p10112_p3)
}
  0x51   : > { %9193 = dma.hbm_to_vmem [thread:$0]  (!%p10327_p6), %s10744_s2, 256, %s191_s30, [#allocation6]  }
  0x52   : > { %s10257_s10 = smov [#allocation10]   ;;  %s10116_s14 = scalar_lea.hbm %s10746_s4, 64 }
  0x53   : > { %s214_s23 = sshll.u32 %s10257_s10, 4  ;;  %p10117_p11 = scmp.ne.s32.totalorder %s10746_s4, %s10116_s14  ;;  %s215_s23 = int_to_ptr.vmem [resolvable:$true] %s214_s23 }
  0x54   : > { %p10123_p12 = scmp.lt.u32.totalorder %s10116_s14, %s10746_s4 }
  0x55   : > { %p10119_p1 = pnand %p10117_p11, %p10343_p8 }
  0x57   : > { %p10120_p3 = pneg %p10119_p1 }
  0x59   : > { %p10125_p13 = pnand %p10123_p12, %p10120_p3 }
  0x5b   : > { %10128 = shalt.err (!%p10125_p13)
}
  0x5c   : > { %s10129_s30 = scalar_lea.vmem %s215_s23, 64  ;;  %p10137_p7 = scmp.lt.s32.totalorder %s215_s23, %s215_s23 }
  0x5d   : > { %p10130_p0 = scmp.ne.s32.totalorder %s215_s23, %s10129_s30  ;;  %p10138_p9 = scmp.lt.s32.totalorder %s10129_s30, %s10129_s30 }
  0x5f   : > { %p10132_p2 = pnand %p10130_p0, %p10343_p8  ;;  %p10139_p4 = por %p10138_p9, %p10137_p7 }
  0x61   : > { %p10133_p5 = pneg %p10132_p2 }
  0x63   : > { %p10140_p10 = pnand %p10139_p4, %p10133_p5 }
  0x65   : > { %10143 = shalt.err (!%p10140_p10)
}
  0x66   : > { %9199 = dma.hbm_to_vmem [thread:$0]  (!%p10327_p6), %s10746_s4, 64, %s215_s23, [#allocation9]  }
  0x67   : > { %s8071_s11 = sadd.s32 4294967294, %s10248_s21   ;;  %s10426_s28 = sadd.s32 1, %s10248_s21  }
  0x68   : > { %s27_s6 = ssub.s32 %s10248_s21, %s10426_s28  ;;  %s30_s7 = sadd.s32 1, %s10244_s20 }
  0x69   : > { %p28_p8 = scmp.eq.s32.totalorder %s27_s6, 0  ;;  %p37_p11 = scmp.ne.s32.totalorder %s10244_s20, %s10240_s19 }
  0x6a   : > { %p38_p1 = scmp.eq.s32.totalorder %s10248_s21, 0  ;;  %p43_p3 = scmp.ne.s32.totalorder %s10240_s19, %s10236_s18 }
  0x6b   : > { %s10437_s8 = scalar_select %p28_p8, %s10244_s20, %s30_s7  }
  0x6c   : > { %p10439_p12 = por %p38_p1, %p37_p11  ;;  %p10755_p13 = scmp.eq.s32.totalorder %s10311_s24, 0 }
  0x6d   : > { %p151_p0 = scmp.eq.s32.totalorder %s10311_s24, 1  ;;  %p157_p2 = scmp.eq.s32.totalorder %s8071_s11, 1 }
  0x6e   : > { %p10445_p6 = por %p10755_p13, %p43_p3  ;;  %p9212_p5 = scmp.lt.s32.totalorder %s10248_s21, 2 }
  0x6f   : > { %s225_s10 = sand.u32 1, %s10244_s20   ;;  %p10452_p7 = por %p151_p0, %p37_p11 }
  0x70   : > { %p10456_p9 = por %p157_p2, %p43_p3  ;;  %s8078_s13 = sshll.u32 %s225_s10, 5 }
  0x71   : > { %s10757_s23 = scalar_select %p10452_p7, 1, 0 }
  0x72   : > { %s10758_s12 = scalar_select %p10456_p9, 1, 0 }
  0x73   : > { %s9117_s14 = sshll.u32 %s10248_s21, 9  ;;  %s229_s22 = scalar_lea.vmem [#allocation2], %s8078_s13 }
  0x74   : > { %s10464_s17 = scalar_lea.hbm %s10742_s0, %s9117_s14  ;;  %s237_s30 = sshll.u32 %s229_s22, 4  ;;  %s10466_s30 = int_to_ptr.vmem [resolvable:$true] %s237_s30 }
  0x75   : > { %p10470_p4 = pnand %p9212_p5, %p10439_p12  ;;  %s226_s29 = scalar_lea.sflag [#allocation3], %s225_s10 }
  0x76   : > { %s10144_s11 = scalar_lea.hbm %s10464_s17, 512  ;;  %s10149_s13 = scalar_lea.hbm %s10742_s0, 1024 }
  0x77   : > { %p10145_p10 = scmp.ne.s32.totalorder %s10464_s17, %s10144_s11  ;;  %p10146_p8 = pneg %p10470_p4 }
  0x78   : > { %p10150_p3 = scmp.lt.u32.totalorder %s10464_s17, %s10742_s0  ;;  %p10151_p12 = scmp.lt.u32.totalorder %s10149_s13, %s10144_s11 }
  0x79   : > { %p10147_p11 = pnand %p10146_p8, %p10145_p10  ;;  %p10153_p0 = scmp.lt.u32.totalorder %s10144_s11, %s10464_s17 }
  0x7a   : > { %p10152_p13 = por %p10151_p12, %p10150_p3 }
  0x7b   : > { %p10148_p1 = pneg %p10147_p11 }
  0x7c   : > { %p10154_p2 = por %p10153_p0, %p10152_p13 }
  0x7e   : > { %p10155_p5 = pnand %p10154_p2, %p10148_p1 }
  0x80   : > { %10158 = shalt.err (!%p10155_p5)
}
  0x81   : > { %s10159_s10 = scalar_lea.vmem %s10466_s30, 512  ;;  %s10258_s15 = smov [#allocation2]  }
  0x82   : > { %p10160_p10 = scmp.ne.s32.totalorder %s10466_s30, %s10159_s10  ;;  %s10164_s16 = sshll.u32 %s10258_s15, 4  ;;  %s10165_s16 = int_to_ptr.vmem [resolvable:$false] %s10164_s16 }
  0x83   : > { %s10166_s22 = scalar_lea.vmem %s10165_s16, 1024  ;;  %p10167_p7 = scmp.lt.s32.totalorder %s10466_s30, %s10165_s16 }
  0x84   : > { %p10162_p11 = pnand %p10160_p10, %p10146_p8  ;;  %p10168_p3 = scmp.lt.s32.totalorder %s10166_s22, %s10159_s10 }
  0x86   : > { %p10163_p9 = pneg %p10162_p11  ;;  %p10169_p12 = por %p10168_p3, %p10167_p7 }
  0x88   : > { %p10170_p13 = pnand %p10169_p12, %p10163_p9 }
  0x8a   : > { %10173 = shalt.err (!%p10170_p13)
}
  0x8b   : > { %9203 = dma.hbm_to_vmem [thread:$0]  (!%p10470_p4), %s10464_s17, 512, %s10466_s30, %s226_s29  }
  0x8c   : > { %p10760_p1 = scmp.ne.s32.totalorder %s10751_s25, 0 }
  0x8d   : > { %s10502_s11 = sand.u32 (!%p10760_p1), 1, %s10240_s19  }
  0x8e   : > { %246 = sbr.rel (%p10760_p1) target bundleno = 2205 (0x89d), region = 40  ;;  %s8082_s6 = sshll.u32 (!%p10760_p1), %s10502_s11, 5 }
  0x8f   : > { %s249_s7 = scalar_lea.sflag (!%p10760_p1), [#allocation3], %s10502_s11  ;;  %s10508_s13 = scalar_lea.vmem (!%p10760_p1), [#allocation2], %s8082_s6 }
  0x95   : > { %10219 = dma.done.wait (%p10445_p6), %s249_s7, 512  }
  0x96   : > { %10221 = vsyncadd (%p10445_p6), %s249_s7, 4294966784  ;;  %p10761_p7 = scmp.eq.s32.totalorder %s10311_s24, 0 }
  0x98   : > { %10223 = dma.done.wait (%p10761_p7), [#allocation6], 65792   ;;  %p10762_p9 = pmov %p10761_p7 }
  0x99   : > { %p10763_p4 = pmov %p10761_p7 }
  0x9a   : > { %10225 = vsyncadd (%p10762_p9), [#allocation6], 4294901504 }
  0x9b   : > { %10227 = dma.done.wait (%p10763_p4), [#allocation9], 65600   ;;  %p10764_p8 = pmov %p10763_p4 }
  0x9c   : > { %v303_v0 = vld [vmem:[#allocation5] sm:$0xff]  ;;  %v304_v2 = vld [vmem:[#allocation5 + $0x8] sm:$0xff]  ;;  %s9118_s25 = sshll.u32 %s10311_s24, 9  ;;  %s294_s9 = scalar_lea.vmem [#allocation11], %s8082_s6 }
  0x9d   : > { %10229 = vsyncadd (%p10764_p8), [#allocation9], 4294901696  ;;  %v305_v1 = vld [vmem:[#allocation5 + $0x40] sm:$0xff]  ;;  %v306_v4 = vld [vmem:[#allocation5 + $0x48] sm:$0xff]  ;;  %s7963_s17 = sshll.u32 %s294_s9, 4  ;;  %s10698_s29 = scalar_lea.hbm %s10747_s5, %s9118_s25  ;;  %s10700_s17 = int_to_ptr.vmem [resolvable:$true] %s7963_s17 }
  0x9e   : > { %v8089_v3 = vcombine.high %v303_v0, %v305_v1  ;;  %v8088_v5 = vcombine.low %v303_v0, %v305_v1  ;;  %v307_v6 = vld [vmem:[#allocation5 + $0x80] sm:$0xff]  ;;  %v8091_v8 = vcombine.high %v304_v2, %v306_v4  ;;  %v8090_v9 = vcombine.low %v304_v2, %v306_v4  ;;  %v308_v11 = vld [vmem:[#allocation5 + $0x88] sm:$0xff]  ;;  %s7949_s24 = scalar_lea.sflag [#allocation4], %s10502_s11  ;;  %s10174_s27 = scalar_lea.vmem %s10700_s17, 512 }
  0x9f   : > { %v309_v7 = vld [vmem:[#allocation5 + $0xc0] sm:$0xff]  ;;  %v310_v12 = vld [vmem:[#allocation5 + $0xc8] sm:$0xff]  ;;  %p10175_p6 = scmp.ne.s32.totalorder %s10700_s17, %s10174_s27  ;;  %p10765_p0 = scmp.ne.s32.totalorder %s10757_s23, 0 }
  0xa0   : > { %v8093_v10 = vcombine.high %v307_v6, %v309_v7  ;;  %v311_v13 = vld [vmem:[#allocation5 + $0x100] sm:$0xff]  ;;  %1093 = vmatprep.subr.bf16.mxu0 %v8089_v3  ;;  %v8095_v14 = vcombine.high %v308_v11, %v310_v12  ;;  %v312_v16 = vld [vmem:[#allocation5 + $0x108] sm:$0xff]  ;;  %1175 = vmatprep.subr.bf16.mxu1 %v8091_v8  ;;  %v8092_v18 = vcombine.low %v307_v6, %v309_v7  ;;  %s10259_s14 = smov [#allocation11]  }
  0xa1   : > { %v313_v15 = vld [vmem:[#allocation5 + $0x140] sm:$0xff]  ;;  %v314_v17 = vld [vmem:[#allocation5 + $0x148] sm:$0xff]  ;;  %1094 = vmatpush1.bf16.msra.mxu0 %v8088_v5  ;;  %1176 = vmatpush1.bf16.msra.mxu1 %v8090_v9  ;;  %v8094_v19 = vcombine.low %v308_v11, %v310_v12  ;;  %p10176_p2 = pnand %p10175_p6, %p10765_p0  ;;  %s10178_s10 = sshll.u32 %s10259_s14, 4  ;;  %s10179_s10 = int_to_ptr.vmem [resolvable:$false] %s10178_s10 }
  0xa2   : > { %1095 = vmatprep.subr.bf16.mxu0 %v8093_v10  ;;  %v8097_v20 = vcombine.high %v311_v13, %v313_v15  ;;  %1177 = vmatprep.subr.bf16.mxu1 %v8095_v14  ;;  %v8099_v21 = vcombine.high %v312_v16, %v314_v17  ;;  %v315_v22 = vld [vmem:[#allocation5 + $0x180] sm:$0xff]  ;;  %v316_v24 = vld [vmem:[#allocation5 + $0x188] sm:$0xff]  ;;  %v8096_v26 = vcombine.low %v311_v13, %v313_v15  ;;  %s10180_s15 = scalar_lea.vmem %s10179_s10, 1024  ;;  %p10181_p10 = scmp.lt.s32.totalorder %s10700_s17, %s10179_s10 }
  0xa3   : > { %v317_v23 = vld [vmem:[#allocation5 + $0x1c0] sm:$0xff]  ;;  %v318_v25 = vld [vmem:[#allocation5 + $0x1c8] sm:$0xff]  ;;  %v8098_v27 = vcombine.low %v312_v16, %v314_v17  ;;  %p10177_p5 = pneg %p10176_p2  ;;  %p10182_p11 = scmp.lt.s32.totalorder %s10180_s15, %s10174_s27 }
  0xa4   : > { %v8101_v28 = vcombine.high %v315_v22, %v317_v23  ;;  %v8103_v29 = vcombine.high %v316_v24, %v318_v25  ;;  %v319_v30 = vld [vmem:[#allocation5 + $0x200] sm:$0xff]  ;;  %v320_v32 = vld [vmem:[#allocation5 + $0x208] sm:$0xff]  ;;  %v8100_v34 = vcombine.low %v315_v22, %v317_v23  ;;  %v8102_v35 = vcombine.low %v316_v24, %v318_v25 }
  0xa5   : > { %1096 = vmatpush1.bf16.msra.mxu0 %v8092_v18  ;;  %1178 = vmatpush1.bf16.msra.mxu1 %v8094_v19  ;;  %v321_v31 = vld [vmem:[#allocation5 + $0x240] sm:$0xff]  ;;  %v322_v33 = vld [vmem:[#allocation5 + $0x248] sm:$0xff]  ;;  %p10183_p3 = por %p10182_p11, %p10181_p10 }
  0xa6   : > { %1097 = vmatprep.subr.bf16.mxu0 %v8097_v20  ;;  %1179 = vmatprep.subr.bf16.mxu1 %v8099_v21  ;;  %v8105_v36 = vcombine.high %v319_v30, %v321_v31  ;;  %v8107_v37 = vcombine.high %v320_v32, %v322_v33  ;;  %v323_v38 = vld [vmem:[#allocation5 + $0x280] sm:$0xff]  ;;  %v324_v40 = vld [vmem:[#allocation5 + $0x288] sm:$0xff]  ;;  %v8104_v42 = vcombine.low %v319_v30, %v321_v31 }
  0xa7   : > { %v325_v39 = vld [vmem:[#allocation5 + $0x2c0] sm:$0xff]  ;;  %v326_v41 = vld [vmem:[#allocation5 + $0x2c8] sm:$0xff]  ;;  %v8106_v43 = vcombine.low %v320_v32, %v322_v33  ;;  %p10184_p12 = pnand %p10183_p3, %p10177_p5 }
  0xa8   : > { %v8109_v44 = vcombine.high %v323_v38, %v325_v39  ;;  %v8111_v45 = vcombine.high %v324_v40, %v326_v41  ;;  %v327_v46 = vld [vmem:[#allocation5 + $0x300] sm:$0xff]  ;;  %v328_v48 = vld [vmem:[#allocation5 + $0x308] sm:$0xff]  ;;  %v8108_v50 = vcombine.low %v323_v38, %v325_v39  ;;  %v8110_v51 = vcombine.low %v324_v40, %v326_v41 }
  0xa9   : > { %1098 = vmatpush1.bf16.msra.mxu0 %v8096_v26  ;;  %1180 = vmatpush1.bf16.msra.mxu1 %v8098_v27  ;;  %v329_v47 = vld [vmem:[#allocation5 + $0x340] sm:$0xff]  ;;  %v330_v49 = vld [vmem:[#allocation5 + $0x348] sm:$0xff] }
  0xaa   : > { %1099 = vmatprep.subr.bf16.mxu0 %v8101_v28  ;;  %1181 = vmatprep.subr.bf16.mxu1 %v8103_v29  ;;  %v8113_v52 = vcombine.high %v327_v46, %v329_v47  ;;  %v296_v53 = vld [vmem:[%s10508_s13 + $0x8] sm:$0xff]  ;;  %v8115_v54 = vcombine.high %v328_v48, %v330_v49  ;;  %v331_v55 = vld [vmem:[#allocation5 + $0x380] sm:$0xff]  ;;  %v8112_v60 = vcombine.low %v327_v46, %v329_v47 }
  0xab   : > { %v333_v56 = vld [vmem:[#allocation5 + $0x3c0] sm:$0xff]  ;;  %v10523_v57 = vpack.c.bf16 %v296_v53, %v296_v53  ;;  %v332_v58 = vld [vmem:[#allocation5 + $0x388] sm:$0xff]  ;;  %v8114_v61 = vcombine.low %v328_v48, %v330_v49 }
  0xac   : > { %v334_v59 = vld [vmem:[#allocation5 + $0x3c8] sm:$0xff]  ;;  %v8117_v62 = vcombine.high %v331_v55, %v333_v56  ;;  %v335_v0 = vld [vmem:[#allocation5 + $0x400] sm:$0xff]  ;;  %v8116_v4 = vcombine.low %v331_v55, %v333_v56 }
  0xad   : > { %1100 = vmatpush1.bf16.msra.mxu0 %v8100_v34  ;;  %1182 = vmatpush1.bf16.msra.mxu1 %v8102_v35  ;;  %v8119_v63 = vcombine.high %v332_v58, %v334_v59  ;;  %v337_v1 = vld [vmem:[#allocation5 + $0x440] sm:$0xff]  ;;  %v336_v2 = vld [vmem:[#allocation5 + $0x408] sm:$0xff]  ;;  %v8118_v5 = vcombine.low %v332_v58, %v334_v59 }
  0xae   : > { %1101 = vmatprep.subr.bf16.mxu0 %v8105_v36  ;;  %1183 = vmatprep.subr.bf16.mxu1 %v8107_v37  ;;  %v338_v3 = vld [vmem:[#allocation5 + $0x448] sm:$0xff]  ;;  %v8121_v6 = vcombine.high %v335_v0, %v337_v1  ;;  %v339_v8 = vld [vmem:[#allocation5 + $0x480] sm:$0xff]  ;;  %v8120_v12 = vcombine.low %v335_v0, %v337_v1 }
  0xaf   : > { %1125 = vmatprep.mubr.bf16.mxu0 %v10523_v57  ;;  %1207 = vmatprep.mubr.bf16.mxu1 %v10523_v57  ;;  %v8123_v7 = vcombine.high %v336_v2, %v338_v3  ;;  %v341_v9 = vld [vmem:[#allocation5 + $0x4c0] sm:$0xff]  ;;  %v340_v10 = vld [vmem:[#allocation5 + $0x488] sm:$0xff]  ;;  %v8122_v13 = vcombine.low %v336_v2, %v338_v3 }
  0xb0   : > { %v342_v11 = vld [vmem:[#allocation5 + $0x4c8] sm:$0xff]  ;;  %v8125_v14 = vcombine.high %v339_v8, %v341_v9  ;;  %v343_v16 = vld [vmem:[#allocation5 + $0x500] sm:$0xff]  ;;  %v8124_v20 = vcombine.low %v339_v8, %v341_v9 }
  0xb1   : > { %1102 = vmatpush1.bf16.msra.mxu0 %v8104_v42  ;;  %1184 = vmatpush1.bf16.msra.mxu1 %v8106_v43  ;;  %v8127_v15 = vcombine.high %v340_v10, %v342_v11  ;;  %v345_v17 = vld [vmem:[#allocation5 + $0x540] sm:$0xff]  ;;  %v344_v18 = vld [vmem:[#allocation5 + $0x508] sm:$0xff]  ;;  %v8126_v21 = vcombine.low %v340_v10, %v342_v11 }
  0xb2   : > { %1103 = vmatprep.subr.bf16.mxu0 %v8109_v44  ;;  %1185 = vmatprep.subr.bf16.mxu1 %v8111_v45  ;;  %v346_v19 = vld [vmem:[#allocation5 + $0x548] sm:$0xff]  ;;  %v8129_v22 = vcombine.high %v343_v16, %v345_v17  ;;  %v347_v24 = vld [vmem:[#allocation5 + $0x580] sm:$0xff]  ;;  %v8128_v28 = vcombine.low %v343_v16, %v345_v17 }
  0xb3   : > { %v8131_v23 = vcombine.high %v344_v18, %v346_v19  ;;  %v349_v25 = vld [vmem:[#allocation5 + $0x5c0] sm:$0xff]  ;;  %v348_v26 = vld [vmem:[#allocation5 + $0x588] sm:$0xff]  ;;  %v8130_v29 = vcombine.low %v344_v18, %v346_v19 }
  0xb4   : > { %v350_v27 = vld [vmem:[#allocation5 + $0x5c8] sm:$0xff]  ;;  %v8133_v30 = vcombine.high %v347_v24, %v349_v25  ;;  %v351_v32 = vld [vmem:[#allocation5 + $0x600] sm:$0xff]  ;;  %v8132_v36 = vcombine.low %v347_v24, %v349_v25 }
  0xb5   : > { %1104 = vmatpush1.bf16.msra.mxu0 %v8108_v50  ;;  %1186 = vmatpush1.bf16.msra.mxu1 %v8110_v51  ;;  %v8135_v31 = vcombine.high %v348_v26, %v350_v27  ;;  %v353_v33 = vld [vmem:[#allocation5 + $0x640] sm:$0xff]  ;;  %v352_v34 = vld [vmem:[#allocation5 + $0x608] sm:$0xff]  ;;  %v8134_v37 = vcombine.low %v348_v26, %v350_v27 }
  0xb6   : > { %1105 = vmatprep.subr.bf16.mxu0 %v8113_v52  ;;  %1187 = vmatprep.subr.bf16.mxu1 %v8115_v54  ;;  %v354_v35 = vld [vmem:[#allocation5 + $0x648] sm:$0xff]  ;;  %v8137_v38 = vcombine.high %v351_v32, %v353_v33  ;;  %v355_v40 = vld [vmem:[#allocation5 + $0x680] sm:$0xff]  ;;  %v8136_v44 = vcombine.low %v351_v32, %v353_v33 }
  0xb7   : > { %v8139_v39 = vcombine.high %v352_v34, %v354_v35  ;;  %v357_v41 = vld [vmem:[#allocation5 + $0x6c0] sm:$0xff]  ;;  %v356_v42 = vld [vmem:[#allocation5 + $0x688] sm:$0xff]  ;;  %v8138_v45 = vcombine.low %v352_v34, %v354_v35 }
  0xb8   : > { %v358_v43 = vld [vmem:[#allocation5 + $0x6c8] sm:$0xff]  ;;  %v8141_v46 = vcombine.high %v355_v40, %v357_v41  ;;  %v359_v48 = vld [vmem:[#allocation5 + $0x700] sm:$0xff]  ;;  %v8140_v52 = vcombine.low %v355_v40, %v357_v41 }
  0xb9   : > { %1106 = vmatpush1.bf16.msra.mxu0 %v8112_v60  ;;  %1188 = vmatpush1.bf16.msra.mxu1 %v8114_v61  ;;  %v8143_v47 = vcombine.high %v356_v42, %v358_v43  ;;  %v361_v49 = vld [vmem:[#allocation5 + $0x740] sm:$0xff]  ;;  %v360_v50 = vld [vmem:[#allocation5 + $0x708] sm:$0xff]  ;;  %v8142_v53 = vcombine.low %v356_v42, %v358_v43 }
  0xba   : > { %1107 = vmatprep.subr.bf16.mxu0 %v8117_v62  ;;  %1189 = vmatprep.subr.bf16.mxu1 %v8119_v63  ;;  %v362_v51 = vld [vmem:[#allocation5 + $0x748] sm:$0xff]  ;;  %v8145_v54 = vcombine.high %v359_v48, %v361_v49  ;;  %v363_v56 = vld [vmem:[#allocation5 + $0x780] sm:$0xff]  ;;  %v8144_v61 = vcombine.low %v359_v48, %v361_v49 }
  0xbb   : > { %v8147_v55 = vcombine.high %v360_v50, %v362_v51  ;;  %v365_v58 = vld [vmem:[#allocation5 + $0x7c0] sm:$0xff]  ;;  %v364_v59 = vld [vmem:[#allocation5 + $0x788] sm:$0xff]  ;;  %v8146_v62 = vcombine.low %v360_v50, %v362_v51 }
  0xbc   : > { %v366_v60 = vld [vmem:[#allocation5 + $0x7c8] sm:$0xff]  ;;  %v8149_v63 = vcombine.high %v363_v56, %v365_v58  ;;  %v367_v1 = vld [vmem:[#allocation5 + $0x800] sm:$0xff] }
  0xbd   : > { %1108 = vmatpush1.bf16.msra.mxu0 %v8116_v4  ;;  %1190 = vmatpush1.bf16.msra.mxu1 %v8118_v5  ;;  %v8151_v0 = vcombine.high %v364_v59, %v366_v60  ;;  %v369_v2 = vld [vmem:[#allocation5 + $0x840] sm:$0xff]  ;;  %v368_v3 = vld [vmem:[#allocation5 + $0x808] sm:$0xff]  ;;  %v8148_v5 = vcombine.low %v363_v56, %v365_v58 }
  0xbe   : > { %1109 = vmatprep.subr.bf16.mxu0 %v8121_v6  ;;  %1191 = vmatprep.subr.bf16.mxu1 %v8123_v7  ;;  %v370_v4 = vld [vmem:[#allocation5 + $0x848] sm:$0xff]  ;;  %v295_v6 = vld [vmem:[%s10508_s13] sm:$0xff]  ;;  %v8150_v7 = vcombine.low %v364_v59, %v366_v60  ;;  %v8153_v8 = vcombine.high %v367_v1, %v369_v2  ;;  %v8152_v16 = vcombine.low %v367_v1, %v369_v2 }
  0xbf   : > { %v8155_v9 = vcombine.high %v368_v3, %v370_v4  ;;  %v371_v10 = vld [vmem:[#allocation5 + $0x880] sm:$0xff]  ;;  %v8154_v17 = vcombine.low %v368_v3, %v370_v4  ;;  %v382_v32 = vld [vmem:[#allocation5 + $0x9c8] sm:$0xff] }
  0xc0   : > { %v373_v11 = vld [vmem:[#allocation5 + $0x8c0] sm:$0xff]  ;;  %v386_v40 = vld [vmem:[#allocation5 + $0xa48] sm:$0xff] }
  0xc1   : > { %1110 = vmatpush1.bf16.msra.mxu0 %v8120_v12  ;;  %1192 = vmatpush1.bf16.msra.mxu1 %v8122_v13  ;;  %v10528_v12 = vpack.c.bf16 %v295_v6, %v295_v6  ;;  %v372_v13 = vld [vmem:[#allocation5 + $0x888] sm:$0xff]  ;;  %v8157_v18 = vcombine.high %v371_v10, %v373_v11  ;;  %v375_v19 = vld [vmem:[#allocation5 + $0x900] sm:$0xff]  ;;  %v8156_v25 = vcombine.low %v371_v10, %v373_v11 }
  0xc2   : > { %1111 = vmatprep.subr.bf16.mxu0 %v8125_v14  ;;  %1193 = vmatprep.subr.bf16.mxu1 %v8127_v15  ;;  %v374_v14 = vld [vmem:[#allocation5 + $0x8c8] sm:$0xff]  ;;  %v298_v15 = vld [vmem:[%s10508_s13 + $0x18] sm:$0xff]  ;;  %v401_v6 = vld [vmem:[#allocation5 + $0xc40] sm:$0xff] }
  0xc3   : > { %v10531_v24 = vpack.c.bf16 %v298_v15, %v298_v15  ;;  %v8158_v26 = vcombine.low %v372_v13, %v374_v14  ;;  %v390_v48 = vld [vmem:[#allocation5 + $0xac8] sm:$0xff]  ;;  %v405_v15 = vld [vmem:[#allocation5 + $0xcc0] sm:$0xff] }
  0xc4   : > { %v394_v56 = vld [vmem:[#allocation5 + $0xb48] sm:$0xff] }
  0xc5   : > { %1112 = vmatpush1.bf16.msra.mxu0 %v8124_v20  ;;  %1194 = vmatpush1.bf16.msra.mxu1 %v8126_v21  ;;  %v377_v20 = vld [vmem:[#allocation5 + $0x940] sm:$0xff]  ;;  %v8159_v21 = vcombine.high %v372_v13, %v374_v14  ;;  %v398_v1 = vld [vmem:[#allocation5 + $0xbc8] sm:$0xff] }
  0xc6   : > { %1113 = vmatprep.subr.bf16.mxu0 %v8129_v22  ;;  %1195 = vmatprep.subr.bf16.mxu1 %v8131_v23  ;;  %v376_v22 = vld [vmem:[#allocation5 + $0x908] sm:$0xff]  ;;  %v8161_v27 = vcombine.high %v375_v19, %v377_v20  ;;  %v8160_v33 = vcombine.low %v375_v19, %v377_v20  ;;  %v403_v14 = vld [vmem:[#allocation5 + $0xc80] sm:$0xff] }
  0xc7   : > { %v378_v23 = vld [vmem:[#allocation5 + $0x948] sm:$0xff] }
  0xc8   : > { %v8162_v34 = vcombine.low %v376_v22, %v378_v23 }
  0xc9   : > { %1114 = vmatpush1.bf16.msra.mxu0 %v8128_v28  ;;  %1196 = vmatpush1.bf16.msra.mxu1 %v8130_v29  ;;  %v379_v28 = vld [vmem:[#allocation5 + $0x980] sm:$0xff] }
  0xca   : > { %1115 = vmatprep.subr.bf16.mxu0 %v8133_v30  ;;  %1197 = vmatprep.subr.bf16.mxu1 %v8135_v31  ;;  %v381_v29 = vld [vmem:[#allocation5 + $0x9c0] sm:$0xff]  ;;  %v380_v30 = vld [vmem:[#allocation5 + $0x988] sm:$0xff]  ;;  %v8163_v31 = vcombine.high %v376_v22, %v378_v23 }
  0xcb   : > { %v8165_v35 = vcombine.high %v379_v28, %v381_v29  ;;  %v8164_v41 = vcombine.low %v379_v28, %v381_v29  ;;  %v8166_v42 = vcombine.low %v380_v30, %v382_v32  ;;  %v407_v22 = vld [vmem:[#allocation5 + $0xd00] sm:$0xff]  ;;  %v8188_v28 = vcombine.low %v403_v14, %v405_v15 }
  0xcc   : > { %v409_v23 = vld [vmem:[#allocation5 + $0xd40] sm:$0xff] }
  0xcd   : > { %1116 = vmatpush1.bf16.msra.mxu0 %v8132_v36  ;;  %1198 = vmatpush1.bf16.msra.mxu1 %v8134_v37  ;;  %v383_v36 = vld [vmem:[#allocation5 + $0xa00] sm:$0xff] }
  0xce   : > { %1117 = vmatprep.subr.bf16.mxu0 %v8137_v38  ;;  %1199 = vmatprep.subr.bf16.mxu1 %v8139_v39  ;;  %v385_v37 = vld [vmem:[#allocation5 + $0xa40] sm:$0xff]  ;;  %v384_v38 = vld [vmem:[#allocation5 + $0xa08] sm:$0xff]  ;;  %v8167_v39 = vcombine.high %v380_v30, %v382_v32  ;;  %v8193_v30 = vcombine.high %v407_v22, %v409_v23 }
  0xcf   : > { %v8169_v43 = vcombine.high %v383_v36, %v385_v37  ;;  %v8168_v49 = vcombine.low %v383_v36, %v385_v37  ;;  %v8170_v50 = vcombine.low %v384_v38, %v386_v40  ;;  %v413_v32 = vld [vmem:[#allocation5 + $0xdc0] sm:$0xff]  ;;  %v8192_v36 = vcombine.low %v407_v22, %v409_v23  ;;  %v1400_v22 = vld [vmem:[#allocation5 + $0xd8] sm:$0xff] }
  0xd1   : > { %1118 = vmatpush1.bf16.msra.mxu0 %v8136_v44  ;;  %1200 = vmatpush1.bf16.msra.mxu1 %v8138_v45  ;;  %v387_v44 = vld [vmem:[#allocation5 + $0xa80] sm:$0xff] }
  0xd2   : > { %1119 = vmatprep.subr.bf16.mxu0 %v8141_v46  ;;  %1201 = vmatprep.subr.bf16.mxu1 %v8143_v47  ;;  %v389_v45 = vld [vmem:[#allocation5 + $0xac0] sm:$0xff]  ;;  %v388_v46 = vld [vmem:[#allocation5 + $0xa88] sm:$0xff]  ;;  %v8171_v47 = vcombine.high %v384_v38, %v386_v40 }
  0xd3   : > { %v8173_v51 = vcombine.high %v387_v44, %v389_v45  ;;  %v8172_v58 = vcombine.low %v387_v44, %v389_v45  ;;  %v8174_v59 = vcombine.low %v388_v46, %v390_v48  ;;  %v417_v40 = vld [vmem:[#allocation5 + $0xe40] sm:$0xff] }
  0xd5   : > { %1120 = vmatpush1.bf16.msra.mxu0 %v8140_v52  ;;  %1202 = vmatpush1.bf16.msra.mxu1 %v8142_v53  ;;  %v391_v52 = vld [vmem:[#allocation5 + $0xb00] sm:$0xff] }
  0xd6   : > { %1121 = vmatprep.subr.bf16.mxu0 %v8145_v54  ;;  %1203 = vmatprep.subr.bf16.mxu1 %v8147_v55  ;;  %v393_v53 = vld [vmem:[#allocation5 + $0xb40] sm:$0xff]  ;;  %v392_v54 = vld [vmem:[#allocation5 + $0xb08] sm:$0xff]  ;;  %v8175_v55 = vcombine.high %v388_v46, %v390_v48 }
  0xd7   : > { %v8177_v60 = vcombine.high %v391_v52, %v393_v53  ;;  %v8176_v2 = vcombine.low %v391_v52, %v393_v53  ;;  %v8178_v3 = vcombine.low %v392_v54, %v394_v56  ;;  %v421_v48 = vld [vmem:[#allocation5 + $0xec0] sm:$0xff] }
  0xd9   : > { %1122 = vmatpush1.bf16.msra.mxu0 %v8144_v61  ;;  %1204 = vmatpush1.bf16.msra.mxu1 %v8146_v62  ;;  %v395_v61 = vld [vmem:[#allocation5 + $0xb80] sm:$0xff] }
  0xda   : > { %1123 = vmatprep.subr.bf16.mxu0 %v8149_v63  ;;  %1205 = vmatprep.subr.bf16.mxu1 %v8151_v0  ;;  %v397_v62 = vld [vmem:[#allocation5 + $0xbc0] sm:$0xff]  ;;  %v396_v63 = vld [vmem:[#allocation5 + $0xb88] sm:$0xff]  ;;  %v8179_v0 = vcombine.high %v392_v54, %v394_v56 }
  0xdb   : > { %v8181_v4 = vcombine.high %v395_v61, %v397_v62  ;;  %v8180_v10 = vcombine.low %v395_v61, %v397_v62  ;;  %v8182_v11 = vcombine.low %v396_v63, %v398_v1  ;;  %v425_v56 = vld [vmem:[#allocation5 + $0xf40] sm:$0xff] }
  0xdd   : > { %1124 = vmatpush1.bf16.msra.mxu0 %v8148_v5  ;;  %1206 = vmatpush1.bf16.msra.mxu1 %v8150_v7  ;;  %v399_v5 = vld [vmem:[#allocation5 + $0xc00] sm:$0xff]  ;;  %v400_v7 = vld [vmem:[#allocation5 + $0xc08] sm:$0xff] }
  0xde   : > { %1134 = vmatprep.subr.bf16.mxu0 %v8153_v8  ;;  %1216 = vmatprep.subr.bf16.mxu1 %v8155_v9  ;;  %v8183_v8 = vcombine.high %v396_v63, %v398_v1  ;;  %v402_v9 = vld [vmem:[#allocation5 + $0xc48] sm:$0xff]  ;;  %v8185_v13 = vcombine.high %v399_v5, %v401_v6  ;;  %v8184_v19 = vcombine.low %v399_v5, %v401_v6  ;;  %v429_v1 = vld [vmem:[#allocation5 + $0xfc0] sm:$0xff] }
  0xdf   : > { %v8186_v20 = vcombine.low %v400_v7, %v402_v9 }
  0xe0   : > { %1126 = vmatmul.mubr.bf16.vlgmr.msra.gmra.mrb[0].mxu0 %v10528_v12  ;;  %1208 = vmatmul.mubr.bf16.vlgmr.msra.gmra.mrb[0].mxu1 %v10528_v12 }
  0xe1   : > { %1135 = vmatpush1.bf16.msra.mxu0 %v8152_v16  ;;  %1217 = vmatpush1.bf16.msra.mxu1 %v8154_v17  ;;  %v404_v16 = vld [vmem:[#allocation5 + $0xc88] sm:$0xff]  ;;  %v8187_v17 = vcombine.high %v400_v7, %v402_v9  ;;  %v1395_v9 = vld [vmem:[#allocation5 + $0x50] sm:$0xff] }
  0xe2   : > { %1136 = vmatprep.subr.bf16.mxu0 %v8157_v18  ;;  %1218 = vmatprep.subr.bf16.mxu1 %v8159_v21  ;;  %v406_v18 = vld [vmem:[#allocation5 + $0xcc8] sm:$0xff]  ;;  %v8189_v21 = vcombine.high %v403_v14, %v405_v15  ;;  %v1396_v14 = vld [vmem:[#allocation5 + $0x58] sm:$0xff] }
  0xe3   : > { %1166 = vmatprep.mubr.bf16.mxu0 %v10531_v24  ;;  %1248 = vmatprep.mubr.bf16.mxu1 %v10531_v24  ;;  %v8190_v29 = vcombine.low %v404_v16, %v406_v18 }
  0xe5   : > { %1137 = vmatpush1.bf16.msra.mxu0 %v8156_v25  ;;  %1219 = vmatpush1.bf16.msra.mxu1 %v8158_v26  ;;  %v408_v25 = vld [vmem:[#allocation5 + $0xd08] sm:$0xff]  ;;  %v8191_v26 = vcombine.high %v404_v16, %v406_v18  ;;  %v1397_v18 = vld [vmem:[#allocation5 + $0x90] sm:$0xff] }
  0xe6   : > { %1138 = vmatprep.subr.bf16.mxu0 %v8161_v27  ;;  %1220 = vmatprep.subr.bf16.mxu1 %v8163_v31  ;;  %v410_v27 = vld [vmem:[#allocation5 + $0xd48] sm:$0xff]  ;;  %v411_v31 = vld [vmem:[#allocation5 + $0xd80] sm:$0xff] }
  0xe7   : > { %v8194_v37 = vcombine.low %v408_v25, %v410_v27  ;;  %v8197_v38 = vcombine.high %v411_v31, %v413_v32  ;;  %v8196_v44 = vcombine.low %v411_v31, %v413_v32  ;;  %v1404_v31 = vld [vmem:[#allocation5 + $0x158] sm:$0xff] }
  0xe9   : > { %1139 = vmatpush1.bf16.msra.mxu0 %v8160_v33  ;;  %1221 = vmatpush1.bf16.msra.mxu1 %v8162_v34  ;;  %v412_v33 = vld [vmem:[#allocation5 + $0xd88] sm:$0xff]  ;;  %v8195_v34 = vcombine.high %v408_v25, %v410_v27  ;;  %v1403_v27 = vld [vmem:[#allocation5 + $0x150] sm:$0xff] }
  0xea   : > { %1140 = vmatprep.subr.bf16.mxu0 %v8165_v35  ;;  %1222 = vmatprep.subr.bf16.mxu1 %v8167_v39  ;;  %v414_v35 = vld [vmem:[#allocation5 + $0xdc8] sm:$0xff]  ;;  %v415_v39 = vld [vmem:[#allocation5 + $0xe00] sm:$0xff] }
  0xeb   : > { %v8198_v45 = vcombine.low %v412_v33, %v414_v35  ;;  %v8201_v46 = vcombine.high %v415_v39, %v417_v40  ;;  %v8200_v52 = vcombine.low %v415_v39, %v417_v40  ;;  %v1408_v39 = vld [vmem:[#allocation5 + $0x1d8] sm:$0xff] }
  0xed   : > { %1141 = vmatpush1.bf16.msra.mxu0 %v8164_v41  ;;  %1223 = vmatpush1.bf16.msra.mxu1 %v8166_v42  ;;  %v416_v41 = vld [vmem:[#allocation5 + $0xe08] sm:$0xff]  ;;  %v8199_v42 = vcombine.high %v412_v33, %v414_v35  ;;  %v1407_v35 = vld [vmem:[#allocation5 + $0x1d0] sm:$0xff] }
  0xee   : > { %1142 = vmatprep.subr.bf16.mxu0 %v8169_v43  ;;  %1224 = vmatprep.subr.bf16.mxu1 %v8171_v47  ;;  %v418_v43 = vld [vmem:[#allocation5 + $0xe48] sm:$0xff]  ;;  %v419_v47 = vld [vmem:[#allocation5 + $0xe80] sm:$0xff] }
  0xef   : > { %v8202_v53 = vcombine.low %v416_v41, %v418_v43  ;;  %v8205_v54 = vcombine.high %v419_v47, %v421_v48  ;;  %v8204_v61 = vcombine.low %v419_v47, %v421_v48  ;;  %v1412_v47 = vld [vmem:[#allocation5 + $0x258] sm:$0xff] }
  0xf1   : > { %1143 = vmatpush1.bf16.msra.mxu0 %v8168_v49  ;;  %1225 = vmatpush1.bf16.msra.mxu1 %v8170_v50  ;;  %v420_v49 = vld [vmem:[#allocation5 + $0xe88] sm:$0xff]  ;;  %v8203_v50 = vcombine.high %v416_v41, %v418_v43  ;;  %v1411_v43 = vld [vmem:[#allocation5 + $0x250] sm:$0xff] }
  0xf2   : > { %1144 = vmatprep.subr.bf16.mxu0 %v8173_v51  ;;  %1226 = vmatprep.subr.bf16.mxu1 %v8175_v55  ;;  %v422_v51 = vld [vmem:[#allocation5 + $0xec8] sm:$0xff]  ;;  %v423_v55 = vld [vmem:[#allocation5 + $0xf00] sm:$0xff] }
  0xf3   : > { %v8206_v62 = vcombine.low %v420_v49, %v422_v51  ;;  %v8209_v63 = vcombine.high %v423_v55, %v425_v56  ;;  %v8208_v5 = vcombine.low %v423_v55, %v425_v56  ;;  %v1416_v55 = vld [vmem:[#allocation5 + $0x2d8] sm:$0xff] }
  0xf5   : > { %1145 = vmatpush1.bf16.msra.mxu0 %v8172_v58  ;;  %1227 = vmatpush1.bf16.msra.mxu1 %v8174_v59  ;;  %v424_v58 = vld [vmem:[#allocation5 + $0xf08] sm:$0xff]  ;;  %v8207_v59 = vcombine.high %v420_v49, %v422_v51  ;;  %v1415_v51 = vld [vmem:[#allocation5 + $0x2d0] sm:$0xff] }
  0xf6   : > { %1146 = vmatprep.subr.bf16.mxu0 %v8177_v60  ;;  %1228 = vmatprep.subr.bf16.mxu1 %v8179_v0  ;;  %v426_v60 = vld [vmem:[#allocation5 + $0xf48] sm:$0xff]  ;;  %v427_v0 = vld [vmem:[#allocation5 + $0xf80] sm:$0xff] }
  0xf7   : > { %v8210_v6 = vcombine.low %v424_v58, %v426_v60  ;;  %v8213_v7 = vcombine.high %v427_v0, %v429_v1  ;;  %v8212_v15 = vcombine.low %v427_v0, %v429_v1  ;;  %v1420_v0 = vld [vmem:[#allocation5 + $0x358] sm:$0xff] }
  0xf9   : > { %1147 = vmatpush1.bf16.msra.mxu0 %v8176_v2  ;;  %1229 = vmatpush1.bf16.msra.mxu1 %v8178_v3  ;;  %v428_v2 = vld [vmem:[#allocation5 + $0xf88] sm:$0xff]  ;;  %v8211_v3 = vcombine.high %v424_v58, %v426_v60  ;;  %v1419_v60 = vld [vmem:[#allocation5 + $0x350] sm:$0xff] }
  0xfa   : > { %1148 = vmatprep.subr.bf16.mxu0 %v8181_v4  ;;  %1230 = vmatprep.subr.bf16.mxu1 %v8183_v8  ;;  %v430_v4 = vld [vmem:[#allocation5 + $0xfc8] sm:$0xff]  ;;  %v1393_v8 = vld [vmem:[#allocation5 + $0x10] sm:$0xff] }
  0xfb   : > { %v8214_v16 = vcombine.low %v428_v2, %v430_v4  ;;  %v8216_v25 = vcombine.low %v1393_v8, %v1395_v9 }
  0xfd   : > { %1149 = vmatpush1.bf16.msra.mxu0 %v8180_v10  ;;  %1231 = vmatpush1.bf16.msra.mxu1 %v8182_v11  ;;  %v1394_v10 = vld [vmem:[#allocation5 + $0x18] sm:$0xff]  ;;  %v8215_v11 = vcombine.high %v428_v2, %v430_v4  ;;  %v1423_v4 = vld [vmem:[#allocation5 + $0x3d0] sm:$0xff] }
  0xfe   : > { %1150 = vmatprep.subr.bf16.mxu0 %v8185_v13  ;;  %1232 = vmatprep.subr.bf16.mxu1 %v8187_v17  ;;  %v297_v13 = vld [vmem:[%s10508_s13 + $0x10] sm:$0xff]  ;;  %v8217_v17 = vcombine.high %v1393_v8, %v1395_v9  ;;  %v1424_v8 = vld [vmem:[#allocation5 + $0x3d8] sm:$0xff] }
  0xff   : > { %v10538_v23 = vpack.c.bf16 %v297_v13, %v297_v13  ;;  %v1427_v13 = vld [vmem:[#allocation5 + $0x450] sm:$0xff] }
 0x101   : > { %1151 = vmatpush1.bf16.msra.mxu0 %v8184_v19  ;;  %1233 = vmatpush1.bf16.msra.mxu1 %v8186_v20  ;;  %v1399_v19 = vld [vmem:[#allocation5 + $0xd0] sm:$0xff]  ;;  %v1398_v20 = vld [vmem:[#allocation5 + $0x98] sm:$0xff] }
 0x102   : > { %1152 = vmatprep.subr.bf16.mxu0 %v8189_v21  ;;  %1234 = vmatprep.subr.bf16.mxu1 %v8191_v26  ;;  %v8219_v21 = vcombine.high %v1394_v10, %v1396_v14  ;;  %v1401_v26 = vld [vmem:[#allocation5 + $0x110] sm:$0xff]  ;;  %v8223_v32 = vcombine.high %v1398_v20, %v1400_v22  ;;  %v8220_v33 = vcombine.low %v1397_v18, %v1399_v19 }
 0x103   : > { %v8224_v41 = vcombine.low %v1401_v26, %v1403_v27 }
 0x105   : > { %1153 = vmatpush1.bf16.msra.mxu0 %v8188_v28  ;;  %1235 = vmatpush1.bf16.msra.mxu1 %v8190_v29  ;;  %v8218_v28 = vcombine.low %v1394_v10, %v1396_v14  ;;  %v8221_v29 = vcombine.high %v1397_v18, %v1399_v19 }
 0x106   : > { %1154 = vmatprep.subr.bf16.mxu0 %v8193_v30  ;;  %1236 = vmatprep.subr.bf16.mxu1 %v8195_v34  ;;  %v1402_v30 = vld [vmem:[#allocation5 + $0x118] sm:$0xff]  ;;  %v1405_v34 = vld [vmem:[#allocation5 + $0x190] sm:$0xff] }
 0x107   : > { %v8227_v40 = vcombine.high %v1402_v30, %v1404_v31  ;;  %v8228_v49 = vcombine.low %v1405_v34, %v1407_v35 }
 0x109   : > { %1155 = vmatpush1.bf16.msra.mxu0 %v8192_v36  ;;  %1237 = vmatpush1.bf16.msra.mxu1 %v8194_v37  ;;  %v8222_v36 = vcombine.low %v1398_v20, %v1400_v22  ;;  %v8225_v37 = vcombine.high %v1401_v26, %v1403_v27  ;;  %v1429_v20 = vld [vmem:[#allocation5 + $0x490] sm:$0xff]  ;;  %v1430_v26 = vld [vmem:[#allocation5 + $0x498] sm:$0xff] }
 0x10a   : > { %1156 = vmatprep.subr.bf16.mxu0 %v8197_v38  ;;  %1238 = vmatprep.subr.bf16.mxu1 %v8199_v42  ;;  %v1406_v38 = vld [vmem:[#allocation5 + $0x198] sm:$0xff]  ;;  %v1409_v42 = vld [vmem:[#allocation5 + $0x210] sm:$0xff] }
 0x10b   : > { %v8231_v48 = vcombine.high %v1406_v38, %v1408_v39  ;;  %v8232_v58 = vcombine.low %v1409_v42, %v1411_v43  ;;  %v1432_v27 = vld [vmem:[#allocation5 + $0x4d8] sm:$0xff] }
 0x10d   : > { %1157 = vmatpush1.bf16.msra.mxu0 %v8196_v44  ;;  %1239 = vmatpush1.bf16.msra.mxu1 %v8198_v45  ;;  %v8226_v44 = vcombine.low %v1402_v30, %v1404_v31  ;;  %v8229_v45 = vcombine.high %v1405_v34, %v1407_v35  ;;  %v1433_v30 = vld [vmem:[#allocation5 + $0x510] sm:$0xff]  ;;  %v1434_v34 = vld [vmem:[#allocation5 + $0x518] sm:$0xff] }
 0x10e   : > { %1158 = vmatprep.subr.bf16.mxu0 %v8201_v46  ;;  %1240 = vmatprep.subr.bf16.mxu1 %v8203_v50  ;;  %v1410_v46 = vld [vmem:[#allocation5 + $0x218] sm:$0xff]  ;;  %v1413_v50 = vld [vmem:[#allocation5 + $0x290] sm:$0xff] }
 0x10f   : > { %v8235_v56 = vcombine.high %v1410_v46, %v1412_v47  ;;  %v8236_v2 = vcombine.low %v1413_v50, %v1415_v51  ;;  %v1435_v31 = vld [vmem:[#allocation5 + $0x550] sm:$0xff]  ;;  %v1436_v35 = vld [vmem:[#allocation5 + $0x558] sm:$0xff] }
 0x111   : > { %1159 = vmatpush1.bf16.msra.mxu0 %v8200_v52  ;;  %1241 = vmatpush1.bf16.msra.mxu1 %v8202_v53  ;;  %v8230_v52 = vcombine.low %v1406_v38, %v1408_v39  ;;  %v8233_v53 = vcombine.high %v1409_v42, %v1411_v43  ;;  %v1437_v38 = vld [vmem:[#allocation5 + $0x590] sm:$0xff]  ;;  %v1438_v42 = vld [vmem:[#allocation5 + $0x598] sm:$0xff] }
 0x112   : > { %1160 = vmatprep.subr.bf16.mxu0 %v8205_v54  ;;  %1242 = vmatprep.subr.bf16.mxu1 %v8207_v59  ;;  %v1414_v54 = vld [vmem:[#allocation5 + $0x298] sm:$0xff]  ;;  %v1417_v59 = vld [vmem:[#allocation5 + $0x310] sm:$0xff] }
 0x113   : > { %v8239_v1 = vcombine.high %v1414_v54, %v1416_v55  ;;  %v8240_v10 = vcombine.low %v1417_v59, %v1419_v60  ;;  %v1439_v39 = vld [vmem:[#allocation5 + $0x5d0] sm:$0xff]  ;;  %v1440_v43 = vld [vmem:[#allocation5 + $0x5d8] sm:$0xff] }
 0x115   : > { %1161 = vmatpush1.bf16.msra.mxu0 %v8204_v61  ;;  %1243 = vmatpush1.bf16.msra.mxu1 %v8206_v62  ;;  %v8234_v61 = vcombine.low %v1410_v46, %v1412_v47  ;;  %v8237_v62 = vcombine.high %v1413_v50, %v1415_v51  ;;  %v1441_v46 = vld [vmem:[#allocation5 + $0x610] sm:$0xff]  ;;  %v1442_v50 = vld [vmem:[#allocation5 + $0x618] sm:$0xff] }
 0x116   : > { %1162 = vmatprep.subr.bf16.mxu0 %v8209_v63  ;;  %1244 = vmatprep.subr.bf16.mxu1 %v8211_v3  ;;  %v1418_v63 = vld [vmem:[#allocation5 + $0x318] sm:$0xff]  ;;  %v1421_v3 = vld [vmem:[#allocation5 + $0x390] sm:$0xff] }
 0x117   : > { %v8243_v9 = vcombine.high %v1418_v63, %v1420_v0  ;;  %v8242_v14 = vcombine.low %v1418_v63, %v1420_v0  ;;  %v8244_v19 = vcombine.low %v1421_v3, %v1423_v4  ;;  %v1443_v47 = vld [vmem:[#allocation5 + $0x650] sm:$0xff]  ;;  %v1444_v51 = vld [vmem:[#allocation5 + $0x658] sm:$0xff] }
 0x118   : > { %v1449_v63 = vld [vmem:[#allocation5 + $0x710] sm:$0xff] }
 0x119   : > { %1163 = vmatpush1.bf16.msra.mxu0 %v8208_v5  ;;  %1245 = vmatpush1.bf16.msra.mxu1 %v8210_v6  ;;  %v8238_v5 = vcombine.low %v1414_v54, %v1416_v55  ;;  %v8241_v6 = vcombine.high %v1417_v59, %v1419_v60  ;;  %v1445_v54 = vld [vmem:[#allocation5 + $0x690] sm:$0xff]  ;;  %v1446_v59 = vld [vmem:[#allocation5 + $0x698] sm:$0xff] }
 0x11a   : > { %1164 = vmatprep.subr.bf16.mxu0 %v8213_v7  ;;  %1246 = vmatprep.subr.bf16.mxu1 %v8215_v11  ;;  %v1422_v7 = vld [vmem:[#allocation5 + $0x398] sm:$0xff]  ;;  %v1425_v11 = vld [vmem:[#allocation5 + $0x410] sm:$0xff] }
 0x11b   : > { %v8247_v18 = vcombine.high %v1422_v7, %v1424_v8  ;;  %v8246_v22 = vcombine.low %v1422_v7, %v1424_v8  ;;  %v1447_v55 = vld [vmem:[#allocation5 + $0x6d0] sm:$0xff]  ;;  %v1448_v60 = vld [vmem:[#allocation5 + $0x6d8] sm:$0xff] }
 0x11c   : > { %v1451_v0 = vld [vmem:[#allocation5 + $0x750] sm:$0xff] }
 0x11d   : > { %1165 = vmatpush1.bf16.msra.mxu0 %v8212_v15  ;;  %1247 = vmatpush1.bf16.msra.mxu1 %v8214_v16  ;;  %v8245_v15 = vcombine.high %v1421_v3, %v1423_v4  ;;  %v1426_v16 = vld [vmem:[#allocation5 + $0x418] sm:$0xff]  ;;  %v1453_v7 = vld [vmem:[#allocation5 + $0x790] sm:$0xff] }
 0x11e   : > { %2183 = vmatprep.subr.bf16.mxu0 %v8217_v17  ;;  %2265 = vmatprep.subr.bf16.mxu1 %v8219_v21  ;;  %v1428_v17 = vld [vmem:[#allocation5 + $0x458] sm:$0xff]  ;;  %v1431_v21 = vld [vmem:[#allocation5 + $0x4d0] sm:$0xff] }
 0x11f   : > { %v1450_v3 = vld [vmem:[#allocation5 + $0x718] sm:$0xff]  ;;  %v1455_v8 = vld [vmem:[#allocation5 + $0x7d0] sm:$0xff] }
 0x120   : > { %1167 = vmatmul.mubr.bf16.vlgmr.msra.gmra.mrb[0].mxu0 %v10538_v23  ;;  %1249 = vmatmul.mubr.bf16.vlgmr.msra.gmra.mrb[0].mxu1 %v10538_v23  ;;  %v1452_v4 = vld [vmem:[#allocation5 + $0x758] sm:$0xff] }
 0x121   : > { %2184 = vmatpush1.bf16.msra.mxu0 %v8216_v25  ;;  %2266 = vmatpush1.bf16.msra.mxu1 %v8218_v28  ;;  %v8249_v25 = vcombine.high %v1425_v11, %v1427_v13  ;;  %v8251_v28 = vcombine.high %v1426_v16, %v1428_v17 }
 0x122   : > { %2185 = vmatprep.subr.bf16.mxu0 %v8221_v29  ;;  %2267 = vmatprep.subr.bf16.mxu1 %v8223_v32  ;;  %v8248_v29 = vcombine.low %v1425_v11, %v1427_v13  ;;  %v8250_v32 = vcombine.low %v1426_v16, %v1428_v17  ;;  %v1454_v11 = vld [vmem:[#allocation5 + $0x798] sm:$0xff]  ;;  %v1457_v16 = vld [vmem:[#allocation5 + $0x810] sm:$0xff] }
 0x123   : > { %2215 = vmatprep.mubr.bf16.mxu0 %v10523_v57  ;;  %2297 = vmatprep.mubr.bf16.mxu1 %v10523_v57  ;;  %v1456_v13 = vld [vmem:[#allocation5 + $0x7d8] sm:$0xff]  ;;  %v1459_v17 = vld [vmem:[#allocation5 + $0x850] sm:$0xff] }
 0x125   : > { %2186 = vmatpush1.bf16.msra.mxu0 %v8220_v33  ;;  %2268 = vmatpush1.bf16.msra.mxu1 %v8222_v36  ;;  %v8253_v33 = vcombine.high %v1429_v20, %v1431_v21  ;;  %v8255_v36 = vcombine.high %v1430_v26, %v1432_v27 }
 0x126   : > { %2187 = vmatprep.subr.bf16.mxu0 %v8225_v37  ;;  %2269 = vmatprep.subr.bf16.mxu1 %v8227_v40  ;;  %v8252_v37 = vcombine.low %v1429_v20, %v1431_v21  ;;  %v8254_v40 = vcombine.low %v1430_v26, %v1432_v27  ;;  %v1458_v20 = vld [vmem:[#allocation5 + $0x818] sm:$0xff]  ;;  %v1461_v26 = vld [vmem:[#allocation5 + $0x890] sm:$0xff] }
 0x127   : > { %v1460_v21 = vld [vmem:[#allocation5 + $0x858] sm:$0xff]  ;;  %v1463_v27 = vld [vmem:[#allocation5 + $0x8d0] sm:$0xff] }
 0x129   : > { %2188 = vmatpush1.bf16.msra.mxu0 %v8224_v41  ;;  %2270 = vmatpush1.bf16.msra.mxu1 %v8226_v44  ;;  %v8257_v41 = vcombine.high %v1433_v30, %v1435_v31  ;;  %v8259_v44 = vcombine.high %v1434_v34, %v1436_v35 }
 0x12a   : > { %2189 = vmatprep.subr.bf16.mxu0 %v8229_v45  ;;  %2271 = vmatprep.subr.bf16.mxu1 %v8231_v48  ;;  %v8256_v45 = vcombine.low %v1433_v30, %v1435_v31  ;;  %v8258_v48 = vcombine.low %v1434_v34, %v1436_v35  ;;  %v1462_v30 = vld [vmem:[#allocation5 + $0x898] sm:$0xff]  ;;  %v1465_v34 = vld [vmem:[#allocation5 + $0x910] sm:$0xff] }
 0x12b   : > { %v1464_v31 = vld [vmem:[#allocation5 + $0x8d8] sm:$0xff]  ;;  %v1467_v35 = vld [vmem:[#allocation5 + $0x950] sm:$0xff] }
 0x12d   : > { %2190 = vmatpush1.bf16.msra.mxu0 %v8228_v49  ;;  %2272 = vmatpush1.bf16.msra.mxu1 %v8230_v52  ;;  %v8261_v49 = vcombine.high %v1437_v38, %v1439_v39  ;;  %v8263_v52 = vcombine.high %v1438_v42, %v1440_v43 }
 0x12e   : > { %2191 = vmatprep.subr.bf16.mxu0 %v8233_v53  ;;  %2273 = vmatprep.subr.bf16.mxu1 %v8235_v56  ;;  %v8260_v53 = vcombine.low %v1437_v38, %v1439_v39  ;;  %v8262_v56 = vcombine.low %v1438_v42, %v1440_v43  ;;  %v1466_v38 = vld [vmem:[#allocation5 + $0x918] sm:$0xff]  ;;  %v1469_v42 = vld [vmem:[#allocation5 + $0x990] sm:$0xff] }
 0x12f   : > { %v1468_v39 = vld [vmem:[#allocation5 + $0x958] sm:$0xff]  ;;  %v1471_v43 = vld [vmem:[#allocation5 + $0x9d0] sm:$0xff] }
 0x131   : > { %2192 = vmatpush1.bf16.msra.mxu0 %v8232_v58  ;;  %2274 = vmatpush1.bf16.msra.mxu1 %v8234_v61  ;;  %v8265_v58 = vcombine.high %v1441_v46, %v1443_v47  ;;  %v8267_v61 = vcombine.high %v1442_v50, %v1444_v51 }
 0x132   : > { %2193 = vmatprep.subr.bf16.mxu0 %v8237_v62  ;;  %2275 = vmatprep.subr.bf16.mxu1 %v8239_v1  ;;  %v8264_v62 = vcombine.low %v1441_v46, %v1443_v47  ;;  %v8266_v1 = vcombine.low %v1442_v50, %v1444_v51  ;;  %v1470_v46 = vld [vmem:[#allocation5 + $0x998] sm:$0xff]  ;;  %v1473_v50 = vld [vmem:[#allocation5 + $0xa10] sm:$0xff] }
 0x133   : > { %v1472_v47 = vld [vmem:[#allocation5 + $0x9d8] sm:$0xff]  ;;  %v1475_v51 = vld [vmem:[#allocation5 + $0xa50] sm:$0xff] }
 0x135   : > { %2194 = vmatpush1.bf16.msra.mxu0 %v8236_v2  ;;  %2276 = vmatpush1.bf16.msra.mxu1 %v8238_v5  ;;  %v8269_v2 = vcombine.high %v1445_v54, %v1447_v55  ;;  %v8271_v5 = vcombine.high %v1446_v59, %v1448_v60 }
 0x136   : > { %2195 = vmatprep.subr.bf16.mxu0 %v8241_v6  ;;  %2277 = vmatprep.subr.bf16.mxu1 %v8243_v9  ;;  %v8268_v6 = vcombine.low %v1445_v54, %v1447_v55  ;;  %v8270_v9 = vcombine.low %v1446_v59, %v1448_v60  ;;  %v1474_v54 = vld [vmem:[#allocation5 + $0xa18] sm:$0xff]  ;;  %v1477_v59 = vld [vmem:[#allocation5 + $0xa90] sm:$0xff] }
 0x137   : > { %v1476_v55 = vld [vmem:[#allocation5 + $0xa58] sm:$0xff]  ;;  %v1479_v60 = vld [vmem:[#allocation5 + $0xad0] sm:$0xff] }
 0x139   : > { %2196 = vmatpush1.bf16.msra.mxu0 %v8240_v10  ;;  %2278 = vmatpush1.bf16.msra.mxu1 %v8242_v14  ;;  %v8273_v10 = vcombine.high %v1449_v63, %v1451_v0  ;;  %v8275_v14 = vcombine.high %v1450_v3, %v1452_v4 }
 0x13a   : > { %2197 = vmatprep.subr.bf16.mxu0 %v8245_v15  ;;  %2279 = vmatprep.subr.bf16.mxu1 %v8247_v18  ;;  %v8272_v15 = vcombine.low %v1449_v63, %v1451_v0  ;;  %v8274_v18 = vcombine.low %v1450_v3, %v1452_v4  ;;  %v1478_v63 = vld [vmem:[#allocation5 + $0xa98] sm:$0xff]  ;;  %v1481_v3 = vld [vmem:[#allocation5 + $0xb10] sm:$0xff] }
 0x13b   : > { %v1480_v0 = vld [vmem:[#allocation5 + $0xad8] sm:$0xff]  ;;  %v1483_v4 = vld [vmem:[#allocation5 + $0xb50] sm:$0xff] }
 0x13d   : > { %2198 = vmatpush1.bf16.msra.mxu0 %v8244_v19  ;;  %2280 = vmatpush1.bf16.msra.mxu1 %v8246_v22  ;;  %v8277_v19 = vcombine.high %v1453_v7, %v1455_v8  ;;  %v8279_v22 = vcombine.high %v1454_v11, %v1456_v13 }
 0x13e   : > { %2199 = vmatprep.subr.bf16.mxu0 %v8249_v25  ;;  %2281 = vmatprep.subr.bf16.mxu1 %v8251_v28  ;;  %v8276_v25 = vcombine.low %v1453_v7, %v1455_v8  ;;  %v8278_v28 = vcombine.low %v1454_v11, %v1456_v13  ;;  %v1482_v7 = vld [vmem:[#allocation5 + $0xb18] sm:$0xff]  ;;  %v1485_v11 = vld [vmem:[#allocation5 + $0xb90] sm:$0xff] }
 0x13f   : > { %v1484_v8 = vld [vmem:[#allocation5 + $0xb58] sm:$0xff]  ;;  %v1487_v13 = vld [vmem:[#allocation5 + $0xbd0] sm:$0xff] }
 0x141   : > { %2200 = vmatpush1.bf16.msra.mxu0 %v8248_v29  ;;  %2282 = vmatpush1.bf16.msra.mxu1 %v8250_v32  ;;  %v8281_v29 = vcombine.high %v1457_v16, %v1459_v17  ;;  %v8283_v32 = vcombine.high %v1458_v20, %v1460_v21 }
 0x142   : > { %2201 = vmatprep.subr.bf16.mxu0 %v8253_v33  ;;  %2283 = vmatprep.subr.bf16.mxu1 %v8255_v36  ;;  %v8280_v33 = vcombine.low %v1457_v16, %v1459_v17  ;;  %v8282_v36 = vcombine.low %v1458_v20, %v1460_v21  ;;  %v1486_v16 = vld [vmem:[#allocation5 + $0xb98] sm:$0xff]  ;;  %v1489_v20 = vld [vmem:[#allocation5 + $0xc10] sm:$0xff] }
 0x143   : > { %v1488_v17 = vld [vmem:[#allocation5 + $0xbd8] sm:$0xff]  ;;  %v1491_v21 = vld [vmem:[#allocation5 + $0xc50] sm:$0xff] }
 0x145   : > { %2202 = vmatpush1.bf16.msra.mxu0 %v8252_v37  ;;  %2284 = vmatpush1.bf16.msra.mxu1 %v8254_v40  ;;  %v8285_v37 = vcombine.high %v1461_v26, %v1463_v27  ;;  %v8287_v40 = vcombine.high %v1462_v30, %v1464_v31 }
 0x146   : > { %2203 = vmatprep.subr.bf16.mxu0 %v8257_v41  ;;  %2285 = vmatprep.subr.bf16.mxu1 %v8259_v44  ;;  %v8284_v41 = vcombine.low %v1461_v26, %v1463_v27  ;;  %v8286_v44 = vcombine.low %v1462_v30, %v1464_v31  ;;  %v1490_v26 = vld [vmem:[#allocation5 + $0xc18] sm:$0xff]  ;;  %v8310_v30 = vcombine.low %v1486_v16, %v1488_v17 }
 0x147   : > { %v1492_v27 = vld [vmem:[#allocation5 + $0xc58] sm:$0xff]  ;;  %v8313_v31 = vcombine.high %v1489_v20, %v1491_v21 }
 0x149   : > { %2204 = vmatpush1.bf16.msra.mxu0 %v8256_v45  ;;  %2286 = vmatpush1.bf16.msra.mxu1 %v8258_v48  ;;  %v8289_v45 = vcombine.high %v1465_v34, %v1467_v35  ;;  %v8291_v48 = vcombine.high %v1466_v38, %v1468_v39 }
 0x14a   : > { %2205 = vmatprep.subr.bf16.mxu0 %v8261_v49  ;;  %2287 = vmatprep.subr.bf16.mxu1 %v8263_v52  ;;  %v8288_v49 = vcombine.low %v1465_v34, %v1467_v35  ;;  %v8290_v52 = vcombine.low %v1466_v38, %v1468_v39  ;;  %v1495_v34 = vld [vmem:[#allocation5 + $0xcd0] sm:$0xff]  ;;  %v1494_v35 = vld [vmem:[#allocation5 + $0xc98] sm:$0xff]  ;;  %v8314_v38 = vcombine.low %v1490_v26, %v1492_v27 }
 0x14d   : > { %2206 = vmatpush1.bf16.msra.mxu0 %v8260_v53  ;;  %2288 = vmatpush1.bf16.msra.mxu1 %v8262_v56  ;;  %v8293_v53 = vcombine.high %v1469_v42, %v1471_v43  ;;  %v8295_v56 = vcombine.high %v1470_v46, %v1472_v47 }
 0x14e   : > { %2207 = vmatprep.subr.bf16.mxu0 %v8265_v58  ;;  %2289 = vmatprep.subr.bf16.mxu1 %v8267_v61  ;;  %v8292_v58 = vcombine.low %v1469_v42, %v1471_v43  ;;  %v8294_v61 = vcombine.low %v1470_v46, %v1472_v47  ;;  %v1499_v42 = vld [vmem:[#allocation5 + $0xd50] sm:$0xff]  ;;  %v1498_v43 = vld [vmem:[#allocation5 + $0xd18] sm:$0xff] }
 0x151   : > { %2208 = vmatpush1.bf16.msra.mxu0 %v8264_v62  ;;  %2290 = vmatpush1.bf16.msra.mxu1 %v8266_v1  ;;  %v8297_v62 = vcombine.high %v1473_v50, %v1475_v51  ;;  %v8299_v1 = vcombine.high %v1474_v54, %v1476_v55 }
 0x152   : > { %2209 = vmatprep.subr.bf16.mxu0 %v8269_v2  ;;  %2291 = vmatprep.subr.bf16.mxu1 %v8271_v5  ;;  %v8296_v2 = vcombine.low %v1473_v50, %v1475_v51  ;;  %v8298_v5 = vcombine.low %v1474_v54, %v1476_v55  ;;  %v1503_v50 = vld [vmem:[#allocation5 + $0xdd0] sm:$0xff]  ;;  %v1502_v51 = vld [vmem:[#allocation5 + $0xd98] sm:$0xff] }
 0x155   : > { %2210 = vmatpush1.bf16.msra.mxu0 %v8268_v6  ;;  %2292 = vmatpush1.bf16.msra.mxu1 %v8270_v9  ;;  %v8301_v6 = vcombine.high %v1477_v59, %v1479_v60  ;;  %v8303_v9 = vcombine.high %v1478_v63, %v1480_v0 }
 0x156   : > { %2211 = vmatprep.subr.bf16.mxu0 %v8273_v10  ;;  %2293 = vmatprep.subr.bf16.mxu1 %v8275_v14  ;;  %v8300_v10 = vcombine.low %v1477_v59, %v1479_v60  ;;  %v8302_v14 = vcombine.low %v1478_v63, %v1480_v0  ;;  %v1507_v59 = vld [vmem:[#allocation5 + $0xe50] sm:$0xff]  ;;  %v1506_v60 = vld [vmem:[#allocation5 + $0xe18] sm:$0xff] }
 0x159   : > { %2212 = vmatpush1.bf16.msra.mxu0 %v8272_v15  ;;  %2294 = vmatpush1.bf16.msra.mxu1 %v8274_v18  ;;  %v8305_v15 = vcombine.high %v1481_v3, %v1483_v4  ;;  %v8307_v18 = vcombine.high %v1482_v7, %v1484_v8 }
 0x15a   : > { %2213 = vmatprep.subr.bf16.mxu0 %v8277_v19  ;;  %2295 = vmatprep.subr.bf16.mxu1 %v8279_v22  ;;  %v8304_v19 = vcombine.low %v1481_v3, %v1483_v4  ;;  %v8306_v22 = vcombine.low %v1482_v7, %v1484_v8  ;;  %v1511_v3 = vld [vmem:[#allocation5 + $0xed0] sm:$0xff]  ;;  %v1510_v4 = vld [vmem:[#allocation5 + $0xe98] sm:$0xff] }
 0x15b   : > { %v1513_v7 = vld [vmem:[#allocation5 + $0xf10] sm:$0xff] }
 0x15c   : > { %v1515_v8 = vld [vmem:[#allocation5 + $0xf50] sm:$0xff] }
 0x15d   : > { %2214 = vmatpush1.bf16.msra.mxu0 %v8276_v25  ;;  %2296 = vmatpush1.bf16.msra.mxu1 %v8278_v28  ;;  %v8309_v25 = vcombine.high %v1485_v11, %v1487_v13  ;;  %v8311_v28 = vcombine.high %v1486_v16, %v1488_v17  ;;  %v1517_v16 = vld [vmem:[#allocation5 + $0xf90] sm:$0xff] }
 0x15e   : > { %2224 = vmatprep.subr.bf16.mxu0 %v8281_v29  ;;  %2306 = vmatprep.subr.bf16.mxu1 %v8283_v32  ;;  %v8308_v29 = vcombine.low %v1485_v11, %v1487_v13  ;;  %v8315_v32 = vcombine.high %v1490_v26, %v1492_v27  ;;  %v1514_v11 = vld [vmem:[#allocation5 + $0xf18] sm:$0xff]  ;;  %v1519_v17 = vld [vmem:[#allocation5 + $0xfd0] sm:$0xff] }
 0x15f   : > { %v1516_v13 = vld [vmem:[#allocation5 + $0xf58] sm:$0xff]  ;;  %v8341_v27 = vcombine.high %v1517_v16, %v1519_v17 }
 0x160   : > { %2216 = vmatmul.mubr.bf16.vlgmr.msra.gmra.mrb[4].mxu0 %v10528_v12  ;;  %2298 = vmatmul.mubr.bf16.vlgmr.msra.gmra.mrb[4].mxu1 %v10528_v12  ;;  %v8338_v26 = vcombine.low %v1514_v11, %v1516_v13 }
 0x161   : > { %2225 = vmatpush1.bf16.msra.mxu0 %v8280_v33  ;;  %2307 = vmatpush1.bf16.msra.mxu1 %v8282_v36  ;;  %v1493_v33 = vld [vmem:[#allocation5 + $0xc90] sm:$0xff]  ;;  %v1496_v36 = vld [vmem:[#allocation5 + $0xcd8] sm:$0xff] }
 0x162   : > { %2226 = vmatprep.subr.bf16.mxu0 %v8285_v37  ;;  %2308 = vmatprep.subr.bf16.mxu1 %v8287_v40  ;;  %v8312_v37 = vcombine.low %v1489_v20, %v1491_v21  ;;  %v8317_v39 = vcombine.high %v1493_v33, %v1495_v34  ;;  %v8319_v40 = vcombine.high %v1494_v35, %v1496_v36  ;;  %v1518_v20 = vld [vmem:[#allocation5 + $0xf98] sm:$0xff] }
 0x163   : > { %2256 = vmatprep.mubr.bf16.mxu0 %v10531_v24  ;;  %2338 = vmatprep.mubr.bf16.mxu1 %v10531_v24  ;;  %v8318_v46 = vcombine.low %v1494_v35, %v1496_v36  ;;  %v1520_v21 = vld [vmem:[#allocation5 + $0xfd8] sm:$0xff]  ;;  %v9266_v35 = vld [vmem:[#allocation8 + $0x424] ss:$16 sps:$4 sm:$0xff]  }
 0x164   : > { %v9269_v36 = vld [vmem:[#allocation8 + $0x624] ss:$16 sps:$4 sm:$0xff]  }
 0x165   : > { %2227 = vmatpush1.bf16.msra.mxu0 %v8284_v41  ;;  %2309 = vmatpush1.bf16.msra.mxu1 %v8286_v44  ;;  %v1497_v41 = vld [vmem:[#allocation5 + $0xd10] sm:$0xff]  ;;  %v1500_v44 = vld [vmem:[#allocation5 + $0xd58] sm:$0xff] }
 0x166   : > { %2228 = vmatprep.subr.bf16.mxu0 %v8289_v45  ;;  %2310 = vmatprep.subr.bf16.mxu1 %v8291_v48  ;;  %v8316_v45 = vcombine.low %v1493_v33, %v1495_v34  ;;  %v8321_v47 = vcombine.high %v1497_v41, %v1499_v42  ;;  %v8323_v48 = vcombine.high %v1498_v43, %v1500_v44  ;;  %v9258_v33 = vld [vmem:[#allocation8 + $0x400] ss:$16 sps:$4 sm:$0xff]  }
 0x167   : > { %v8322_v54 = vcombine.low %v1498_v43, %v1500_v44  ;;  %v9261_v34 = vld [vmem:[#allocation8 + $0x600] ss:$16 sps:$4 sm:$0xff]   ;;  %v9278_v43 = vld [vmem:[#allocation8 + $0x464] ss:$16 sps:$4 sm:$0xff]  }
 0x168   : > { %v9281_v44 = vld [vmem:[#allocation8 + $0x664] ss:$16 sps:$4 sm:$0xff]  }
 0x169   : > { %2229 = vmatpush1.bf16.msra.mxu0 %v8288_v49  ;;  %2311 = vmatpush1.bf16.msra.mxu1 %v8290_v52  ;;  %v1501_v49 = vld [vmem:[#allocation5 + $0xd90] sm:$0xff]  ;;  %v1504_v52 = vld [vmem:[#allocation5 + $0xdd8] sm:$0xff] }
 0x16a   : > { %2230 = vmatprep.subr.bf16.mxu0 %v8293_v53  ;;  %2312 = vmatprep.subr.bf16.mxu1 %v8295_v56  ;;  %v8320_v53 = vcombine.low %v1497_v41, %v1499_v42  ;;  %v8325_v55 = vcombine.high %v1501_v49, %v1503_v50  ;;  %v8327_v56 = vcombine.high %v1502_v51, %v1504_v52  ;;  %v9270_v41 = vld [vmem:[#allocation8 + $0x440] ss:$16 sps:$4 sm:$0xff]  }
 0x16b   : > { %v8326_v63 = vcombine.low %v1502_v51, %v1504_v52  ;;  %v9273_v42 = vld [vmem:[#allocation8 + $0x640] ss:$16 sps:$4 sm:$0xff]   ;;  %v9290_v51 = vld [vmem:[#allocation8 + $0x4a4] ss:$16 sps:$4 sm:$0xff]  }
 0x16c   : > { %v9293_v52 = vld [vmem:[#allocation8 + $0x6a4] ss:$16 sps:$4 sm:$0xff]  }
 0x16d   : > { %2231 = vmatpush1.bf16.msra.mxu0 %v8292_v58  ;;  %2313 = vmatpush1.bf16.msra.mxu1 %v8294_v61  ;;  %v1505_v58 = vld [vmem:[#allocation5 + $0xe10] sm:$0xff]  ;;  %v1508_v61 = vld [vmem:[#allocation5 + $0xe58] sm:$0xff] }
 0x16e   : > { %2232 = vmatprep.subr.bf16.mxu0 %v8297_v62  ;;  %2314 = vmatprep.subr.bf16.mxu1 %v8299_v1  ;;  %v8324_v62 = vcombine.low %v1501_v49, %v1503_v50  ;;  %v8329_v0 = vcombine.high %v1505_v58, %v1507_v59  ;;  %v8331_v1 = vcombine.high %v1506_v60, %v1508_v61  ;;  %v9282_v49 = vld [vmem:[#allocation8 + $0x480] ss:$16 sps:$4 sm:$0xff]  }
 0x16f   : > { %v9285_v50 = vld [vmem:[#allocation8 + $0x680] ss:$16 sps:$4 sm:$0xff]  }
 0x171   : > { %2233 = vmatpush1.bf16.msra.mxu0 %v8296_v2  ;;  %2315 = vmatpush1.bf16.msra.mxu1 %v8298_v5  ;;  %v1509_v2 = vld [vmem:[#allocation5 + $0xe90] sm:$0xff]  ;;  %v1512_v5 = vld [vmem:[#allocation5 + $0xed8] sm:$0xff] }
 0x172   : > { %2234 = vmatprep.subr.bf16.mxu0 %v8301_v6  ;;  %2316 = vmatprep.subr.bf16.mxu1 %v8303_v9  ;;  %v8328_v6 = vcombine.low %v1505_v58, %v1507_v59  ;;  %v8330_v9 = vcombine.low %v1506_v60, %v1508_v61  ;;  %v9294_v58 = vld [vmem:[#allocation8 + $0x4c0] ss:$16 sps:$4 sm:$0xff]   ;;  %v9302_v60 = vld [vmem:[#allocation8 + $0x4e4] ss:$16 sps:$4 sm:$0xff]  }
 0x173   : > { %v9297_v59 = vld [vmem:[#allocation8 + $0x6c0] ss:$16 sps:$4 sm:$0xff]   ;;  %v9305_v61 = vld [vmem:[#allocation8 + $0x6e4] ss:$16 sps:$4 sm:$0xff]  }
 0x175   : > { %2235 = vmatpush1.bf16.msra.mxu0 %v8300_v10  ;;  %2317 = vmatpush1.bf16.msra.mxu1 %v8302_v14  ;;  %v8333_v10 = vcombine.high %v1509_v2, %v1511_v3  ;;  %v8335_v14 = vcombine.high %v1510_v4, %v1512_v5 }
 0x176   : > { %2236 = vmatprep.subr.bf16.mxu0 %v8305_v15  ;;  %2318 = vmatprep.subr.bf16.mxu1 %v8307_v18  ;;  %v8332_v15 = vcombine.low %v1509_v2, %v1511_v3  ;;  %v8334_v18 = vcombine.low %v1510_v4, %v1512_v5  ;;  %v9306_v2 = vld [vmem:[#allocation8 + $0x500] ss:$16 sps:$4 sm:$0xff]   ;;  %v9314_v4 = vld [vmem:[#allocation8 + $0x524] ss:$16 sps:$4 sm:$0xff]  }
 0x177   : > { %v9309_v3 = vld [vmem:[#allocation8 + $0x700] ss:$16 sps:$4 sm:$0xff]   ;;  %v9317_v5 = vld [vmem:[#allocation8 + $0x724] ss:$16 sps:$4 sm:$0xff]  }
 0x179   : > { %2237 = vmatpush1.bf16.msra.mxu0 %v8304_v19  ;;  %2319 = vmatpush1.bf16.msra.mxu1 %v8306_v22  ;;  %v8337_v19 = vcombine.high %v1513_v7, %v1515_v8  ;;  %v8339_v22 = vcombine.high %v1514_v11, %v1516_v13  ;;  %v9321_v11 = vld [vmem:[#allocation8 + $0x740] ss:$16 sps:$4 sm:$0xff]   ;;  %v9326_v13 = vld [vmem:[#allocation8 + $0x564] ss:$16 sps:$4 sm:$0xff]  }
 0x17a   : > { %2238 = vmatprep.subr.bf16.mxu0 %v8309_v25  ;;  %2320 = vmatprep.subr.bf16.mxu1 %v8311_v28  ;;  %v8336_v25 = vcombine.low %v1513_v7, %v1515_v8  ;;  %v8343_v28 = vcombine.high %v1518_v20, %v1520_v21  ;;  %v9315_v7 = vld [vmem:[#allocation8 + $0x720] ss:$16 sps:$4 sm:$0xff]   ;;  %v9320_v8 = vld [vmem:[#allocation8 + $0x544] ss:$16 sps:$4 sm:$0xff]  }
 0x17d   : > { %2239 = vmatpush1.bf16.msra.mxu0 %v8308_v29  ;;  %2321 = vmatpush1.bf16.msra.mxu1 %v8310_v30  ;;  %v9260_v29 = vld [vmem:[#allocation8 + $0x404] ss:$16 sps:$4 sm:$0xff]   ;;  %v8340_v30 = vcombine.low %v1517_v16, %v1519_v17  ;;  %v9327_v16 = vld [vmem:[#allocation8 + $0x760] ss:$16 sps:$4 sm:$0xff]  }
 0x17e   : > { %2240 = vmatprep.subr.bf16.mxu0 %v8313_v31  ;;  %2322 = vmatprep.subr.bf16.mxu1 %v8315_v32  ;;  %v9263_v31 = vld [vmem:[#allocation8 + $0x604] ss:$16 sps:$4 sm:$0xff]   ;;  %v8342_v32 = vcombine.low %v1518_v20, %v1520_v21  ;;  %v9333_v20 = vld [vmem:[#allocation8 + $0x780] ss:$16 sps:$4 sm:$0xff]  }
 0x17f   : > { %v9332_v17 = vld [vmem:[#allocation8 + $0x584] ss:$16 sps:$4 sm:$0xff]  }
 0x180   : > { %v9338_v21 = vld [vmem:[#allocation8 + $0x5a4] ss:$16 sps:$4 sm:$0xff]  }
 0x181   : > { %2241 = vmatpush1.bf16.msra.mxu0 %v8312_v37  ;;  %2323 = vmatpush1.bf16.msra.mxu1 %v8314_v38  ;;  %v9264_v37 = vld [vmem:[#allocation8 + $0x420] ss:$16 sps:$4 sm:$0xff]  }
 0x182   : > { %2242 = vmatprep.subr.bf16.mxu0 %v8317_v39  ;;  %2324 = vmatprep.subr.bf16.mxu1 %v8319_v40  ;;  %v9267_v38 = vld [vmem:[#allocation8 + $0x620] ss:$16 sps:$4 sm:$0xff]   ;;  %v9272_v39 = vld [vmem:[#allocation8 + $0x444] ss:$16 sps:$4 sm:$0xff]  }
 0x183   : > { %v9275_v40 = vld [vmem:[#allocation8 + $0x644] ss:$16 sps:$4 sm:$0xff]  }
 0x185   : > { %2243 = vmatpush1.bf16.msra.mxu0 %v8316_v45  ;;  %2325 = vmatpush1.bf16.msra.mxu1 %v8318_v46  ;;  %v9276_v45 = vld [vmem:[#allocation8 + $0x460] ss:$16 sps:$4 sm:$0xff]  }
 0x186   : > { %2244 = vmatprep.subr.bf16.mxu0 %v8321_v47  ;;  %2326 = vmatprep.subr.bf16.mxu1 %v8323_v48  ;;  %v9279_v46 = vld [vmem:[#allocation8 + $0x660] ss:$16 sps:$4 sm:$0xff]   ;;  %v9284_v47 = vld [vmem:[#allocation8 + $0x484] ss:$16 sps:$4 sm:$0xff]  }
 0x187   : > { %v9287_v48 = vld [vmem:[#allocation8 + $0x684] ss:$16 sps:$4 sm:$0xff]  }
 0x189   : > { %2245 = vmatpush1.bf16.msra.mxu0 %v8320_v53  ;;  %2327 = vmatpush1.bf16.msra.mxu1 %v8322_v54  ;;  %v9288_v53 = vld [vmem:[#allocation8 + $0x4a0] ss:$16 sps:$4 sm:$0xff]  }
 0x18a   : > { %2246 = vmatprep.subr.bf16.mxu0 %v8325_v55  ;;  %2328 = vmatprep.subr.bf16.mxu1 %v8327_v56  ;;  %v9291_v54 = vld [vmem:[#allocation8 + $0x6a0] ss:$16 sps:$4 sm:$0xff]   ;;  %v9296_v55 = vld [vmem:[#allocation8 + $0x4c4] ss:$16 sps:$4 sm:$0xff]  }
 0x18b   : > { %v9299_v56 = vld [vmem:[#allocation8 + $0x6c4] ss:$16 sps:$4 sm:$0xff]  }
 0x18d   : > { %2247 = vmatpush1.bf16.msra.mxu0 %v8324_v62  ;;  %2329 = vmatpush1.bf16.msra.mxu1 %v8326_v63  ;;  %v9300_v62 = vld [vmem:[#allocation8 + $0x4e0] ss:$16 sps:$4 sm:$0xff]  }
 0x18e   : > { %2248 = vmatprep.subr.bf16.mxu0 %v8329_v0  ;;  %2330 = vmatprep.subr.bf16.mxu1 %v8331_v1  ;;  %v9303_v63 = vld [vmem:[#allocation8 + $0x6e0] ss:$16 sps:$4 sm:$0xff]   ;;  %v9308_v0 = vld [vmem:[#allocation8 + $0x504] ss:$16 sps:$4 sm:$0xff]  }
 0x18f   : > { %v9311_v1 = vld [vmem:[#allocation8 + $0x704] ss:$16 sps:$4 sm:$0xff]  }
 0x191   : > { %2249 = vmatpush1.bf16.msra.mxu0 %v8328_v6  ;;  %2331 = vmatpush1.bf16.msra.mxu1 %v8330_v9  ;;  %v9312_v6 = vld [vmem:[#allocation8 + $0x520] ss:$16 sps:$4 sm:$0xff]   ;;  %v9323_v9 = vld [vmem:[#allocation8 + $0x744] ss:$16 sps:$4 sm:$0xff]  }
 0x192   : > { %2250 = vmatprep.subr.bf16.mxu0 %v8333_v10  ;;  %2332 = vmatprep.subr.bf16.mxu1 %v8335_v14  ;;  %v9318_v10 = vld [vmem:[#allocation8 + $0x540] ss:$16 sps:$4 sm:$0xff]   ;;  %v9329_v14 = vld [vmem:[#allocation8 + $0x764] ss:$16 sps:$4 sm:$0xff]  }
 0x195   : > { %2251 = vmatpush1.bf16.msra.mxu0 %v8332_v15  ;;  %2333 = vmatpush1.bf16.msra.mxu1 %v8334_v18  ;;  %v9324_v15 = vld [vmem:[#allocation8 + $0x560] ss:$16 sps:$4 sm:$0xff]   ;;  %v9335_v18 = vld [vmem:[#allocation8 + $0x784] ss:$16 sps:$4 sm:$0xff]  }
 0x196   : > { %2252 = vmatprep.subr.bf16.mxu0 %v8337_v19  ;;  %2334 = vmatprep.subr.bf16.mxu1 %v8339_v22  ;;  %v9330_v19 = vld [vmem:[#allocation8 + $0x580] ss:$16 sps:$4 sm:$0xff]   ;;  %v9341_v22 = vld [vmem:[#allocation8 + $0x7a4] ss:$16 sps:$4 sm:$0xff]  }
 0x199   : > { %2253 = vmatpush1.bf16.msra.mxu0 %v8336_v25  ;;  %2335 = vmatpush1.bf16.msra.mxu1 %v8338_v26  ;;  %v9336_v25 = vld [vmem:[#allocation8 + $0x5a0] ss:$16 sps:$4 sm:$0xff]  }
 0x19a   : > { %2254 = vmatprep.subr.bf16.mxu0 %v8341_v27  ;;  %2336 = vmatprep.subr.bf16.mxu1 %v8343_v28  ;;  %v9339_v26 = vld [vmem:[#allocation8 + $0x7a0] ss:$16 sps:$4 sm:$0xff]   ;;  %v9344_v27 = vld [vmem:[#allocation8 + $0x5c4] ss:$16 sps:$4 sm:$0xff]  }
 0x19b   : > { %v9347_v28 = vld [vmem:[#allocation8 + $0x7c4] ss:$16 sps:$4 sm:$0xff]  }
 0x19d   : > { %2255 = vmatpush1.bf16.msra.mxu0 %v8340_v30  ;;  %2337 = vmatpush1.bf16.msra.mxu1 %v8342_v32  ;;  %v9342_v30 = vld [vmem:[#allocation8 + $0x5c0] ss:$16 sps:$4 sm:$0xff]  }
 0x19e   : > { %3123 = vmatprep.subr.bf16.mxu0 %v9260_v29  ;;  %3164 = vmatprep.subr.bf16.mxu1 %v9263_v31  ;;  %v9345_v31 = vld [vmem:[#allocation8 + $0x7c0] ss:$16 sps:$4 sm:$0xff]  }
 0x1a0   : > { %2257 = vmatmul.mubr.bf16.vlgmr.msra.gmra.mrb[4].mxu0 %v10538_v23  ;;  %2339 = vmatmul.mubr.bf16.vlgmr.msra.gmra.mrb[4].mxu1 %v10538_v23 }
 0x1a1   : > { %3124 = vmatpush1.bf16.msra.mxu0 %v9258_v33  ;;  %3165 = vmatpush1.bf16.msra.mxu1 %v9261_v34 }
 0x1a2   : > { %3125 = vmatprep.subr.bf16.mxu0 %v9266_v35  ;;  %3166 = vmatprep.subr.bf16.mxu1 %v9269_v36 }
 0x1a5   : > { %3126 = vmatpush1.bf16.msra.mxu0 %v9264_v37  ;;  %3167 = vmatpush1.bf16.msra.mxu1 %v9267_v38  ;;  %v9350_v38 = vld [vmem:[#allocation8 + $0x5e4] ss:$16 sps:$4 sm:$0xff]  }
 0x1a6   : > { %3127 = vmatprep.subr.bf16.mxu0 %v9272_v39  ;;  %3168 = vmatprep.subr.bf16.mxu1 %v9275_v40  ;;  %v9348_v40 = vld [vmem:[#allocation8 + $0x5e0] ss:$16 sps:$4 sm:$0xff]  }
 0x1a9   : > { %3128 = vmatpush1.bf16.msra.mxu0 %v9270_v41  ;;  %3169 = vmatpush1.bf16.msra.mxu1 %v9273_v42  ;;  %v9351_v41 = vld [vmem:[#allocation8 + $0x7e0] ss:$16 sps:$4 sm:$0xff]   ;;  %v9353_v42 = vld [vmem:[#allocation8 + $0x7e4] ss:$16 sps:$4 sm:$0xff]  }
 0x1aa   : > { %3129 = vmatprep.subr.bf16.mxu0 %v9278_v43  ;;  %3170 = vmatprep.subr.bf16.mxu1 %v9281_v44  ;;  %v9356_v43 = vld [vmem:[#allocation8 + $0x40c] ss:$16 sps:$4 sm:$0xff]  }
 0x1ab   : > { %v9359_v44 = vld [vmem:[#allocation8 + $0x60c] ss:$16 sps:$4 sm:$0xff]  }
 0x1ad   : > { %3130 = vmatpush1.bf16.msra.mxu0 %v9276_v45  ;;  %3171 = vmatpush1.bf16.msra.mxu1 %v9279_v46  ;;  %v433_v45 = vlaneseq }
 0x1ae   : > { %3131 = vmatprep.subr.bf16.mxu0 %v9284_v47  ;;  %3172 = vmatprep.subr.bf16.mxu1 %v9287_v48  ;;  %v1521_v47 = vld [vmem:[#allocation7 + $0x4] sm:$0xf] }
 0x1af   : > { %v434_v46 = vshrl.u32 %v433_v45, 7  ;;  %v9393_v45 = vld [vmem:[#allocation8 + $0x6c8] ss:$16 sps:$4 sm:$0xff]  }
 0x1b1   : > { %3132 = vmatpush1.bf16.msra.mxu0 %v9282_v49  ;;  %3173 = vmatpush1.bf16.msra.mxu1 %v9285_v50  ;;  %v10558_v48 = vsub.s32 0, %v434_v46  ;;  %v10560_v49 = vsub.s32 2, %v434_v46  ;;  %v10562_v50 = vsub.s32 1, %v434_v46 }
 0x1b2   : > { %3133 = vmatprep.subr.bf16.mxu0 %v9290_v51  ;;  %3174 = vmatprep.subr.bf16.mxu1 %v9293_v52  ;;  %v10564_v51 = vsub.s32 3, %v434_v46  ;;  %v9398_v46 = vld [vmem:[#allocation8 + $0x4ec] ss:$16 sps:$4 sm:$0xff]  }
 0x1b3   : > { %v1526_v52 = vrot.slane %v1521_v47, %v10558_v48 }
 0x1b5   : > { %3134 = vmatpush1.bf16.msra.mxu0 %v9288_v53  ;;  %3175 = vmatpush1.bf16.msra.mxu1 %v9291_v54  ;;  %v1534_v53 = vrot.slane %v1521_v47, %v10560_v49  ;;  %v1530_v54 = vrot.slane %v1521_v47, %v10562_v50 }
 0x1b6   : > { %3135 = vmatprep.subr.bf16.mxu0 %v9296_v55  ;;  %3176 = vmatprep.subr.bf16.mxu1 %v9299_v56  ;;  %v1538_v55 = vrot.slane %v1521_v47, %v10564_v51  ;;  %v9401_v47 = vld [vmem:[#allocation8 + $0x6ec] ss:$16 sps:$4 sm:$0xff]  }
 0x1b9   : > { %3136 = vmatpush1.bf16.msra.mxu0 %v9294_v58  ;;  %3177 = vmatpush1.bf16.msra.mxu1 %v9297_v59 }
 0x1ba   : > { %3137 = vmatprep.subr.bf16.mxu0 %v9302_v60  ;;  %3178 = vmatprep.subr.bf16.mxu1 %v9305_v61 }
 0x1bd   : > { %3138 = vmatpush1.bf16.msra.mxu0 %v9300_v62  ;;  %3179 = vmatpush1.bf16.msra.mxu1 %v9303_v63 }
 0x1be   : > { %3139 = vmatprep.subr.bf16.mxu0 %v9308_v0  ;;  %3180 = vmatprep.subr.bf16.mxu1 %v9311_v1 }
 0x1c1   : > { %3140 = vmatpush1.bf16.msra.mxu0 %v9306_v2  ;;  %3181 = vmatpush1.bf16.msra.mxu1 %v9309_v3 }
 0x1c2   : > { %3141 = vmatprep.subr.bf16.mxu0 %v9314_v4  ;;  %3182 = vmatprep.subr.bf16.mxu1 %v9317_v5 }
 0x1c5   : > { %3142 = vmatpush1.bf16.msra.mxu0 %v9312_v6  ;;  %3183 = vmatpush1.bf16.msra.mxu1 %v9315_v7 }
 0x1c6   : > { %3143 = vmatprep.subr.bf16.mxu0 %v9320_v8  ;;  %3184 = vmatprep.subr.bf16.mxu1 %v9323_v9 }
 0x1c9   : > { %3144 = vmatpush1.bf16.msra.mxu0 %v9318_v10  ;;  %3185 = vmatpush1.bf16.msra.mxu1 %v9321_v11  ;;  %v9354_v10 = vld [vmem:[#allocation8 + $0x408] ss:$16 sps:$4 sm:$0xff]  }
 0x1ca   : > { %3145 = vmatprep.subr.bf16.mxu0 %v9326_v13  ;;  %3186 = vmatprep.subr.bf16.mxu1 %v9329_v14  ;;  %v9357_v14 = vld [vmem:[#allocation8 + $0x608] ss:$16 sps:$4 sm:$0xff]  }
 0x1cd   : > { %3146 = vmatpush1.bf16.msra.mxu0 %v9324_v15  ;;  %3187 = vmatpush1.bf16.msra.mxu1 %v9327_v16  ;;  %v9362_v16 = vld [vmem:[#allocation8 + $0x42c] ss:$16 sps:$4 sm:$0xff]  }
 0x1ce   : > { %3147 = vmatprep.subr.bf16.mxu0 %v9332_v17  ;;  %3188 = vmatprep.subr.bf16.mxu1 %v9335_v18  ;;  %v9365_v17 = vld [vmem:[#allocation8 + $0x62c] ss:$16 sps:$4 sm:$0xff]   ;;  %v9360_v18 = vld [vmem:[#allocation8 + $0x428] ss:$16 sps:$4 sm:$0xff]  }
 0x1d1   : > { %3148 = vmatpush1.bf16.msra.mxu0 %v9330_v19  ;;  %3189 = vmatpush1.bf16.msra.mxu1 %v9333_v20  ;;  %v9363_v19 = vld [vmem:[#allocation8 + $0x628] ss:$16 sps:$4 sm:$0xff]   ;;  %v9368_v20 = vld [vmem:[#allocation8 + $0x44c] ss:$16 sps:$4 sm:$0xff]  }
 0x1d2   : > { %3149 = vmatprep.subr.bf16.mxu0 %v9338_v21  ;;  %3190 = vmatprep.subr.bf16.mxu1 %v9341_v22  ;;  %v9371_v21 = vld [vmem:[#allocation8 + $0x64c] ss:$16 sps:$4 sm:$0xff]   ;;  %v9366_v22 = vld [vmem:[#allocation8 + $0x448] ss:$16 sps:$4 sm:$0xff]  }
 0x1d5   : > { %3150 = vmatpush1.bf16.msra.mxu0 %v9336_v25  ;;  %3191 = vmatpush1.bf16.msra.mxu1 %v9339_v26  ;;  %v9369_v25 = vld [vmem:[#allocation8 + $0x648] ss:$16 sps:$4 sm:$0xff]   ;;  %v9374_v26 = vld [vmem:[#allocation8 + $0x46c] ss:$16 sps:$4 sm:$0xff]  }
 0x1d6   : > { %3151 = vmatprep.subr.bf16.mxu0 %v9344_v27  ;;  %3192 = vmatprep.subr.bf16.mxu1 %v9347_v28  ;;  %v9377_v27 = vld [vmem:[#allocation8 + $0x66c] ss:$16 sps:$4 sm:$0xff]   ;;  %v9372_v28 = vld [vmem:[#allocation8 + $0x468] ss:$16 sps:$4 sm:$0xff]  }
 0x1d9   : > { %3152 = vmatpush1.bf16.msra.mxu0 %v9342_v30  ;;  %3193 = vmatpush1.bf16.msra.mxu1 %v9345_v31  ;;  %v9375_v30 = vld [vmem:[#allocation8 + $0x668] ss:$16 sps:$4 sm:$0xff]   ;;  %v9380_v31 = vld [vmem:[#allocation8 + $0x48c] ss:$16 sps:$4 sm:$0xff]  }
 0x1da   : > { %3153 = vmatprep.subr.bf16.mxu0 %v9350_v38  ;;  %3194 = vmatprep.subr.bf16.mxu1 %v9353_v42  ;;  %v9386_v38 = vld [vmem:[#allocation8 + $0x4ac] ss:$16 sps:$4 sm:$0xff]  }
 0x1db   : > { %v9392_v42 = vld [vmem:[#allocation8 + $0x4cc] ss:$16 sps:$4 sm:$0xff]  }
 0x1dd   : > { %3154 = vmatpush1.bf16.msra.mxu0 %v9348_v40  ;;  %3195 = vmatpush1.bf16.msra.mxu1 %v9351_v41  ;;  %v9384_v40 = vld [vmem:[#allocation8 + $0x4a8] ss:$16 sps:$4 sm:$0xff]  }
 0x1de   : > { %3205 = vmatprep.subr.bf16.mxu0 %v9356_v43  ;;  %3246 = vmatprep.subr.bf16.mxu1 %v9359_v44  ;;  %v9387_v41 = vld [vmem:[#allocation8 + $0x6a8] ss:$16 sps:$4 sm:$0xff]   ;;  %v9395_v43 = vld [vmem:[#allocation8 + $0x6cc] ss:$16 sps:$4 sm:$0xff]  }
 0x1df   : > { %v9390_v44 = vld [vmem:[#allocation8 + $0x4c8] ss:$16 sps:$4 sm:$0xff]  }
 0x1f3   : > { %v10550_v29 = vpop.f32.mrb[0].mxu0  ;;  %v10552_v32 = vpop.f32.mrb[0].mxu1 }
 0x1f4   : > { %v10554_v33 = vpop.f32.mrb[1].mxu0  ;;  %v10556_v34 = vpop.f32.mrb[1].mxu1 }
 0x1f5   : > { %v1172_v35 = vpop.f32.mrb[2].mxu0  ;;  %v1254_v36 = vpop.f32.mrb[2].mxu1 }
 0x1f6   : > { %v1173_v37 = vpop.f32.mrb[3].mxu0  ;;  %v1255_v39 = vpop.f32.mrb[3].mxu1  ;;  %v9383_v35 = vld [vmem:[#allocation8 + $0x68c] ss:$16 sps:$4 sm:$0xff]   ;;  %v9378_v36 = vld [vmem:[#allocation8 + $0x488] ss:$16 sps:$4 sm:$0xff]  }
 0x1f7   : > { %v9381_v37 = vld [vmem:[#allocation8 + $0x688] ss:$16 sps:$4 sm:$0xff]   ;;  %v9389_v39 = vld [vmem:[#allocation8 + $0x6ac] ss:$16 sps:$4 sm:$0xff]  }
 0x273   : > { %v2258_v56 = vpop.f32.mrb[4].mxu0  ;;  %v2340_v59 = vpop.f32.mrb[4].mxu1 }
 0x274   : > { %v9123_v58 = vadd.f32 %v2258_v56, %v1526_v52  ;;  %v2260_v60 = vpop.f32.mrb[5].mxu0  ;;  %v9125_v61 = vadd.f32 %v2340_v59, %v1534_v53  ;;  %v2342_v63 = vpop.f32.mrb[5].mxu1  ;;  %v9396_v52 = vld [vmem:[#allocation8 + $0x4e8] ss:$16 sps:$4 sm:$0xff]   ;;  %v9410_v59 = vld [vmem:[#allocation8 + $0x52c] ss:$16 sps:$4 sm:$0xff]  }
 0x275   : > { %v9124_v62 = vadd.f32 %v2260_v60, %v1530_v54  ;;  %v2262_v0 = vpop.f32.mrb[6].mxu0  ;;  %v9126_v2 = vadd.f32 %v2342_v63, %v1538_v55  ;;  %v2344_v3 = vpop.f32.mrb[6].mxu1  ;;  %v9399_v53 = vld [vmem:[#allocation8 + $0x6e8] ss:$16 sps:$4 sm:$0xff]   ;;  %v9404_v54 = vld [vmem:[#allocation8 + $0x50c] ss:$16 sps:$4 sm:$0xff]  }
 0x276   : > { %v2347_v1 = vmax.f32 %v9123_v58, 0.0  ;;  %v2263_v4 = vpop.f32.mrb[7].mxu0  ;;  %v2349_v5 = vmax.f32 %v9125_v61, 0.0  ;;  %v2345_v7 = vpop.f32.mrb[7].mxu1  ;;  %v9407_v55 = vld [vmem:[#allocation8 + $0x70c] ss:$16 sps:$4 sm:$0xff]  }
 0x277   : > { %v2348_v6 = vmax.f32 %v9124_v62, 0.0  ;;  %v2350_v8 = vmax.f32 %v9126_v2, 0.0  ;;  %v9402_v56 = vld [vmem:[#allocation8 + $0x508] ss:$16 sps:$4 sm:$0xff]   ;;  %v9413_v60 = vld [vmem:[#allocation8 + $0x72c] ss:$16 sps:$4 sm:$0xff]  }
 0x278   : > { %v10570_v11 = vpack.c.bf16 %v2347_v1, %v2347_v1  ;;  %v10572_v15 = vpack.c.bf16 %v2349_v5, %v2349_v5  ;;  %v9405_v58 = vld [vmem:[#allocation8 + $0x708] ss:$16 sps:$4 sm:$0xff]   ;;  %v9416_v63 = vld [vmem:[#allocation8 + $0x54c] ss:$16 sps:$4 sm:$0xff]  }
 0x279   : > { %v2352_v9 = vpack.c.bf16 %v2348_v6, %v2348_v6  ;;  %v2354_v13 = vpack.c.bf16 %v2350_v8, %v2350_v8  ;;  %v9408_v61 = vld [vmem:[#allocation8 + $0x528] ss:$16 sps:$4 sm:$0xff]   ;;  %v9419_v0 = vld [vmem:[#allocation8 + $0x74c] ss:$16 sps:$4 sm:$0xff]  }
 0x27a   : > { %v9411_v62 = vld [vmem:[#allocation8 + $0x728] ss:$16 sps:$4 sm:$0xff]   ;;  %v9422_v3 = vld [vmem:[#allocation8 + $0x56c] ss:$16 sps:$4 sm:$0xff]  }
 0x27b   : > { %3155 = vmatprep.mubr.bf16.mxu0 %v2352_v9  ;;  %3196 = vmatprep.mubr.bf16.mxu1 %v2354_v13  ;;  %v9414_v1 = vld [vmem:[#allocation8 + $0x548] ss:$16 sps:$4 sm:$0xff]   ;;  %v9425_v4 = vld [vmem:[#allocation8 + $0x76c] ss:$16 sps:$4 sm:$0xff]  }
 0x27c   : > { %3156 = vmatmul.mubr.bf16.vlgmr.msra.gmra.mrb[8].mxu0 %v10570_v11  ;;  %3197 = vmatmul.mubr.bf16.vlgmr.msra.gmra.mrb[8].mxu1 %v10572_v15  ;;  %v9417_v2 = vld [vmem:[#allocation8 + $0x748] ss:$16 sps:$4 sm:$0xff]   ;;  %v9428_v7 = vld [vmem:[#allocation8 + $0x58c] ss:$16 sps:$4 sm:$0xff]  }
 0x27d   : > { %3206 = vmatpush1.bf16.msra.mxu0 %v9354_v10  ;;  %3247 = vmatpush1.bf16.msra.mxu1 %v9357_v14  ;;  %v9420_v5 = vld [vmem:[#allocation8 + $0x568] ss:$16 sps:$4 sm:$0xff]   ;;  %v9431_v8 = vld [vmem:[#allocation8 + $0x78c] ss:$16 sps:$4 sm:$0xff]  }
 0x27e   : > { %3237 = vmatprep.mubr.bf16.mxu0 %v2352_v9  ;;  %3278 = vmatprep.mubr.bf16.mxu1 %v2354_v13  ;;  %v9423_v6 = vld [vmem:[#allocation8 + $0x768] ss:$16 sps:$4 sm:$0xff]   ;;  %v9434_v13 = vld [vmem:[#allocation8 + $0x5ac] ss:$16 sps:$4 sm:$0xff]  }
 0x27f   : > { %3207 = vmatprep.subr.bf16.mxu0 %v9362_v16  ;;  %3248 = vmatprep.subr.bf16.mxu1 %v9365_v17  ;;  %v9426_v9 = vld [vmem:[#allocation8 + $0x588] ss:$16 sps:$4 sm:$0xff]   ;;  %v9437_v14 = vld [vmem:[#allocation8 + $0x7ac] ss:$16 sps:$4 sm:$0xff]   ;;  %v10576_v16 = vld [vmem:[#allocation7] sm:$0xf] }
 0x280   : > { %v9429_v10 = vld [vmem:[#allocation8 + $0x788] ss:$16 sps:$4 sm:$0xff]  }
 0x281   : > { %3208 = vmatpush1.bf16.msra.mxu0 %v9360_v18  ;;  %3249 = vmatpush1.bf16.msra.mxu1 %v9363_v19  ;;  %v9432_v17 = vld [vmem:[#allocation8 + $0x5a8] ss:$16 sps:$4 sm:$0xff]   ;;  %v9440_v19 = vld [vmem:[#allocation8 + $0x5cc] ss:$16 sps:$4 sm:$0xff]  }
 0x282   : > { %3209 = vmatprep.subr.bf16.mxu0 %v9368_v20  ;;  %3250 = vmatprep.subr.bf16.mxu1 %v9371_v21  ;;  %v9435_v18 = vld [vmem:[#allocation8 + $0x7a8] ss:$16 sps:$4 sm:$0xff]   ;;  %v9443_v20 = vld [vmem:[#allocation8 + $0x7cc] ss:$16 sps:$4 sm:$0xff]   ;;  %v440_v21 = vrot.slane %v10576_v16, %v10562_v50 }
 0x285   : > { %3210 = vmatpush1.bf16.msra.mxu0 %v9366_v22  ;;  %3251 = vmatpush1.bf16.msra.mxu1 %v9369_v25  ;;  %v448_v22 = vrot.slane %v10576_v16, %v10564_v51  ;;  %v9438_v25 = vld [vmem:[#allocation8 + $0x5c8] ss:$16 sps:$4 sm:$0xff]  }
 0x286   : > { %3211 = vmatprep.subr.bf16.mxu0 %v9374_v26  ;;  %3252 = vmatprep.subr.bf16.mxu1 %v9377_v27  ;;  %v9441_v26 = vld [vmem:[#allocation8 + $0x7c8] ss:$16 sps:$4 sm:$0xff]   ;;  %v9446_v27 = vld [vmem:[#allocation8 + $0x5ec] ss:$16 sps:$4 sm:$0xff]  }
 0x289   : > { %3212 = vmatpush1.bf16.msra.mxu0 %v9372_v28  ;;  %3253 = vmatpush1.bf16.msra.mxu1 %v9375_v30  ;;  %v9449_v28 = vld [vmem:[#allocation8 + $0x7ec] ss:$16 sps:$4 sm:$0xff]   ;;  %v9120_v30 = vadd.f32 %v10554_v33, %v440_v21  ;;  %v9507_v21 = vld [vmem:[#allocation8 + $0x320] ss:$16 sps:$4 sm:$0xff]  }
 0x28a   : > { %3213 = vmatprep.subr.bf16.mxu0 %v9380_v31  ;;  %3254 = vmatprep.subr.bf16.mxu1 %v9383_v35  ;;  %v9122_v31 = vadd.f32 %v10556_v34, %v448_v22  ;;  %v9444_v35 = vld [vmem:[#allocation8 + $0x5e8] ss:$16 sps:$4 sm:$0xff]   ;;  %v9461_v34 = vld [vmem:[#allocation8 + $0x224] ss:$16 sps:$4 sm:$0xff]  }
 0x28b   : > { %v9512_v22 = vld [vmem:[#allocation8 + $0x144] ss:$16 sps:$4 sm:$0xff]  }
 0x28d   : > { %3214 = vmatpush1.bf16.msra.mxu0 %v9378_v36  ;;  %3255 = vmatpush1.bf16.msra.mxu1 %v9381_v37  ;;  %v9447_v36 = vld [vmem:[#allocation8 + $0x7e8] ss:$16 sps:$4 sm:$0xff]   ;;  %v9452_v37 = vld [vmem:[#allocation8 + $0x4] ss:$16 sps:$4 sm:$0xff]  }
 0x28e   : > { %3215 = vmatprep.subr.bf16.mxu0 %v9386_v38  ;;  %3256 = vmatprep.subr.bf16.mxu1 %v9389_v39  ;;  %v9455_v38 = vld [vmem:[#allocation8 + $0x204] ss:$16 sps:$4 sm:$0xff]   ;;  %v1258_v39 = vmax.f32 %v9120_v30, 0.0 }
 0x28f   : > { %v9521_v30 = vld [vmem:[#allocation8 + $0x364] ss:$16 sps:$4 sm:$0xff]  }
 0x290   : > { %v10584_v33 = vpack.c.bf16 %v1258_v39, %v1258_v39  ;;  %v9525_v39 = vld [vmem:[#allocation8 + $0x380] ss:$16 sps:$4 sm:$0xff]  }
 0x291   : > { %3216 = vmatpush1.bf16.msra.mxu0 %v9384_v40  ;;  %3257 = vmatpush1.bf16.msra.mxu1 %v9387_v41  ;;  %v1260_v40 = vmax.f32 %v9122_v31, 0.0  ;;  %v9450_v41 = vld [vmem:[#allocation8] ss:$16 sps:$4 sm:$0xff]  }
 0x292   : > { %3217 = vmatprep.subr.bf16.mxu0 %v9392_v42  ;;  %3258 = vmatprep.subr.bf16.mxu1 %v9395_v43  ;;  %v9453_v42 = vld [vmem:[#allocation8 + $0x200] ss:$16 sps:$4 sm:$0xff]   ;;  %v9458_v43 = vld [vmem:[#allocation8 + $0x24] ss:$16 sps:$4 sm:$0xff]  }
 0x293   : > { %v9516_v31 = vld [vmem:[#allocation8 + $0x160] ss:$16 sps:$4 sm:$0xff]  }
 0x295   : > { %3218 = vmatpush1.bf16.msra.mxu0 %v9390_v44  ;;  %3259 = vmatpush1.bf16.msra.mxu1 %v9393_v45  ;;  %v10587_v44 = vpack.c.bf16 %v1260_v40, %v1260_v40  ;;  %v9456_v45 = vld [vmem:[#allocation8 + $0x20] ss:$16 sps:$4 sm:$0xff]   ;;  %v9530_v40 = vld [vmem:[#allocation8 + $0x1a4] ss:$16 sps:$4 sm:$0xff]  }
 0x296   : > { %3219 = vmatprep.subr.bf16.mxu0 %v9398_v46  ;;  %3260 = vmatprep.subr.bf16.mxu1 %v9401_v47  ;;  %v9459_v46 = vld [vmem:[#allocation8 + $0x220] ss:$16 sps:$4 sm:$0xff]   ;;  %v9464_v47 = vld [vmem:[#allocation8 + $0x44] ss:$16 sps:$4 sm:$0xff]  }
 0x299   : > { %3220 = vmatpush1.bf16.msra.mxu0 %v9396_v52  ;;  %3261 = vmatpush1.bf16.msra.mxu1 %v9399_v53  ;;  %v9467_v52 = vld [vmem:[#allocation8 + $0x244] ss:$16 sps:$4 sm:$0xff]   ;;  %v9462_v53 = vld [vmem:[#allocation8 + $0x40] ss:$16 sps:$4 sm:$0xff]  }
 0x29a   : > { %3221 = vmatprep.subr.bf16.mxu0 %v9404_v54  ;;  %3262 = vmatprep.subr.bf16.mxu1 %v9407_v55  ;;  %v9470_v54 = vld [vmem:[#allocation8 + $0x64] ss:$16 sps:$4 sm:$0xff]   ;;  %v9468_v55 = vld [vmem:[#allocation8 + $0x60] ss:$16 sps:$4 sm:$0xff]  }
 0x29d   : > { %3222 = vmatpush1.bf16.msra.mxu0 %v9402_v56  ;;  %3263 = vmatpush1.bf16.msra.mxu1 %v9405_v58  ;;  %v9471_v56 = vld [vmem:[#allocation8 + $0x260] ss:$16 sps:$4 sm:$0xff]   ;;  %v9476_v58 = vld [vmem:[#allocation8 + $0x84] ss:$16 sps:$4 sm:$0xff]  }
 0x29e   : > { %3223 = vmatprep.subr.bf16.mxu0 %v9410_v59  ;;  %3264 = vmatprep.subr.bf16.mxu1 %v9413_v60  ;;  %v9479_v59 = vld [vmem:[#allocation8 + $0x284] ss:$16 sps:$4 sm:$0xff]   ;;  %v9474_v60 = vld [vmem:[#allocation8 + $0x80] ss:$16 sps:$4 sm:$0xff]  }
 0x2a1   : > { %3224 = vmatpush1.bf16.msra.mxu0 %v9408_v61  ;;  %3265 = vmatpush1.bf16.msra.mxu1 %v9411_v62  ;;  %v9477_v61 = vld [vmem:[#allocation8 + $0x280] ss:$16 sps:$4 sm:$0xff]   ;;  %v9482_v62 = vld [vmem:[#allocation8 + $0xa4] ss:$16 sps:$4 sm:$0xff]  }
 0x2a2   : > { %3225 = vmatprep.subr.bf16.mxu0 %v9416_v63  ;;  %3266 = vmatprep.subr.bf16.mxu1 %v9419_v0  ;;  %v9485_v63 = vld [vmem:[#allocation8 + $0x2a4] ss:$16 sps:$4 sm:$0xff]   ;;  %v9480_v0 = vld [vmem:[#allocation8 + $0xa0] ss:$16 sps:$4 sm:$0xff]  }
 0x2a5   : > { %3226 = vmatpush1.bf16.msra.mxu0 %v9414_v1  ;;  %3267 = vmatpush1.bf16.msra.mxu1 %v9417_v2  ;;  %v9483_v1 = vld [vmem:[#allocation8 + $0x2a0] ss:$16 sps:$4 sm:$0xff]   ;;  %v9488_v2 = vld [vmem:[#allocation8 + $0xc4] ss:$16 sps:$4 sm:$0xff]  }
 0x2a6   : > { %3227 = vmatprep.subr.bf16.mxu0 %v9422_v3  ;;  %3268 = vmatprep.subr.bf16.mxu1 %v9425_v4  ;;  %v9491_v3 = vld [vmem:[#allocation8 + $0x2c4] ss:$16 sps:$4 sm:$0xff]   ;;  %v9486_v4 = vld [vmem:[#allocation8 + $0xc0] ss:$16 sps:$4 sm:$0xff]  }
 0x2a9   : > { %3228 = vmatpush1.bf16.msra.mxu0 %v9420_v5  ;;  %3269 = vmatpush1.bf16.msra.mxu1 %v9423_v6  ;;  %v9489_v5 = vld [vmem:[#allocation8 + $0x2c0] ss:$16 sps:$4 sm:$0xff]   ;;  %v9494_v6 = vld [vmem:[#allocation8 + $0xe4] ss:$16 sps:$4 sm:$0xff]  }
 0x2aa   : > { %3229 = vmatprep.subr.bf16.mxu0 %v9428_v7  ;;  %3270 = vmatprep.subr.bf16.mxu1 %v9431_v8  ;;  %v9497_v7 = vld [vmem:[#allocation8 + $0x2e4] ss:$16 sps:$4 sm:$0xff]   ;;  %v9492_v8 = vld [vmem:[#allocation8 + $0xe0] ss:$16 sps:$4 sm:$0xff]  }
 0x2ad   : > { %3230 = vmatpush1.bf16.msra.mxu0 %v9426_v9  ;;  %3271 = vmatpush1.bf16.msra.mxu1 %v9429_v10  ;;  %v9495_v9 = vld [vmem:[#allocation8 + $0x2e0] ss:$16 sps:$4 sm:$0xff]   ;;  %v9500_v10 = vld [vmem:[#allocation8 + $0x104] ss:$16 sps:$4 sm:$0xff]  }
 0x2ae   : > { %3231 = vmatprep.subr.bf16.mxu0 %v9434_v13  ;;  %3272 = vmatprep.subr.bf16.mxu1 %v9437_v14  ;;  %v9503_v13 = vld [vmem:[#allocation8 + $0x304] ss:$16 sps:$4 sm:$0xff]   ;;  %v9498_v14 = vld [vmem:[#allocation8 + $0x100] ss:$16 sps:$4 sm:$0xff]  }
 0x2b1   : > { %3232 = vmatpush1.bf16.msra.mxu0 %v9432_v17  ;;  %3273 = vmatpush1.bf16.msra.mxu1 %v9435_v18  ;;  %v9501_v17 = vld [vmem:[#allocation8 + $0x300] ss:$16 sps:$4 sm:$0xff]   ;;  %v9506_v18 = vld [vmem:[#allocation8 + $0x124] ss:$16 sps:$4 sm:$0xff]  }
 0x2b2   : > { %3233 = vmatprep.subr.bf16.mxu0 %v9440_v19  ;;  %3274 = vmatprep.subr.bf16.mxu1 %v9443_v20  ;;  %v9509_v19 = vld [vmem:[#allocation8 + $0x324] ss:$16 sps:$4 sm:$0xff]   ;;  %v9504_v20 = vld [vmem:[#allocation8 + $0x120] ss:$16 sps:$4 sm:$0xff]  }
 0x2b5   : > { %3234 = vmatpush1.bf16.msra.mxu0 %v9438_v25  ;;  %3275 = vmatpush1.bf16.msra.mxu1 %v9441_v26  ;;  %v9515_v25 = vld [vmem:[#allocation8 + $0x344] ss:$16 sps:$4 sm:$0xff]   ;;  %v9510_v26 = vld [vmem:[#allocation8 + $0x140] ss:$16 sps:$4 sm:$0xff]  }
 0x2b6   : > { %3235 = vmatprep.subr.bf16.mxu0 %v9446_v27  ;;  %3276 = vmatprep.subr.bf16.mxu1 %v9449_v28  ;;  %v9513_v27 = vld [vmem:[#allocation8 + $0x340] ss:$16 sps:$4 sm:$0xff]   ;;  %v9518_v28 = vld [vmem:[#allocation8 + $0x164] ss:$16 sps:$4 sm:$0xff]  }
 0x2b9   : > { %3236 = vmatpush1.bf16.msra.mxu0 %v9444_v35  ;;  %3277 = vmatpush1.bf16.msra.mxu1 %v9447_v36  ;;  %v9519_v35 = vld [vmem:[#allocation8 + $0x360] ss:$16 sps:$4 sm:$0xff]   ;;  %v9524_v36 = vld [vmem:[#allocation8 + $0x184] ss:$16 sps:$4 sm:$0xff]  }
 0x2ba   : > { %3927 = vmatprep.subr.bf16.mxu0 %v9452_v37  ;;  %3968 = vmatprep.subr.bf16.mxu1 %v9455_v38  ;;  %v9527_v37 = vld [vmem:[#allocation8 + $0x384] ss:$16 sps:$4 sm:$0xff]   ;;  %v9522_v38 = vld [vmem:[#allocation8 + $0x180] ss:$16 sps:$4 sm:$0xff]  }
 0x2bc   : > { %3238 = vmatmul.mubr.bf16.vlgmr.msra.gmra.mrb[12].mxu0 %v10570_v11  ;;  %3279 = vmatmul.mubr.bf16.vlgmr.msra.gmra.mrb[12].mxu1 %v10572_v15  ;;  %v9465_v11 = vld [vmem:[#allocation8 + $0x240] ss:$16 sps:$4 sm:$0xff]   ;;  %v9473_v15 = vld [vmem:[#allocation8 + $0x264] ss:$16 sps:$4 sm:$0xff]  }
 0x2bd   : > { %3928 = vmatpush1.bf16.msra.mxu0 %v9450_v41  ;;  %3959 = vmatprep.mubr.bf16.mxu0 %v10584_v33  ;;  %v9533_v41 = vld [vmem:[#allocation8 + $0x3a4] ss:$16 sps:$4 sm:$0xff]  }
 0x2be   : > { %3969 = vmatpush1.bf16.msra.mxu1 %v9453_v42  ;;  %4000 = vmatprep.mubr.bf16.mxu1 %v10587_v44  ;;  %v9528_v42 = vld [vmem:[#allocation8 + $0x1a0] ss:$16 sps:$4 sm:$0xff]  }
 0x2bf   : > { %3929 = vmatprep.subr.bf16.mxu0 %v9458_v43  ;;  %3970 = vmatprep.subr.bf16.mxu1 %v9461_v34  ;;  %v436_v43 = vrot.slane %v10576_v16, %v10558_v48  ;;  %v9531_v34 = vld [vmem:[#allocation8 + $0x3a0] ss:$16 sps:$4 sm:$0xff]  }
 0x2c1   : > { %3930 = vmatpush1.bf16.msra.mxu0 %v9456_v45  ;;  %v9536_v45 = vld [vmem:[#allocation8 + $0x1c4] ss:$16 sps:$4 sm:$0xff]  }
 0x2c2   : > { %3971 = vmatpush1.bf16.msra.mxu1 %v9459_v46  ;;  %3931 = vmatprep.subr.bf16.mxu0 %v9464_v47  ;;  %v444_v46 = vrot.slane %v10576_v16, %v10560_v49  ;;  %v9539_v47 = vld [vmem:[#allocation8 + $0x3c4] ss:$16 sps:$4 sm:$0xff]   ;;  %v9543_v16 = vld [vmem:[#allocation8 + $0x3e0] ss:$16 sps:$4 sm:$0xff]  }
 0x2c3   : > { %3972 = vmatprep.subr.bf16.mxu1 %v9467_v52  ;;  %v9534_v52 = vld [vmem:[#allocation8 + $0x1c0] ss:$16 sps:$4 sm:$0xff]  }
 0x2c5   : > { %3932 = vmatpush1.bf16.msra.mxu0 %v9462_v53  ;;  %v9119_v53 = vadd.f32 %v10550_v29, %v436_v43  ;;  %v9546_v29 = vld [vmem:[#allocation8 + $0x8] ss:$16 sps:$4 sm:$0xff]  }
 0x2c6   : > { %3973 = vmatpush1.bf16.msra.mxu1 %v9465_v11  ;;  %3933 = vmatprep.subr.bf16.mxu0 %v9470_v54  ;;  %v9537_v11 = vld [vmem:[#allocation8 + $0x3c0] ss:$16 sps:$4 sm:$0xff]   ;;  %v9542_v54 = vld [vmem:[#allocation8 + $0x1e4] ss:$16 sps:$4 sm:$0xff]   ;;  %v9603_v43 = vld [vmem:[#allocation8 + $0x328] ss:$16 sps:$4 sm:$0xff]  }
 0x2c7   : > { %3974 = vmatprep.subr.bf16.mxu1 %v9473_v15  ;;  %v9121_v15 = vadd.f32 %v10552_v32, %v444_v46  ;;  %v9606_v46 = vld [vmem:[#allocation8 + $0x148] ss:$16 sps:$4 sm:$0xff]  }
 0x2c9   : > { %3934 = vmatpush1.bf16.msra.mxu0 %v9468_v55  ;;  %v9545_v55 = vld [vmem:[#allocation8 + $0x3e4] ss:$16 sps:$4 sm:$0xff]  }
 0x2ca   : > { %3975 = vmatpush1.bf16.msra.mxu1 %v9471_v56  ;;  %3935 = vmatprep.subr.bf16.mxu0 %v9476_v58  ;;  %v9540_v56 = vld [vmem:[#allocation8 + $0x1e0] ss:$16 sps:$4 sm:$0xff]   ;;  %v1257_v58 = vmax.f32 %v9119_v53, 0.0  ;;  %v9617_v53 = vld [vmem:[#allocation8 + $0x36c] ss:$16 sps:$4 sm:$0xff]  }
 0x2cb   : > { %3976 = vmatprep.subr.bf16.mxu1 %v9479_v59  ;;  %v9548_v59 = vld [vmem:[#allocation8 + $0xc] ss:$16 sps:$4 sm:$0xff]  }
 0x2cd   : > { %3936 = vmatpush1.bf16.msra.mxu0 %v9474_v60  ;;  %v1259_v60 = vmax.f32 %v9121_v15, 0.0  ;;  %v9620_v15 = vld [vmem:[#allocation8 + $0x18c] ss:$16 sps:$4 sm:$0xff]  }
 0x2ce   : > { %3977 = vmatpush1.bf16.msra.mxu1 %v9477_v61  ;;  %3937 = vmatprep.subr.bf16.mxu0 %v9482_v62  ;;  %v9551_v61 = vld [vmem:[#allocation8 + $0x20c] ss:$16 sps:$4 sm:$0xff]   ;;  %v10598_v62 = vpack.c.bf16 %v1257_v58, %v1257_v58  ;;  %v9621_v58 = vld [vmem:[#allocation8 + $0x388] ss:$16 sps:$4 sm:$0xff]  }
 0x2cf   : > { %3978 = vmatprep.subr.bf16.mxu1 %v9485_v63  ;;  %v9549_v63 = vld [vmem:[#allocation8 + $0x208] ss:$16 sps:$4 sm:$0xff]   ;;  %v10600_v32 = vpack.c.bf16 %v1259_v60, %v1259_v60 }
 0x2d0   : > { %v9624_v60 = vld [vmem:[#allocation8 + $0x1a8] ss:$16 sps:$4 sm:$0xff]  }
 0x2d1   : > { %3938 = vmatpush1.bf16.msra.mxu0 %v9480_v0  ;;  %v9554_v0 = vld [vmem:[#allocation8 + $0x2c] ss:$16 sps:$4 sm:$0xff]  }
 0x2d2   : > { %3979 = vmatpush1.bf16.msra.mxu1 %v9483_v1  ;;  %3939 = vmatprep.subr.bf16.mxu0 %v9488_v2  ;;  %v9557_v1 = vld [vmem:[#allocation8 + $0x22c] ss:$16 sps:$4 sm:$0xff]   ;;  %v9552_v2 = vld [vmem:[#allocation8 + $0x28] ss:$16 sps:$4 sm:$0xff]  }
 0x2d3   : > { %3980 = vmatprep.subr.bf16.mxu1 %v9491_v3  ;;  %v9555_v3 = vld [vmem:[#allocation8 + $0x228] ss:$16 sps:$4 sm:$0xff]  }
 0x2d5   : > { %3940 = vmatpush1.bf16.msra.mxu0 %v9486_v4  ;;  %v9560_v4 = vld [vmem:[#allocation8 + $0x4c] ss:$16 sps:$4 sm:$0xff]  }
 0x2d6   : > { %3981 = vmatpush1.bf16.msra.mxu1 %v9489_v5  ;;  %3941 = vmatprep.subr.bf16.mxu0 %v9494_v6  ;;  %v9563_v5 = vld [vmem:[#allocation8 + $0x24c] ss:$16 sps:$4 sm:$0xff]   ;;  %v9558_v6 = vld [vmem:[#allocation8 + $0x48] ss:$16 sps:$4 sm:$0xff]  }
 0x2d7   : > { %3982 = vmatprep.subr.bf16.mxu1 %v9497_v7  ;;  %v9561_v7 = vld [vmem:[#allocation8 + $0x248] ss:$16 sps:$4 sm:$0xff]  }
 0x2d9   : > { %3942 = vmatpush1.bf16.msra.mxu0 %v9492_v8  ;;  %v9566_v8 = vld [vmem:[#allocation8 + $0x6c] ss:$16 sps:$4 sm:$0xff]  }
 0x2da   : > { %3983 = vmatpush1.bf16.msra.mxu1 %v9495_v9  ;;  %3943 = vmatprep.subr.bf16.mxu0 %v9500_v10  ;;  %v9569_v9 = vld [vmem:[#allocation8 + $0x26c] ss:$16 sps:$4 sm:$0xff]   ;;  %v9564_v10 = vld [vmem:[#allocation8 + $0x68] ss:$16 sps:$4 sm:$0xff]  }
 0x2db   : > { %3984 = vmatprep.subr.bf16.mxu1 %v9503_v13  ;;  %v9572_v13 = vld [vmem:[#allocation8 + $0x8c] ss:$16 sps:$4 sm:$0xff]  }
 0x2dd   : > { %3944 = vmatpush1.bf16.msra.mxu0 %v9498_v14  ;;  %v9575_v14 = vld [vmem:[#allocation8 + $0x28c] ss:$16 sps:$4 sm:$0xff]  }
 0x2de   : > { %3985 = vmatpush1.bf16.msra.mxu1 %v9501_v17  ;;  %3945 = vmatprep.subr.bf16.mxu0 %v9506_v18  ;;  %v9573_v17 = vld [vmem:[#allocation8 + $0x288] ss:$16 sps:$4 sm:$0xff]   ;;  %v9578_v18 = vld [vmem:[#allocation8 + $0xac] ss:$16 sps:$4 sm:$0xff]  }
 0x2df   : > { %3986 = vmatprep.subr.bf16.mxu1 %v9509_v19  ;;  %v9581_v19 = vld [vmem:[#allocation8 + $0x2ac] ss:$16 sps:$4 sm:$0xff]  }
 0x2e1   : > { %3946 = vmatpush1.bf16.msra.mxu0 %v9504_v20  ;;  %v9576_v20 = vld [vmem:[#allocation8 + $0xa8] ss:$16 sps:$4 sm:$0xff]  }
 0x2e2   : > { %3987 = vmatpush1.bf16.msra.mxu1 %v9507_v21  ;;  %3947 = vmatprep.subr.bf16.mxu0 %v9512_v22  ;;  %v9579_v21 = vld [vmem:[#allocation8 + $0x2a8] ss:$16 sps:$4 sm:$0xff]   ;;  %v9584_v22 = vld [vmem:[#allocation8 + $0xcc] ss:$16 sps:$4 sm:$0xff]  }
 0x2e3   : > { %3988 = vmatprep.subr.bf16.mxu1 %v9515_v25  ;;  %v9587_v25 = vld [vmem:[#allocation8 + $0x2cc] ss:$16 sps:$4 sm:$0xff]  }
 0x2e5   : > { %3948 = vmatpush1.bf16.msra.mxu0 %v9510_v26  ;;  %v9582_v26 = vld [vmem:[#allocation8 + $0xc8] ss:$16 sps:$4 sm:$0xff]  }
 0x2e6   : > { %3989 = vmatpush1.bf16.msra.mxu1 %v9513_v27  ;;  %3949 = vmatprep.subr.bf16.mxu0 %v9518_v28  ;;  %v9585_v27 = vld [vmem:[#allocation8 + $0x2c8] ss:$16 sps:$4 sm:$0xff]   ;;  %v9590_v28 = vld [vmem:[#allocation8 + $0xec] ss:$16 sps:$4 sm:$0xff]  }
 0x2e7   : > { %3990 = vmatprep.subr.bf16.mxu1 %v9521_v30  ;;  %v9593_v30 = vld [vmem:[#allocation8 + $0x2ec] ss:$16 sps:$4 sm:$0xff]  }
 0x2e9   : > { %3950 = vmatpush1.bf16.msra.mxu0 %v9516_v31  ;;  %v9588_v31 = vld [vmem:[#allocation8 + $0xe8] ss:$16 sps:$4 sm:$0xff]  }
 0x2ea   : > { %3991 = vmatpush1.bf16.msra.mxu1 %v9519_v35  ;;  %3951 = vmatprep.subr.bf16.mxu0 %v9524_v36  ;;  %v9591_v35 = vld [vmem:[#allocation8 + $0x2e8] ss:$16 sps:$4 sm:$0xff]   ;;  %v9596_v36 = vld [vmem:[#allocation8 + $0x10c] ss:$16 sps:$4 sm:$0xff]  }
 0x2eb   : > { %3992 = vmatprep.subr.bf16.mxu1 %v9527_v37  ;;  %v9599_v37 = vld [vmem:[#allocation8 + $0x30c] ss:$16 sps:$4 sm:$0xff]  }
 0x2ed   : > { %3952 = vmatpush1.bf16.msra.mxu0 %v9522_v38  ;;  %v9594_v38 = vld [vmem:[#allocation8 + $0x108] ss:$16 sps:$4 sm:$0xff]  }
 0x2ee   : > { %3993 = vmatpush1.bf16.msra.mxu1 %v9525_v39  ;;  %3953 = vmatprep.subr.bf16.mxu0 %v9530_v40  ;;  %v9597_v39 = vld [vmem:[#allocation8 + $0x308] ss:$16 sps:$4 sm:$0xff]   ;;  %v9602_v40 = vld [vmem:[#allocation8 + $0x12c] ss:$16 sps:$4 sm:$0xff]  }
 0x2ef   : > { %3994 = vmatprep.subr.bf16.mxu1 %v9533_v41  ;;  %v9605_v41 = vld [vmem:[#allocation8 + $0x32c] ss:$16 sps:$4 sm:$0xff]  }
 0x2f1   : > { %3954 = vmatpush1.bf16.msra.mxu0 %v9528_v42  ;;  %v9600_v42 = vld [vmem:[#allocation8 + $0x128] ss:$16 sps:$4 sm:$0xff]  }
 0x2f2   : > { %3995 = vmatpush1.bf16.msra.mxu1 %v9531_v34  ;;  %3955 = vmatprep.subr.bf16.mxu0 %v9536_v45  ;;  %v9608_v34 = vld [vmem:[#allocation8 + $0x14c] ss:$16 sps:$4 sm:$0xff]  }
 0x2f3   : > { %3996 = vmatprep.subr.bf16.mxu1 %v9539_v47  ;;  %v9611_v45 = vld [vmem:[#allocation8 + $0x34c] ss:$16 sps:$4 sm:$0xff]   ;;  %v9609_v47 = vld [vmem:[#allocation8 + $0x348] ss:$16 sps:$4 sm:$0xff]  }
 0x2f5   : > { %3956 = vmatpush1.bf16.msra.mxu0 %v9534_v52  ;;  %v9614_v52 = vld [vmem:[#allocation8 + $0x16c] ss:$16 sps:$4 sm:$0xff]  }
 0x2f6   : > { %3997 = vmatpush1.bf16.msra.mxu1 %v9537_v11  ;;  %3957 = vmatprep.subr.bf16.mxu0 %v9542_v54  ;;  %v9612_v11 = vld [vmem:[#allocation8 + $0x168] ss:$16 sps:$4 sm:$0xff]  }
 0x2f7   : > { %3998 = vmatprep.subr.bf16.mxu1 %v9545_v55  ;;  %v9615_v54 = vld [vmem:[#allocation8 + $0x368] ss:$16 sps:$4 sm:$0xff]   ;;  %v9623_v55 = vld [vmem:[#allocation8 + $0x38c] ss:$16 sps:$4 sm:$0xff]  }
 0x2f9   : > { %3958 = vmatpush1.bf16.msra.mxu0 %v9540_v56  ;;  %v9618_v56 = vld [vmem:[#allocation8 + $0x188] ss:$16 sps:$4 sm:$0xff]  }
 0x2fa   : > { %3999 = vmatpush1.bf16.msra.mxu1 %v9543_v16  ;;  %4009 = vmatprep.subr.bf16.mxu0 %v9548_v59  ;;  %v9626_v16 = vld [vmem:[#allocation8 + $0x1ac] ss:$16 sps:$4 sm:$0xff]  }
 0x2fb   : > { %4050 = vmatprep.subr.bf16.mxu1 %v9551_v61  ;;  %v9629_v59 = vld [vmem:[#allocation8 + $0x3ac] ss:$16 sps:$4 sm:$0xff]   ;;  %v9627_v61 = vld [vmem:[#allocation8 + $0x3a8] ss:$16 sps:$4 sm:$0xff]  }
 0x2fc   : > { %3960 = vmatmul.mubr.bf16.vlgmr.msra.gmra.mrb[16].mxu0 %v10598_v62 }
 0x2fd   : > { %4001 = vmatmul.mubr.bf16.vlgmr.msra.gmra.mrb[16].mxu1 %v10600_v32  ;;  %4010 = vmatpush1.bf16.msra.mxu0 %v9546_v29  ;;  %v9632_v29 = vld [vmem:[#allocation8 + $0x1cc] ss:$16 sps:$4 sm:$0xff]  }
 0x2fe   : > { %4041 = vmatprep.mubr.bf16.mxu0 %v10584_v33  ;;  %4051 = vmatpush1.bf16.msra.mxu1 %v9549_v63  ;;  %v9567_v33 = vld [vmem:[#allocation8 + $0x268] ss:$16 sps:$4 sm:$0xff]   ;;  %v9635_v63 = vld [vmem:[#allocation8 + $0x3cc] ss:$16 sps:$4 sm:$0xff]  }
 0x2ff   : > { %4082 = vmatprep.mubr.bf16.mxu1 %v10587_v44  ;;  %4011 = vmatprep.subr.bf16.mxu0 %v9554_v0  ;;  %v9570_v44 = vld [vmem:[#allocation8 + $0x88] ss:$16 sps:$4 sm:$0xff]  }
 0x300   : > { %4052 = vmatprep.subr.bf16.mxu1 %v9557_v1  ;;  %v9630_v0 = vld [vmem:[#allocation8 + $0x1c8] ss:$16 sps:$4 sm:$0xff]  }
 0x301   : > { %4012 = vmatpush1.bf16.msra.mxu0 %v9552_v2  ;;  %v9633_v1 = vld [vmem:[#allocation8 + $0x3c8] ss:$16 sps:$4 sm:$0xff]   ;;  %v9638_v2 = vld [vmem:[#allocation8 + $0x1ec] ss:$16 sps:$4 sm:$0xff]  }
 0x302   : > { %4053 = vmatpush1.bf16.msra.mxu1 %v9555_v3  ;;  %4013 = vmatprep.subr.bf16.mxu0 %v9560_v4  ;;  %v9641_v3 = vld [vmem:[#allocation8 + $0x3ec] ss:$16 sps:$4 sm:$0xff]   ;;  %v4091_v4 = vld [vmem:[#allocation5 + $0x20] sm:$0xff] }
 0x303   : > { %4054 = vmatprep.subr.bf16.mxu1 %v9563_v5  ;;  %v4093_v5 = vld [vmem:[#allocation5 + $0x60] sm:$0xff] }
 0x305   : > { %4014 = vmatpush1.bf16.msra.mxu0 %v9558_v6  ;;  %v4092_v6 = vld [vmem:[#allocation5 + $0x28] sm:$0xff] }
 0x306   : > { %4055 = vmatpush1.bf16.msra.mxu1 %v9561_v7  ;;  %4015 = vmatprep.subr.bf16.mxu0 %v9566_v8  ;;  %v4094_v7 = vld [vmem:[#allocation5 + $0x68] sm:$0xff] }
 0x307   : > { %4056 = vmatprep.subr.bf16.mxu1 %v9569_v9  ;;  %v9636_v8 = vld [vmem:[#allocation8 + $0x1e8] ss:$16 sps:$4 sm:$0xff]  }
 0x308   : > { %v9639_v9 = vld [vmem:[#allocation8 + $0x3e8] ss:$16 sps:$4 sm:$0xff]  }
 0x309   : > { %4016 = vmatpush1.bf16.msra.mxu0 %v9564_v10  ;;  %v8601_v10 = vcombine.high %v4091_v4, %v4093_v5 }
 0x30a   : > { %4057 = vmatpush1.bf16.msra.mxu1 %v9567_v33  ;;  %4017 = vmatprep.subr.bf16.mxu0 %v9572_v13  ;;  %v8603_v33 = vcombine.high %v4092_v6, %v4094_v7  ;;  %v4095_v13 = vld [vmem:[#allocation5 + $0xa0] sm:$0xff] }
 0x30b   : > { %4058 = vmatprep.subr.bf16.mxu1 %v9575_v14  ;;  %v4097_v14 = vld [vmem:[#allocation5 + $0xe0] sm:$0xff] }
 0x30d   : > { %4018 = vmatpush1.bf16.msra.mxu0 %v9570_v44  ;;  %v4096_v44 = vld [vmem:[#allocation5 + $0xa8] sm:$0xff] }
 0x30e   : > { %4059 = vmatpush1.bf16.msra.mxu1 %v9573_v17  ;;  %4019 = vmatprep.subr.bf16.mxu0 %v9578_v18  ;;  %v4098_v17 = vld [vmem:[#allocation5 + $0xe8] sm:$0xff]  ;;  %v8600_v18 = vcombine.low %v4091_v4, %v4093_v5  ;;  %v4119_v5 = vld [vmem:[#allocation5 + $0x3a0] sm:$0xff] }
 0x30f   : > { %4060 = vmatprep.subr.bf16.mxu1 %v9581_v19  ;;  %v8602_v19 = vcombine.low %v4092_v6, %v4094_v7  ;;  %v4121_v6 = vld [vmem:[#allocation5 + $0x3e0] sm:$0xff] }
 0x311   : > { %4020 = vmatpush1.bf16.msra.mxu0 %v9576_v20  ;;  %v8605_v20 = vcombine.high %v4095_v13, %v4097_v14 }
 0x312   : > { %4061 = vmatpush1.bf16.msra.mxu1 %v9579_v21  ;;  %4021 = vmatprep.subr.bf16.mxu0 %v9584_v22  ;;  %v8607_v21 = vcombine.high %v4096_v44, %v4098_v17  ;;  %v4099_v22 = vld [vmem:[#allocation5 + $0x120] sm:$0xff] }
 0x313   : > { %4062 = vmatprep.subr.bf16.mxu1 %v9587_v25  ;;  %v4101_v25 = vld [vmem:[#allocation5 + $0x160] sm:$0xff] }
 0x315   : > { %4022 = vmatpush1.bf16.msra.mxu0 %v9582_v26  ;;  %v4100_v26 = vld [vmem:[#allocation5 + $0x128] sm:$0xff] }
 0x316   : > { %4063 = vmatpush1.bf16.msra.mxu1 %v9585_v27  ;;  %4023 = vmatprep.subr.bf16.mxu0 %v9590_v28  ;;  %v4102_v27 = vld [vmem:[#allocation5 + $0x168] sm:$0xff]  ;;  %v8604_v28 = vcombine.low %v4095_v13, %v4097_v14 }
 0x317   : > { %4064 = vmatprep.subr.bf16.mxu1 %v9593_v30  ;;  %v8606_v30 = vcombine.low %v4096_v44, %v4098_v17 }
 0x319   : > { %4024 = vmatpush1.bf16.msra.mxu0 %v9588_v31  ;;  %v8609_v31 = vcombine.high %v4099_v22, %v4101_v25 }
 0x31a   : > { %4065 = vmatpush1.bf16.msra.mxu1 %v9591_v35  ;;  %4025 = vmatprep.subr.bf16.mxu0 %v9596_v36  ;;  %v8611_v35 = vcombine.high %v4100_v26, %v4102_v27  ;;  %v4103_v36 = vld [vmem:[#allocation5 + $0x1a0] sm:$0xff] }
 0x31b   : > { %4066 = vmatprep.subr.bf16.mxu1 %v9599_v37  ;;  %v4105_v37 = vld [vmem:[#allocation5 + $0x1e0] sm:$0xff] }
 0x31d   : > { %4026 = vmatpush1.bf16.msra.mxu0 %v9594_v38  ;;  %v4104_v38 = vld [vmem:[#allocation5 + $0x1a8] sm:$0xff] }
 0x31e   : > { %4067 = vmatpush1.bf16.msra.mxu1 %v9597_v39  ;;  %4027 = vmatprep.subr.bf16.mxu0 %v9602_v40  ;;  %v4106_v39 = vld [vmem:[#allocation5 + $0x1e8] sm:$0xff]  ;;  %v8613_v40 = vcombine.high %v4103_v36, %v4105_v37 }
 0x31f   : > { %4068 = vmatprep.subr.bf16.mxu1 %v9605_v41  ;;  %v8615_v41 = vcombine.high %v4104_v38, %v4106_v39 }
 0x321   : > { %4028 = vmatpush1.bf16.msra.mxu0 %v9600_v42  ;;  %v4107_v42 = vld [vmem:[#allocation5 + $0x220] sm:$0xff] }
 0x322   : > { %4069 = vmatpush1.bf16.msra.mxu1 %v9603_v43  ;;  %4029 = vmatprep.subr.bf16.mxu0 %v9608_v34  ;;  %v4109_v43 = vld [vmem:[#allocation5 + $0x260] sm:$0xff]  ;;  %v4108_v34 = vld [vmem:[#allocation5 + $0x228] sm:$0xff] }
 0x323   : > { %4070 = vmatprep.subr.bf16.mxu1 %v9611_v45  ;;  %v4110_v45 = vld [vmem:[#allocation5 + $0x268] sm:$0xff] }
 0x325   : > { %4030 = vmatpush1.bf16.msra.mxu0 %v9606_v46  ;;  %v8612_v46 = vcombine.low %v4103_v36, %v4105_v37 }
 0x326   : > { %4071 = vmatpush1.bf16.msra.mxu1 %v9609_v47  ;;  %4031 = vmatprep.subr.bf16.mxu0 %v9614_v52  ;;  %v8614_v47 = vcombine.low %v4104_v38, %v4106_v39  ;;  %v8617_v52 = vcombine.high %v4107_v42, %v4109_v43  ;;  %v4127_v38 = vld [vmem:[#allocation5 + $0x4a0] sm:$0xff] }
 0x327   : > { %4072 = vmatprep.subr.bf16.mxu1 %v9617_v53  ;;  %v8619_v53 = vcombine.high %v4108_v34, %v4110_v45  ;;  %v4129_v39 = vld [vmem:[#allocation5 + $0x4e0] sm:$0xff] }
 0x329   : > { %4032 = vmatpush1.bf16.msra.mxu0 %v9612_v11  ;;  %v4111_v11 = vld [vmem:[#allocation5 + $0x2a0] sm:$0xff] }
 0x32a   : > { %4073 = vmatpush1.bf16.msra.mxu1 %v9615_v54  ;;  %4033 = vmatprep.subr.bf16.mxu0 %v9620_v15  ;;  %v4113_v54 = vld [vmem:[#allocation5 + $0x2e0] sm:$0xff]  ;;  %v4112_v15 = vld [vmem:[#allocation5 + $0x2a8] sm:$0xff] }
 0x32b   : > { %4074 = vmatprep.subr.bf16.mxu1 %v9623_v55  ;;  %v4114_v55 = vld [vmem:[#allocation5 + $0x2e8] sm:$0xff] }
 0x32d   : > { %4034 = vmatpush1.bf16.msra.mxu0 %v9618_v56  ;;  %v8616_v56 = vcombine.low %v4107_v42, %v4109_v43  ;;  %v8637_v42 = vcombine.high %v4127_v38, %v4129_v39 }
 0x32e   : > { %4075 = vmatpush1.bf16.msra.mxu1 %v9621_v58  ;;  %4035 = vmatprep.subr.bf16.mxu0 %v9626_v16  ;;  %v8618_v58 = vcombine.low %v4108_v34, %v4110_v45  ;;  %v8621_v16 = vcombine.high %v4111_v11, %v4113_v54  ;;  %v4131_v34 = vld [vmem:[#allocation5 + $0x520] sm:$0xff] }
 0x32f   : > { %4076 = vmatprep.subr.bf16.mxu1 %v9629_v59  ;;  %v8623_v59 = vcombine.high %v4112_v15, %v4114_v55  ;;  %v4133_v45 = vld [vmem:[#allocation5 + $0x560] sm:$0xff] }
 0x331   : > { %4036 = vmatpush1.bf16.msra.mxu0 %v9624_v60  ;;  %v4115_v60 = vld [vmem:[#allocation5 + $0x320] sm:$0xff] }
 0x332   : > { %4077 = vmatpush1.bf16.msra.mxu1 %v9627_v61  ;;  %4037 = vmatprep.subr.bf16.mxu0 %v9632_v29  ;;  %v4117_v61 = vld [vmem:[#allocation5 + $0x360] sm:$0xff]  ;;  %v4116_v29 = vld [vmem:[#allocation5 + $0x328] sm:$0xff] }
 0x333   : > { %4078 = vmatprep.subr.bf16.mxu1 %v9635_v63  ;;  %v4118_v63 = vld [vmem:[#allocation5 + $0x368] sm:$0xff]  ;;  %v8624_v44 = vcombine.low %v4115_v60, %v4117_v61 }
 0x334   : > { %v8627_v4 = vcombine.high %v4116_v29, %v4118_v63 }
 0x335   : > { %4038 = vmatpush1.bf16.msra.mxu0 %v9630_v0  ;;  %v8620_v0 = vcombine.low %v4111_v11, %v4113_v54  ;;  %v8641_v11 = vcombine.high %v4131_v34, %v4133_v45 }
 0x336   : > { %4079 = vmatpush1.bf16.msra.mxu1 %v9633_v1  ;;  %4039 = vmatprep.subr.bf16.mxu0 %v9638_v2  ;;  %v8622_v1 = vcombine.low %v4112_v15, %v4114_v55  ;;  %v8625_v2 = vcombine.high %v4115_v60, %v4117_v61  ;;  %v4135_v15 = vld [vmem:[#allocation5 + $0x5a0] sm:$0xff] }
 0x337   : > { %4080 = vmatprep.subr.bf16.mxu1 %v9641_v3  ;;  %v4137_v55 = vld [vmem:[#allocation5 + $0x5e0] sm:$0xff] }
 0x338   : > { %v8645_v60 = vcombine.high %v4135_v15, %v4137_v55 }
 0x339   : > { %4040 = vmatpush1.bf16.msra.mxu0 %v9636_v8 }
 0x33a   : > { %4081 = vmatpush1.bf16.msra.mxu1 %v9639_v9  ;;  %4881 = vmatprep.subr.bf16.mxu0 %v8601_v10  ;;  %v4120_v9 = vld [vmem:[#allocation5 + $0x3a8] sm:$0xff] }
 0x33b   : > { %4963 = vmatprep.subr.bf16.mxu1 %v8603_v33  ;;  %v4122_v10 = vld [vmem:[#allocation5 + $0x3e8] sm:$0xff] }
 0x33c   : > { %4042 = vmatmul.mubr.bf16.vlgmr.msra.gmra.mrb[20].mxu0 %v10598_v62  ;;  %v8608_v62 = vcombine.low %v4099_v22, %v4101_v25  ;;  %v8631_v25 = vcombine.high %v4120_v9, %v4122_v10 }
 0x33d   : > { %4083 = vmatmul.mubr.bf16.vlgmr.msra.gmra.mrb[20].mxu1 %v10600_v32  ;;  %4882 = vmatpush1.bf16.msra.mxu0 %v8600_v18  ;;  %v8610_v32 = vcombine.low %v4100_v26, %v4102_v27  ;;  %v4123_v26 = vld [vmem:[#allocation5 + $0x420] sm:$0xff] }
 0x33e   : > { %4964 = vmatpush1.bf16.msra.mxu1 %v8602_v19  ;;  %4883 = vmatprep.subr.bf16.mxu0 %v8605_v20  ;;  %v8626_v20 = vcombine.low %v4116_v29, %v4118_v63  ;;  %v4125_v27 = vld [vmem:[#allocation5 + $0x460] sm:$0xff] }
 0x33f   : > { %4965 = vmatprep.subr.bf16.mxu1 %v8607_v21  ;;  %4913 = vmatprep.mubr.bf16.mxu0 %v10523_v57  ;;  %v8629_v21 = vcombine.high %v4119_v5, %v4121_v6  ;;  %v8633_v36 = vcombine.high %v4123_v26, %v4125_v27  ;;  %v4139_v29 = vld [vmem:[#allocation5 + $0x620] sm:$0xff] }
 0x340   : > { %4995 = vmatprep.mubr.bf16.mxu1 %v10523_v57  ;;  %v4141_v63 = vld [vmem:[#allocation5 + $0x660] sm:$0xff] }
 0x341   : > { %4884 = vmatpush1.bf16.msra.mxu0 %v8604_v28  ;;  %v4124_v28 = vld [vmem:[#allocation5 + $0x428] sm:$0xff] }
 0x342   : > { %4966 = vmatpush1.bf16.msra.mxu1 %v8606_v30  ;;  %4885 = vmatprep.subr.bf16.mxu0 %v8609_v31  ;;  %v4126_v30 = vld [vmem:[#allocation5 + $0x468] sm:$0xff]  ;;  %v8628_v31 = vcombine.low %v4119_v5, %v4121_v6  ;;  %v4143_v6 = vld [vmem:[#allocation5 + $0x6a0] sm:$0xff] }
 0x343   : > { %4967 = vmatprep.subr.bf16.mxu1 %v8611_v35  ;;  %v8630_v35 = vcombine.low %v4120_v9, %v4122_v10  ;;  %v8635_v37 = vcombine.high %v4124_v28, %v4126_v30  ;;  %v4146_v9 = vld [vmem:[#allocation5 + $0x6e8] sm:$0xff]  ;;  %v8648_v10 = vcombine.low %v4139_v29, %v4141_v63 }
 0x345   : > { %4886 = vmatpush1.bf16.msra.mxu0 %v8608_v62  ;;  %v4128_v62 = vld [vmem:[#allocation5 + $0x4a8] sm:$0xff] }
 0x346   : > { %4968 = vmatpush1.bf16.msra.mxu1 %v8610_v32  ;;  %4887 = vmatprep.subr.bf16.mxu0 %v8613_v40  ;;  %v4130_v32 = vld [vmem:[#allocation5 + $0x4e8] sm:$0xff]  ;;  %v8632_v40 = vcombine.low %v4123_v26, %v4125_v27 }
 0x347   : > { %4969 = vmatprep.subr.bf16.mxu1 %v8615_v41  ;;  %v8634_v41 = vcombine.low %v4124_v28, %v4126_v30  ;;  %v8639_v43 = vcombine.high %v4128_v62, %v4130_v32  ;;  %v4151_v28 = vld [vmem:[#allocation5 + $0x7a0] sm:$0xff] }
 0x348   : > { %v4153_v30 = vld [vmem:[#allocation5 + $0x7e0] sm:$0xff] }
 0x349   : > { %4888 = vmatpush1.bf16.msra.mxu0 %v8612_v46  ;;  %v4132_v46 = vld [vmem:[#allocation5 + $0x528] sm:$0xff] }
 0x34a   : > { %4970 = vmatpush1.bf16.msra.mxu1 %v8614_v47  ;;  %4889 = vmatprep.subr.bf16.mxu0 %v8617_v52  ;;  %v4134_v47 = vld [vmem:[#allocation5 + $0x568] sm:$0xff]  ;;  %v8636_v52 = vcombine.low %v4127_v38, %v4129_v39  ;;  %v8661_v38 = vcombine.high %v4151_v28, %v4153_v30 }
 0x34b   : > { %4971 = vmatprep.subr.bf16.mxu1 %v8619_v53  ;;  %v8638_v53 = vcombine.low %v4128_v62, %v4130_v32  ;;  %v8643_v54 = vcombine.high %v4132_v46, %v4134_v47  ;;  %v4155_v62 = vld [vmem:[#allocation5 + $0x820] sm:$0xff] }
 0x34c   : > { %v4157_v32 = vld [vmem:[#allocation5 + $0x860] sm:$0xff] }
 0x34d   : > { %4890 = vmatpush1.bf16.msra.mxu0 %v8616_v56  ;;  %v4136_v56 = vld [vmem:[#allocation5 + $0x5a8] sm:$0xff] }
 0x34e   : > { %4972 = vmatpush1.bf16.msra.mxu1 %v8618_v58  ;;  %4891 = vmatprep.subr.bf16.mxu0 %v8621_v16  ;;  %v4138_v58 = vld [vmem:[#allocation5 + $0x5e8] sm:$0xff]  ;;  %v8640_v16 = vcombine.low %v4131_v34, %v4133_v45  ;;  %v8665_v34 = vcombine.high %v4155_v62, %v4157_v32 }
 0x34f   : > { %v3157_v3 = vpop.f32.mrb[8].mxu0  ;;  %4973 = vmatprep.subr.bf16.mxu1 %v8623_v59  ;;  %v3198_v7 = vpop.f32.mrb[8].mxu1  ;;  %v8642_v59 = vcombine.low %v4132_v46, %v4134_v47  ;;  %v8647_v61 = vcombine.high %v4136_v56, %v4138_v58  ;;  %v4159_v46 = vld [vmem:[#allocation5 + $0x8a0] sm:$0xff] }
 0x350   : > { %v3159_v8 = vpop.f32.mrb[9].mxu0  ;;  %v10610_v33 = vadd.f32 %v3198_v7, %v3157_v3  ;;  %v3200_v13 = vpop.f32.mrb[9].mxu1  ;;  %v8646_v3 = vcombine.low %v4136_v56, %v4138_v58  ;;  %v4145_v7 = vld [vmem:[#allocation5 + $0x6e0] sm:$0xff] }
 0x351   : > { %4892 = vmatpush1.bf16.msra.mxu0 %v8620_v0  ;;  %v3161_v14 = vpop.f32.mrb[10].mxu0  ;;  %v10612_v17 = vadd.f32 %v3200_v13, %v3159_v8  ;;  %v3202_v18 = vpop.f32.mrb[10].mxu1  ;;  %v4140_v0 = vld [vmem:[#allocation5 + $0x628] sm:$0xff]  ;;  %v4161_v47 = vld [vmem:[#allocation5 + $0x8e0] sm:$0xff] }
 0x352   : > { %4974 = vmatpush1.bf16.msra.mxu1 %v8622_v1  ;;  %v3162_v19 = vpop.f32.mrb[11].mxu0  ;;  %4893 = vmatprep.subr.bf16.mxu0 %v8625_v2  ;;  %v3203_v22 = vpop.f32.mrb[11].mxu1  ;;  %v4142_v1 = vld [vmem:[#allocation5 + $0x668] sm:$0xff]  ;;  %v8644_v2 = vcombine.low %v4135_v15, %v4137_v55  ;;  %v8653_v14 = vcombine.high %v4143_v6, %v4145_v7  ;;  %v4147_v18 = vld [vmem:[#allocation5 + $0x720] sm:$0xff]  ;;  %v8669_v15 = vcombine.high %v4159_v46, %v4161_v47 }
 0x353   : > { %4975 = vmatprep.subr.bf16.mxu1 %v8627_v4  ;;  %v8649_v4 = vcombine.high %v4139_v29, %v4141_v63  ;;  %v8651_v5 = vcombine.high %v4140_v0, %v4142_v1  ;;  %v4144_v8 = vld [vmem:[#allocation5 + $0x6a8] sm:$0xff]  ;;  %v8650_v13 = vcombine.low %v4140_v0, %v4142_v1  ;;  %v4149_v19 = vld [vmem:[#allocation5 + $0x760] sm:$0xff]  ;;  %v8652_v22 = vcombine.low %v4143_v6, %v4145_v7 }
 0x354   : > { %v8657_v26 = vcombine.high %v4147_v18, %v4149_v19  ;;  %v4163_v56 = vld [vmem:[#allocation5 + $0x920] sm:$0xff] }
 0x355   : > { %4894 = vmatpush1.bf16.msra.mxu0 %v8624_v44  ;;  %v8655_v44 = vcombine.high %v4144_v8, %v4146_v9  ;;  %v4165_v58 = vld [vmem:[#allocation5 + $0x960] sm:$0xff] }
 0x356   : > { %4976 = vmatpush1.bf16.msra.mxu1 %v8626_v20  ;;  %4895 = vmatprep.subr.bf16.mxu0 %v8629_v21  ;;  %v4148_v20 = vld [vmem:[#allocation5 + $0x728] sm:$0xff]  ;;  %v8673_v29 = vcombine.high %v4163_v56, %v4165_v58  ;;  %v4167_v0 = vld [vmem:[#allocation5 + $0x9a0] sm:$0xff] }
 0x357   : > { %4977 = vmatprep.subr.bf16.mxu1 %v8631_v25  ;;  %v4150_v21 = vld [vmem:[#allocation5 + $0x768] sm:$0xff]  ;;  %v8654_v25 = vcombine.low %v4144_v8, %v4146_v9  ;;  %v4169_v1 = vld [vmem:[#allocation5 + $0x9e0] sm:$0xff] }
 0x358   : > { %v8659_v27 = vcombine.high %v4148_v20, %v4150_v21  ;;  %v8677_v6 = vcombine.high %v4167_v0, %v4169_v1  ;;  %v4171_v8 = vld [vmem:[#allocation5 + $0xa20] sm:$0xff] }
 0x359   : > { %4896 = vmatpush1.bf16.msra.mxu0 %v8628_v31  ;;  %v4152_v31 = vld [vmem:[#allocation5 + $0x7a8] sm:$0xff]  ;;  %v4173_v9 = vld [vmem:[#allocation5 + $0xa60] sm:$0xff] }
 0x35a   : > { %4978 = vmatpush1.bf16.msra.mxu1 %v8630_v35  ;;  %4897 = vmatprep.subr.bf16.mxu0 %v8633_v36  ;;  %v4154_v35 = vld [vmem:[#allocation5 + $0x7e8] sm:$0xff]  ;;  %v8656_v36 = vcombine.low %v4147_v18, %v4149_v19  ;;  %v8681_v18 = vcombine.high %v4171_v8, %v4173_v9 }
 0x35b   : > { %4979 = vmatprep.subr.bf16.mxu1 %v8635_v37  ;;  %v8658_v37 = vcombine.low %v4148_v20, %v4150_v21  ;;  %v8663_v39 = vcombine.high %v4152_v31, %v4154_v35  ;;  %v4175_v20 = vld [vmem:[#allocation5 + $0xaa0] sm:$0xff] }
 0x35c   : > { %v4177_v21 = vld [vmem:[#allocation5 + $0xae0] sm:$0xff] }
 0x35d   : > { %4898 = vmatpush1.bf16.msra.mxu0 %v8632_v40  ;;  %v4156_v40 = vld [vmem:[#allocation5 + $0x828] sm:$0xff] }
 0x35e   : > { %4980 = vmatpush1.bf16.msra.mxu1 %v8634_v41  ;;  %4899 = vmatprep.subr.bf16.mxu0 %v8637_v42  ;;  %v4158_v41 = vld [vmem:[#allocation5 + $0x868] sm:$0xff]  ;;  %v8660_v42 = vcombine.low %v4151_v28, %v4153_v30  ;;  %v8685_v28 = vcombine.high %v4175_v20, %v4177_v21 }
 0x35f   : > { %4981 = vmatprep.subr.bf16.mxu1 %v8639_v43  ;;  %v8662_v43 = vcombine.low %v4152_v31, %v4154_v35  ;;  %v8667_v45 = vcombine.high %v4156_v40, %v4158_v41  ;;  %v4179_v31 = vld [vmem:[#allocation5 + $0xb20] sm:$0xff] }
 0x360   : > { %v4181_v35 = vld [vmem:[#allocation5 + $0xb60] sm:$0xff] }
 0x361   : > { %4900 = vmatpush1.bf16.msra.mxu0 %v8636_v52  ;;  %v4160_v52 = vld [vmem:[#allocation5 + $0x8a8] sm:$0xff] }
 0x362   : > { %4982 = vmatpush1.bf16.msra.mxu1 %v8638_v53  ;;  %4901 = vmatprep.subr.bf16.mxu0 %v8641_v11  ;;  %v4162_v53 = vld [vmem:[#allocation5 + $0x8e8] sm:$0xff]  ;;  %v8664_v11 = vcombine.low %v4155_v62, %v4157_v32  ;;  %v8689_v62 = vcombine.high %v4179_v31, %v4181_v35 }
 0x363   : > { %4983 = vmatprep.subr.bf16.mxu1 %v8643_v54  ;;  %v8666_v54 = vcombine.low %v4156_v40, %v4158_v41  ;;  %v8671_v55 = vcombine.high %v4160_v52, %v4162_v53  ;;  %v4183_v41 = vld [vmem:[#allocation5 + $0xba0] sm:$0xff] }
 0x365   : > { %4902 = vmatpush1.bf16.msra.mxu0 %v8640_v16  ;;  %v4164_v16 = vld [vmem:[#allocation5 + $0x928] sm:$0xff] }
 0x366   : > { %4984 = vmatpush1.bf16.msra.mxu1 %v8642_v59  ;;  %4903 = vmatprep.subr.bf16.mxu0 %v8645_v60  ;;  %v4166_v59 = vld [vmem:[#allocation5 + $0x968] sm:$0xff]  ;;  %v8668_v60 = vcombine.low %v4159_v46, %v4161_v47 }
 0x367   : > { %4985 = vmatprep.subr.bf16.mxu1 %v8647_v61  ;;  %v8670_v61 = vcombine.low %v4160_v52, %v4162_v53  ;;  %v8675_v63 = vcombine.high %v4164_v16, %v4166_v59  ;;  %v4186_v46 = vld [vmem:[#allocation5 + $0xbe8] sm:$0xff] }
 0x369   : > { %4904 = vmatpush1.bf16.msra.mxu0 %v8644_v2  ;;  %v4168_v2 = vld [vmem:[#allocation5 + $0x9a8] sm:$0xff] }
 0x36a   : > { %4986 = vmatpush1.bf16.msra.mxu1 %v8646_v3  ;;  %4905 = vmatprep.subr.bf16.mxu0 %v8649_v4  ;;  %v4170_v3 = vld [vmem:[#allocation5 + $0x9e8] sm:$0xff]  ;;  %v8672_v4 = vcombine.low %v4163_v56, %v4165_v58 }
 0x36b   : > { %4987 = vmatprep.subr.bf16.mxu1 %v8651_v5  ;;  %v8674_v5 = vcombine.low %v4164_v16, %v4166_v59  ;;  %v8679_v7 = vcombine.high %v4168_v2, %v4170_v3 }
 0x36d   : > { %4906 = vmatpush1.bf16.msra.mxu0 %v8648_v10  ;;  %v4172_v10 = vld [vmem:[#allocation5 + $0xa28] sm:$0xff] }
 0x36e   : > { %4988 = vmatpush1.bf16.msra.mxu1 %v8650_v13  ;;  %4907 = vmatprep.subr.bf16.mxu0 %v8653_v14  ;;  %v4174_v13 = vld [vmem:[#allocation5 + $0xa68] sm:$0xff]  ;;  %v8676_v14 = vcombine.low %v4167_v0, %v4169_v1 }
 0x36f   : > { %4989 = vmatprep.subr.bf16.mxu1 %v8655_v44  ;;  %v8678_v44 = vcombine.low %v4168_v2, %v4170_v3  ;;  %v8683_v19 = vcombine.high %v4172_v10, %v4174_v13 }
 0x371   : > { %4908 = vmatpush1.bf16.msra.mxu0 %v8652_v22  ;;  %v4176_v22 = vld [vmem:[#allocation5 + $0xaa8] sm:$0xff] }
 0x372   : > { %4990 = vmatpush1.bf16.msra.mxu1 %v8654_v25  ;;  %4909 = vmatprep.subr.bf16.mxu0 %v8657_v26  ;;  %v4178_v25 = vld [vmem:[#allocation5 + $0xae8] sm:$0xff]  ;;  %v8680_v26 = vcombine.low %v4171_v8, %v4173_v9 }
 0x373   : > { %4991 = vmatprep.subr.bf16.mxu1 %v8659_v27  ;;  %v8682_v27 = vcombine.low %v4172_v10, %v4174_v13  ;;  %v8687_v30 = vcombine.high %v4176_v22, %v4178_v25 }
 0x375   : > { %4910 = vmatpush1.bf16.msra.mxu0 %v8656_v36  ;;  %v4180_v36 = vld [vmem:[#allocation5 + $0xb28] sm:$0xff] }
 0x376   : > { %4992 = vmatpush1.bf16.msra.mxu1 %v8658_v37  ;;  %4911 = vmatprep.subr.bf16.mxu0 %v8661_v38  ;;  %v4182_v37 = vld [vmem:[#allocation5 + $0xb68] sm:$0xff]  ;;  %v8684_v38 = vcombine.low %v4175_v20, %v4177_v21 }
 0x377   : > { %4993 = vmatprep.subr.bf16.mxu1 %v8663_v39  ;;  %v8686_v39 = vcombine.low %v4176_v22, %v4178_v25  ;;  %v8691_v40 = vcombine.high %v4180_v36, %v4182_v37  ;;  %v8690_v56 = vcombine.low %v4180_v36, %v4182_v37 }
 0x379   : > { %4912 = vmatpush1.bf16.msra.mxu0 %v8660_v42  ;;  %v4185_v42 = vld [vmem:[#allocation5 + $0xbe0] sm:$0xff] }
 0x37a   : > { %4994 = vmatpush1.bf16.msra.mxu1 %v8662_v43  ;;  %4922 = vmatprep.subr.bf16.mxu0 %v8665_v34  ;;  %v8693_v58 = vcombine.high %v4183_v41, %v4185_v42  ;;  %v8692_v0 = vcombine.low %v4183_v41, %v4185_v42 }
 0x37b   : > { %5004 = vmatprep.subr.bf16.mxu1 %v8667_v45  ;;  %v4184_v45 = vld [vmem:[#allocation5 + $0xba8] sm:$0xff] }
 0x37c   : > { %4914 = vmatmul.mubr.bf16.vlgmr.msra.gmra.mrb[24].mxu0 %v10528_v12  ;;  %v8695_v59 = vcombine.high %v4184_v45, %v4186_v46  ;;  %v8694_v1 = vcombine.low %v4184_v45, %v4186_v46  ;;  %v4209_v45 = vld [vmem:[#allocation5 + $0xee0] sm:$0xff]  ;;  %v4208_v46 = vld [vmem:[#allocation5 + $0xea8] sm:$0xff] }
 0x37d   : > { %4923 = vmatpush1.bf16.msra.mxu0 %v8664_v11  ;;  %4996 = vmatmul.mubr.bf16.vlgmr.msra.gmra.mrb[24].mxu1 %v10528_v12  ;;  %v8688_v11 = vcombine.low %v4179_v31, %v4181_v35 }
 0x37e   : > { %5005 = vmatpush1.bf16.msra.mxu1 %v8666_v54  ;;  %4924 = vmatprep.subr.bf16.mxu0 %v8669_v15 }
 0x37f   : > { %5006 = vmatprep.subr.bf16.mxu1 %v8671_v55  ;;  %4954 = vmatprep.mubr.bf16.mxu0 %v10531_v24 }
 0x380   : > { %5036 = vmatprep.mubr.bf16.mxu1 %v10531_v24 }
 0x381   : > { %4925 = vmatpush1.bf16.msra.mxu0 %v8668_v60  ;;  %v4187_v60 = vld [vmem:[#allocation5 + $0xc20] sm:$0xff] }
 0x382   : > { %5007 = vmatpush1.bf16.msra.mxu1 %v8670_v61  ;;  %4926 = vmatprep.subr.bf16.mxu0 %v8673_v29  ;;  %v4189_v61 = vld [vmem:[#allocation5 + $0xc60] sm:$0xff]  ;;  %v4188_v29 = vld [vmem:[#allocation5 + $0xc28] sm:$0xff] }
 0x383   : > { %5008 = vmatprep.subr.bf16.mxu1 %v8675_v63  ;;  %v4190_v63 = vld [vmem:[#allocation5 + $0xc68] sm:$0xff]  ;;  %v8697_v2 = vcombine.high %v4187_v60, %v4189_v61  ;;  %v8696_v8 = vcombine.low %v4187_v60, %v4189_v61 }
 0x384   : > { %v8699_v3 = vcombine.high %v4188_v29, %v4190_v63  ;;  %v8698_v9 = vcombine.low %v4188_v29, %v4190_v63 }
 0x385   : > { %4927 = vmatpush1.bf16.msra.mxu0 %v8672_v4  ;;  %v4191_v4 = vld [vmem:[#allocation5 + $0xca0] sm:$0xff] }
 0x386   : > { %5009 = vmatpush1.bf16.msra.mxu1 %v8674_v5  ;;  %4928 = vmatprep.subr.bf16.mxu0 %v8677_v6  ;;  %v4193_v5 = vld [vmem:[#allocation5 + $0xce0] sm:$0xff]  ;;  %v4192_v6 = vld [vmem:[#allocation5 + $0xca8] sm:$0xff] }
 0x387   : > { %5010 = vmatprep.subr.bf16.mxu1 %v8679_v7  ;;  %v4194_v7 = vld [vmem:[#allocation5 + $0xce8] sm:$0xff]  ;;  %v8701_v10 = vcombine.high %v4191_v4, %v4193_v5  ;;  %v8700_v20 = vcombine.low %v4191_v4, %v4193_v5 }
 0x388   : > { %v8703_v13 = vcombine.high %v4192_v6, %v4194_v7  ;;  %v8702_v21 = vcombine.low %v4192_v6, %v4194_v7 }
 0x389   : > { %4929 = vmatpush1.bf16.msra.mxu0 %v8676_v14  ;;  %v4195_v14 = vld [vmem:[#allocation5 + $0xd20] sm:$0xff] }
 0x38a   : > { %5011 = vmatpush1.bf16.msra.mxu1 %v8678_v44  ;;  %4930 = vmatprep.subr.bf16.mxu0 %v8681_v18  ;;  %v4197_v44 = vld [vmem:[#allocation5 + $0xd60] sm:$0xff]  ;;  %v4196_v18 = vld [vmem:[#allocation5 + $0xd28] sm:$0xff] }
 0x38b   : > { %5012 = vmatprep.subr.bf16.mxu1 %v8683_v19  ;;  %v4198_v19 = vld [vmem:[#allocation5 + $0xd68] sm:$0xff]  ;;  %v8705_v22 = vcombine.high %v4195_v14, %v4197_v44  ;;  %v8704_v31 = vcombine.low %v4195_v14, %v4197_v44  ;;  %v9642_v14 = vld [vmem:[#allocation8 + $0x800] ss:$16 sps:$4 sm:$0xff]  }
 0x38c   : > { %v8707_v25 = vcombine.high %v4196_v18, %v4198_v19  ;;  %v8706_v35 = vcombine.low %v4196_v18, %v4198_v19  ;;  %v9645_v44 = vld [vmem:[#allocation8 + $0xa00] ss:$16 sps:$4 sm:$0xff]   ;;  %v9650_v18 = vld [vmem:[#allocation8 + $0x824] ss:$16 sps:$4 sm:$0xff]  }
 0x38d   : > { %4931 = vmatpush1.bf16.msra.mxu0 %v8680_v26  ;;  %v4199_v26 = vld [vmem:[#allocation5 + $0xda0] sm:$0xff] }
 0x38e   : > { %5013 = vmatpush1.bf16.msra.mxu1 %v8682_v27  ;;  %4932 = vmatprep.subr.bf16.mxu0 %v8685_v28  ;;  %v4201_v27 = vld [vmem:[#allocation5 + $0xde0] sm:$0xff]  ;;  %v4200_v28 = vld [vmem:[#allocation5 + $0xda8] sm:$0xff] }
 0x38f   : > { %v3239_v32 = vpop.f32.mrb[12].mxu0  ;;  %5014 = vmatprep.subr.bf16.mxu1 %v8687_v30  ;;  %v3280_v43 = vpop.f32.mrb[12].mxu1  ;;  %v4202_v30 = vld [vmem:[#allocation5 + $0xde8] sm:$0xff]  ;;  %v8709_v36 = vcombine.high %v4199_v26, %v4201_v27  ;;  %v9653_v19 = vld [vmem:[#allocation8 + $0xa24] ss:$16 sps:$4 sm:$0xff]  }
 0x390   : > { %v3241_v34 = vpop.f32.mrb[13].mxu0  ;;  %v10618_v47 = vadd.f32 %v3280_v43, %v3239_v32  ;;  %v3282_v52 = vpop.f32.mrb[13].mxu1  ;;  %v8711_v37 = vcombine.high %v4200_v28, %v4202_v30  ;;  %v4206_v32 = vld [vmem:[#allocation5 + $0xe68] sm:$0xff]  ;;  %v8710_v41 = vcombine.low %v4200_v28, %v4202_v30  ;;  %v9662_v28 = vld [vmem:[#allocation8 + $0x864] ss:$16 sps:$4 sm:$0xff]  }
 0x391   : > { %v3243_v53 = vpop.f32.mrb[14].mxu0  ;;  %4933 = vmatpush1.bf16.msra.mxu0 %v8684_v38  ;;  %v10620_v54 = vadd.f32 %v3282_v52, %v3241_v34  ;;  %v3284_v15 = vpop.f32.mrb[14].mxu1  ;;  %v4203_v38 = vld [vmem:[#allocation5 + $0xe20] sm:$0xff]  ;;  %v4210_v52 = vld [vmem:[#allocation5 + $0xee8] sm:$0xff] }
 0x392   : > { %5015 = vmatpush1.bf16.msra.mxu1 %v8686_v39  ;;  %v3244_v55 = vpop.f32.mrb[15].mxu0  ;;  %4934 = vmatprep.subr.bf16.mxu0 %v8689_v62  ;;  %v3285_v16 = vpop.f32.mrb[15].mxu1  ;;  %v4205_v39 = vld [vmem:[#allocation5 + $0xe60] sm:$0xff]  ;;  %v4204_v62 = vld [vmem:[#allocation5 + $0xe28] sm:$0xff]  ;;  %v8718_v61 = vcombine.low %v4208_v46, %v4210_v52 }
 0x393   : > { %5016 = vmatprep.subr.bf16.mxu1 %v8691_v40  ;;  %v8708_v40 = vcombine.low %v4199_v26, %v4201_v27  ;;  %v8713_v42 = vcombine.high %v4203_v38, %v4205_v39  ;;  %v8715_v43 = vcombine.high %v4204_v62, %v4206_v32  ;;  %v4207_v34 = vld [vmem:[#allocation5 + $0xea0] sm:$0xff]  ;;  %v8712_v53 = vcombine.low %v4203_v38, %v4205_v39  ;;  %v4212_v16 = vld [vmem:[#allocation5 + $0xf28] sm:$0xff] }
 0x394   : > { %v8717_v15 = vcombine.high %v4207_v34, %v4209_v45  ;;  %v8719_v55 = vcombine.high %v4208_v46, %v4210_v52  ;;  %v8716_v60 = vcombine.low %v4207_v34, %v4209_v45  ;;  %v9654_v26 = vld [vmem:[#allocation8 + $0x840] ss:$16 sps:$4 sm:$0xff]   ;;  %v9665_v30 = vld [vmem:[#allocation8 + $0xa64] ss:$16 sps:$4 sm:$0xff]  }
 0x395   : > { %4935 = vmatpush1.bf16.msra.mxu0 %v8688_v11  ;;  %v8714_v11 = vcombine.low %v4204_v62, %v4206_v32  ;;  %v9657_v27 = vld [vmem:[#allocation8 + $0xa40] ss:$16 sps:$4 sm:$0xff]   ;;  %v9674_v62 = vld [vmem:[#allocation8 + $0x8a4] ss:$16 sps:$4 sm:$0xff]  }
 0x396   : > { %5017 = vmatpush1.bf16.msra.mxu1 %v8690_v56  ;;  %4936 = vmatprep.subr.bf16.mxu0 %v8693_v58  ;;  %v4211_v56 = vld [vmem:[#allocation5 + $0xf20] sm:$0xff] }
 0x397   : > { %5018 = vmatprep.subr.bf16.mxu1 %v8695_v59  ;;  %v4213_v58 = vld [vmem:[#allocation5 + $0xf60] sm:$0xff]  ;;  %v4214_v59 = vld [vmem:[#allocation5 + $0xf68] sm:$0xff] }
 0x398   : > { %v8721_v29 = vcombine.high %v4211_v56, %v4213_v58  ;;  %v8723_v63 = vcombine.high %v4212_v16, %v4214_v59  ;;  %v8720_v4 = vcombine.low %v4211_v56, %v4213_v58  ;;  %v8722_v5 = vcombine.low %v4212_v16, %v4214_v59  ;;  %v9666_v38 = vld [vmem:[#allocation8 + $0x880] ss:$16 sps:$4 sm:$0xff]   ;;  %v9677_v32 = vld [vmem:[#allocation8 + $0xaa4] ss:$16 sps:$4 sm:$0xff]  }
 0x399   : > { %4937 = vmatpush1.bf16.msra.mxu0 %v8692_v0  ;;  %v4215_v0 = vld [vmem:[#allocation5 + $0xfa0] sm:$0xff] }
 0x39a   : > { %5019 = vmatpush1.bf16.msra.mxu1 %v8694_v1  ;;  %4938 = vmatprep.subr.bf16.mxu0 %v8697_v2  ;;  %v4217_v1 = vld [vmem:[#allocation5 + $0xfe0] sm:$0xff]  ;;  %v4216_v2 = vld [vmem:[#allocation5 + $0xfa8] sm:$0xff] }
 0x39b   : > { %5020 = vmatprep.subr.bf16.mxu1 %v8699_v3  ;;  %v4218_v3 = vld [vmem:[#allocation5 + $0xfe8] sm:$0xff]  ;;  %v8725_v6 = vcombine.high %v4215_v0, %v4217_v1  ;;  %v9669_v39 = vld [vmem:[#allocation8 + $0xa80] ss:$16 sps:$4 sm:$0xff]   ;;  %v9683_v34 = vld [vmem:[#allocation8 + $0xac4] ss:$16 sps:$4 sm:$0xff]  }
 0x39c   : > { %v8727_v7 = vcombine.high %v4216_v2, %v4218_v3  ;;  %v9681_v59 = vld [vmem:[#allocation8 + $0xac0] ss:$16 sps:$4 sm:$0xff]  }
 0x39d   : > { %4939 = vmatpush1.bf16.msra.mxu0 %v8696_v8  ;;  %v8724_v8 = vcombine.low %v4215_v0, %v4217_v1  ;;  %v9692_v0 = vld [vmem:[#allocation8 + $0x904] ss:$16 sps:$4 sm:$0xff]  }
 0x39e   : > { %5021 = vmatpush1.bf16.msra.mxu1 %v8698_v9  ;;  %4940 = vmatprep.subr.bf16.mxu0 %v8701_v10  ;;  %v8726_v9 = vcombine.low %v4216_v2, %v4218_v3  ;;  %v9644_v10 = vld [vmem:[#allocation8 + $0x804] ss:$16 sps:$4 sm:$0xff]   ;;  %v9690_v2 = vld [vmem:[#allocation8 + $0x900] ss:$16 sps:$4 sm:$0xff]  }
 0x39f   : > { %5022 = vmatprep.subr.bf16.mxu1 %v8703_v13  ;;  %v9647_v13 = vld [vmem:[#allocation8 + $0xa04] ss:$16 sps:$4 sm:$0xff]   ;;  %v9693_v3 = vld [vmem:[#allocation8 + $0xb00] ss:$16 sps:$4 sm:$0xff]  }
 0x3a0   : > { %v9695_v1 = vld [vmem:[#allocation8 + $0xb04] ss:$16 sps:$4 sm:$0xff]  }
 0x3a1   : > { %4941 = vmatpush1.bf16.msra.mxu0 %v8700_v20  ;;  %v9648_v20 = vld [vmem:[#allocation8 + $0x820] ss:$16 sps:$4 sm:$0xff]  }
 0x3a2   : > { %5023 = vmatpush1.bf16.msra.mxu1 %v8702_v21  ;;  %4942 = vmatprep.subr.bf16.mxu0 %v8705_v22  ;;  %v9651_v21 = vld [vmem:[#allocation8 + $0xa20] ss:$16 sps:$4 sm:$0xff]   ;;  %v9656_v22 = vld [vmem:[#allocation8 + $0x844] ss:$16 sps:$4 sm:$0xff]  }
 0x3a3   : > { %5024 = vmatprep.subr.bf16.mxu1 %v8707_v25  ;;  %v9659_v25 = vld [vmem:[#allocation8 + $0xa44] ss:$16 sps:$4 sm:$0xff]  }
 0x3a5   : > { %4943 = vmatpush1.bf16.msra.mxu0 %v8704_v31  ;;  %v9660_v31 = vld [vmem:[#allocation8 + $0x860] ss:$16 sps:$4 sm:$0xff]  }
 0x3a6   : > { %5025 = vmatpush1.bf16.msra.mxu1 %v8706_v35  ;;  %4944 = vmatprep.subr.bf16.mxu0 %v8709_v36  ;;  %v9663_v35 = vld [vmem:[#allocation8 + $0xa60] ss:$16 sps:$4 sm:$0xff]   ;;  %v9668_v36 = vld [vmem:[#allocation8 + $0x884] ss:$16 sps:$4 sm:$0xff]  }
 0x3a7   : > { %5026 = vmatprep.subr.bf16.mxu1 %v8711_v37  ;;  %v9671_v37 = vld [vmem:[#allocation8 + $0xa84] ss:$16 sps:$4 sm:$0xff]  }
 0x3a9   : > { %4945 = vmatpush1.bf16.msra.mxu0 %v8708_v40  ;;  %v9672_v40 = vld [vmem:[#allocation8 + $0x8a0] ss:$16 sps:$4 sm:$0xff]  }
 0x3aa   : > { %5027 = vmatpush1.bf16.msra.mxu1 %v8710_v41  ;;  %4946 = vmatprep.subr.bf16.mxu0 %v8713_v42  ;;  %v9675_v41 = vld [vmem:[#allocation8 + $0xaa0] ss:$16 sps:$4 sm:$0xff]   ;;  %v9680_v42 = vld [vmem:[#allocation8 + $0x8c4] ss:$16 sps:$4 sm:$0xff]  }
 0x3ab   : > { %5028 = vmatprep.subr.bf16.mxu1 %v8715_v43 }
 0x3ad   : > { %4947 = vmatpush1.bf16.msra.mxu0 %v8712_v53 }
 0x3ae   : > { %5029 = vmatpush1.bf16.msra.mxu1 %v8714_v11  ;;  %4948 = vmatprep.subr.bf16.mxu0 %v8717_v15 }
 0x3af   : > { %5030 = vmatprep.subr.bf16.mxu1 %v8719_v55  ;;  %v9678_v55 = vld [vmem:[#allocation8 + $0x8c0] ss:$16 sps:$4 sm:$0xff]  }
 0x3b1   : > { %4949 = vmatpush1.bf16.msra.mxu0 %v8716_v60  ;;  %v9686_v60 = vld [vmem:[#allocation8 + $0x8e4] ss:$16 sps:$4 sm:$0xff]  }
 0x3b2   : > { %5031 = vmatpush1.bf16.msra.mxu1 %v8718_v61  ;;  %4950 = vmatprep.subr.bf16.mxu0 %v8721_v29 }
 0x3b3   : > { %5032 = vmatprep.subr.bf16.mxu1 %v8723_v63  ;;  %v9684_v63 = vld [vmem:[#allocation8 + $0x8e0] ss:$16 sps:$4 sm:$0xff]  }
 0x3b5   : > { %4951 = vmatpush1.bf16.msra.mxu0 %v8720_v4  ;;  %v9698_v4 = vld [vmem:[#allocation8 + $0x924] ss:$16 sps:$4 sm:$0xff]  }
 0x3b6   : > { %5033 = vmatpush1.bf16.msra.mxu1 %v8722_v5  ;;  %4952 = vmatprep.subr.bf16.mxu0 %v8725_v6  ;;  %v9701_v5 = vld [vmem:[#allocation8 + $0xb24] ss:$16 sps:$4 sm:$0xff]   ;;  %v9696_v6 = vld [vmem:[#allocation8 + $0x920] ss:$16 sps:$4 sm:$0xff]  }
 0x3b7   : > { %5034 = vmatprep.subr.bf16.mxu1 %v8727_v7  ;;  %v9699_v7 = vld [vmem:[#allocation8 + $0xb20] ss:$16 sps:$4 sm:$0xff]  }
 0x3b9   : > { %4953 = vmatpush1.bf16.msra.mxu0 %v8724_v8  ;;  %v9704_v8 = vld [vmem:[#allocation8 + $0x944] ss:$16 sps:$4 sm:$0xff]  }
 0x3ba   : > { %5035 = vmatpush1.bf16.msra.mxu1 %v8726_v9  ;;  %5821 = vmatprep.subr.bf16.mxu0 %v9644_v10  ;;  %v9707_v9 = vld [vmem:[#allocation8 + $0xb44] ss:$16 sps:$4 sm:$0xff]   ;;  %v9702_v10 = vld [vmem:[#allocation8 + $0x940] ss:$16 sps:$4 sm:$0xff]  }
 0x3bb   : > { %5862 = vmatprep.subr.bf16.mxu1 %v9647_v13  ;;  %v9705_v13 = vld [vmem:[#allocation8 + $0xb40] ss:$16 sps:$4 sm:$0xff]  }
 0x3bc   : > { %4955 = vmatmul.mubr.bf16.vlgmr.msra.gmra.mrb[24].mxu0 %v10538_v23 }
 0x3bd   : > { %5037 = vmatmul.mubr.bf16.vlgmr.msra.gmra.mrb[24].mxu1 %v10538_v23  ;;  %5822 = vmatpush1.bf16.msra.mxu0 %v9642_v14  ;;  %v9710_v14 = vld [vmem:[#allocation8 + $0x964] ss:$16 sps:$4 sm:$0xff]  }
 0x3be   : > { %5863 = vmatpush1.bf16.msra.mxu1 %v9645_v44  ;;  %5823 = vmatprep.subr.bf16.mxu0 %v9650_v18  ;;  %v9713_v44 = vld [vmem:[#allocation8 + $0xb64] ss:$16 sps:$4 sm:$0xff]   ;;  %v9708_v18 = vld [vmem:[#allocation8 + $0x960] ss:$16 sps:$4 sm:$0xff]  }
 0x3bf   : > { %5864 = vmatprep.subr.bf16.mxu1 %v9653_v19  ;;  %v9711_v19 = vld [vmem:[#allocation8 + $0xb60] ss:$16 sps:$4 sm:$0xff]  }
 0x3c1   : > { %5824 = vmatpush1.bf16.msra.mxu0 %v9648_v20  ;;  %v9716_v20 = vld [vmem:[#allocation8 + $0x984] ss:$16 sps:$4 sm:$0xff]  }
 0x3c2   : > { %5865 = vmatpush1.bf16.msra.mxu1 %v9651_v21  ;;  %5825 = vmatprep.subr.bf16.mxu0 %v9656_v22  ;;  %v9719_v21 = vld [vmem:[#allocation8 + $0xb84] ss:$16 sps:$4 sm:$0xff]   ;;  %v9714_v22 = vld [vmem:[#allocation8 + $0x980] ss:$16 sps:$4 sm:$0xff]  }
 0x3c3   : > { %5866 = vmatprep.subr.bf16.mxu1 %v9659_v25  ;;  %v9717_v25 = vld [vmem:[#allocation8 + $0xb80] ss:$16 sps:$4 sm:$0xff]  }
 0x3c5   : > { %5826 = vmatpush1.bf16.msra.mxu0 %v9654_v26  ;;  %v9722_v26 = vld [vmem:[#allocation8 + $0x9a4] ss:$16 sps:$4 sm:$0xff]  }
 0x3c6   : > { %5867 = vmatpush1.bf16.msra.mxu1 %v9657_v27  ;;  %5827 = vmatprep.subr.bf16.mxu0 %v9662_v28  ;;  %v9725_v27 = vld [vmem:[#allocation8 + $0xba4] ss:$16 sps:$4 sm:$0xff]   ;;  %v9720_v28 = vld [vmem:[#allocation8 + $0x9a0] ss:$16 sps:$4 sm:$0xff]  }
 0x3c7   : > { %5868 = vmatprep.subr.bf16.mxu1 %v9665_v30  ;;  %v9723_v30 = vld [vmem:[#allocation8 + $0xba0] ss:$16 sps:$4 sm:$0xff]  }
 0x3c9   : > { %5828 = vmatpush1.bf16.msra.mxu0 %v9660_v31 }
 0x3ca   : > { %5869 = vmatpush1.bf16.msra.mxu1 %v9663_v35  ;;  %5829 = vmatprep.subr.bf16.mxu0 %v9668_v36  ;;  %v9728_v35 = vld [vmem:[#allocation8 + $0x9c4] ss:$16 sps:$4 sm:$0xff]  }
 0x3cb   : > { %5870 = vmatprep.subr.bf16.mxu1 %v9671_v37  ;;  %v9731_v36 = vld [vmem:[#allocation8 + $0xbc4] ss:$16 sps:$4 sm:$0xff]  }
 0x3cd   : > { %5830 = vmatpush1.bf16.msra.mxu0 %v9666_v38 }
 0x3ce   : > { %5871 = vmatpush1.bf16.msra.mxu1 %v9669_v39  ;;  %5831 = vmatprep.subr.bf16.mxu0 %v9674_v62  ;;  %v9726_v62 = vld [vmem:[#allocation8 + $0x9c0] ss:$16 sps:$4 sm:$0xff]  }
 0x3cf   : > { %v3961_v43 = vpop.f32.mrb[16].mxu0  ;;  %5872 = vmatprep.subr.bf16.mxu1 %v9677_v32  ;;  %v9729_v32 = vld [vmem:[#allocation8 + $0xbc0] ss:$16 sps:$4 sm:$0xff]  }
 0x3d0   : > { %v3962_v45 = vadd.f32 %v3961_v43, %v10610_v33  ;;  %v4002_v46 = vpop.f32.mrb[16].mxu1  ;;  %v3963_v52 = vpop.f32.mrb[17].mxu0  ;;  %v9689_v33 = vld [vmem:[#allocation8 + $0xae4] ss:$16 sps:$4 sm:$0xff]  }
 0x3d1   : > { %v3964_v53 = vadd.f32 %v3963_v52, %v10612_v17  ;;  %v4004_v11 = vpop.f32.mrb[17].mxu1  ;;  %v3965_v15 = vpop.f32.mrb[18].mxu0  ;;  %5832 = vmatpush1.bf16.msra.mxu0 %v9672_v40  ;;  %v9687_v17 = vld [vmem:[#allocation8 + $0xae0] ss:$16 sps:$4 sm:$0xff]  }
 0x3d2   : > { %v10626_v56 = vadd.f32 %v4002_v46, %v3962_v45  ;;  %v4006_v58 = vpop.f32.mrb[18].mxu1  ;;  %v3966_v16 = vpop.f32.mrb[19].mxu0  ;;  %5873 = vmatpush1.bf16.msra.mxu1 %v9675_v41  ;;  %5833 = vmatprep.subr.bf16.mxu0 %v9680_v42  ;;  %v9735_v15 = vld [vmem:[#allocation8 + $0xbe0] ss:$16 sps:$4 sm:$0xff]  }
 0x3d3   : > { %v10628_v61 = vadd.f32 %v4004_v11, %v3964_v53  ;;  %v4007_v29 = vpop.f32.mrb[19].mxu1  ;;  %5874 = vmatprep.subr.bf16.mxu1 %v9683_v34  ;;  %v9737_v53 = vld [vmem:[#allocation8 + $0xbe4] ss:$16 sps:$4 sm:$0xff]   ;;  %v9732_v11 = vld [vmem:[#allocation8 + $0x9e0] ss:$16 sps:$4 sm:$0xff]  }
 0x3d4   : > { %v4219_v58 = vld [vmem:[#allocation7 + $0x8] sm:$0xf] }
 0x3d5   : > { %5834 = vmatpush1.bf16.msra.mxu0 %v9678_v55  ;;  %v9743_v55 = vld [vmem:[#allocation8 + $0xa0c] ss:$16 sps:$4 sm:$0xff]   ;;  %v4224_v16 = vrot.slane %v4219_v58, %v10558_v48  ;;  %v4236_v29 = vrot.slane %v4219_v58, %v10564_v51 }
 0x3d6   : > { %5875 = vmatpush1.bf16.msra.mxu1 %v9681_v59  ;;  %5835 = vmatprep.subr.bf16.mxu0 %v9686_v60  ;;  %v4232_v59 = vrot.slane %v4219_v58, %v10560_v49  ;;  %v4228_v60 = vrot.slane %v4219_v58, %v10562_v50  ;;  %v9785_v58 = vld [vmem:[#allocation8 + $0xaec] ss:$16 sps:$4 sm:$0xff]  }
 0x3d7   : > { %5876 = vmatprep.subr.bf16.mxu1 %v9689_v33 }
 0x3d9   : > { %5836 = vmatpush1.bf16.msra.mxu0 %v9684_v63 }
 0x3da   : > { %5877 = vmatpush1.bf16.msra.mxu1 %v9687_v17  ;;  %5837 = vmatprep.subr.bf16.mxu0 %v9692_v0 }
 0x3db   : > { %5878 = vmatprep.subr.bf16.mxu1 %v9695_v1 }
 0x3dd   : > { %5838 = vmatpush1.bf16.msra.mxu0 %v9690_v2 }
 0x3de   : > { %5879 = vmatpush1.bf16.msra.mxu1 %v9693_v3  ;;  %5839 = vmatprep.subr.bf16.mxu0 %v9698_v4 }
 0x3df   : > { %5880 = vmatprep.subr.bf16.mxu1 %v9701_v5 }
 0x3e1   : > { %5840 = vmatpush1.bf16.msra.mxu0 %v9696_v6 }
 0x3e2   : > { %5881 = vmatpush1.bf16.msra.mxu1 %v9699_v7  ;;  %5841 = vmatprep.subr.bf16.mxu0 %v9704_v8 }
 0x3e3   : > { %5882 = vmatprep.subr.bf16.mxu1 %v9707_v9 }
 0x3e5   : > { %5842 = vmatpush1.bf16.msra.mxu0 %v9702_v10 }
 0x3e6   : > { %5883 = vmatpush1.bf16.msra.mxu1 %v9705_v13  ;;  %5843 = vmatprep.subr.bf16.mxu0 %v9710_v14 }
 0x3e7   : > { %5884 = vmatprep.subr.bf16.mxu1 %v9713_v44 }
 0x3e9   : > { %5844 = vmatpush1.bf16.msra.mxu0 %v9708_v18  ;;  %v9738_v18 = vld [vmem:[#allocation8 + $0x808] ss:$16 sps:$4 sm:$0xff]  }
 0x3ea   : > { %5885 = vmatpush1.bf16.msra.mxu1 %v9711_v19  ;;  %5845 = vmatprep.subr.bf16.mxu0 %v9716_v20 }
 0x3eb   : > { %5886 = vmatprep.subr.bf16.mxu1 %v9719_v21  ;;  %v9741_v21 = vld [vmem:[#allocation8 + $0xa08] ss:$16 sps:$4 sm:$0xff]  }
 0x3ed   : > { %5846 = vmatpush1.bf16.msra.mxu0 %v9714_v22 }
 0x3ee   : > { %5887 = vmatpush1.bf16.msra.mxu1 %v9717_v25  ;;  %5847 = vmatprep.subr.bf16.mxu0 %v9722_v26  ;;  %v9746_v25 = vld [vmem:[#allocation8 + $0x82c] ss:$16 sps:$4 sm:$0xff]  }
 0x3ef   : > { %5888 = vmatprep.subr.bf16.mxu1 %v9725_v27  ;;  %v9749_v26 = vld [vmem:[#allocation8 + $0xa2c] ss:$16 sps:$4 sm:$0xff]   ;;  %v9744_v27 = vld [vmem:[#allocation8 + $0x828] ss:$16 sps:$4 sm:$0xff]  }
 0x3f1   : > { %5848 = vmatpush1.bf16.msra.mxu0 %v9720_v28  ;;  %v9747_v28 = vld [vmem:[#allocation8 + $0xa28] ss:$16 sps:$4 sm:$0xff]  }
 0x3f2   : > { %5889 = vmatpush1.bf16.msra.mxu1 %v9723_v30  ;;  %5849 = vmatprep.subr.bf16.mxu0 %v9728_v35  ;;  %v9752_v30 = vld [vmem:[#allocation8 + $0x84c] ss:$16 sps:$4 sm:$0xff]   ;;  %v9750_v35 = vld [vmem:[#allocation8 + $0x848] ss:$16 sps:$4 sm:$0xff]  }
 0x3f3   : > { %5890 = vmatprep.subr.bf16.mxu1 %v9731_v36  ;;  %v9753_v36 = vld [vmem:[#allocation8 + $0xa48] ss:$16 sps:$4 sm:$0xff]  }
 0x3f5   : > { %5850 = vmatpush1.bf16.msra.mxu0 %v9726_v62  ;;  %v9759_v62 = vld [vmem:[#allocation8 + $0xa68] ss:$16 sps:$4 sm:$0xff]  }
 0x3f6   : > { %5891 = vmatpush1.bf16.msra.mxu1 %v9729_v32  ;;  %v9764_v32 = vld [vmem:[#allocation8 + $0x88c] ss:$16 sps:$4 sm:$0xff]  }
 0x3f7   : > { %5892 = vmatprep.subr.bf16.mxu1 %v9737_v53  ;;  %v9776_v53 = vld [vmem:[#allocation8 + $0x8cc] ss:$16 sps:$4 sm:$0xff]  }
 0x3fa   : > { %5893 = vmatpush1.bf16.msra.mxu1 %v9735_v15  ;;  %v9774_v15 = vld [vmem:[#allocation8 + $0x8c8] ss:$16 sps:$4 sm:$0xff]  }
 0x3fb   : > { %5944 = vmatprep.subr.bf16.mxu1 %v9743_v55  ;;  %v9782_v55 = vld [vmem:[#allocation8 + $0x8ec] ss:$16 sps:$4 sm:$0xff]  }
 0x40f   : > { %v4043_v31 = vpop.f32.mrb[20].mxu0 }
 0x410   : > { %v4044_v37 = vadd.f32 %v4043_v31, %v10618_v47  ;;  %v4084_v38 = vpop.f32.mrb[20].mxu1  ;;  %v4045_v39 = vpop.f32.mrb[21].mxu0  ;;  %v9734_v47 = vld [vmem:[#allocation8 + $0x9e4] ss:$16 sps:$4 sm:$0xff]   ;;  %v9755_v31 = vld [vmem:[#allocation8 + $0xa4c] ss:$16 sps:$4 sm:$0xff]  }
 0x411   : > { %v4046_v40 = vadd.f32 %v4045_v39, %v10620_v54  ;;  %v4086_v41 = vpop.f32.mrb[21].mxu1  ;;  %v4047_v42 = vpop.f32.mrb[22].mxu0  ;;  %5851 = vmatprep.subr.bf16.mxu0 %v9734_v47  ;;  %v9740_v54 = vld [vmem:[#allocation8 + $0x80c] ss:$16 sps:$4 sm:$0xff]   ;;  %v9756_v39 = vld [vmem:[#allocation8 + $0x868] ss:$16 sps:$4 sm:$0xff]  }
 0x412   : > { %v10632_v43 = vadd.f32 %v4084_v38, %v4044_v37  ;;  %v4088_v34 = vpop.f32.mrb[22].mxu1  ;;  %v4048_v45 = vpop.f32.mrb[23].mxu0  ;;  %5852 = vmatpush1.bf16.msra.mxu0 %v9732_v11  ;;  %v9758_v37 = vld [vmem:[#allocation8 + $0x86c] ss:$16 sps:$4 sm:$0xff]   ;;  %v9765_v42 = vld [vmem:[#allocation8 + $0xa88] ss:$16 sps:$4 sm:$0xff]  }
 0x413   : > { %v10634_v46 = vadd.f32 %v4086_v41, %v4046_v40  ;;  %v4089_v52 = vpop.f32.mrb[23].mxu1  ;;  %5903 = vmatprep.subr.bf16.mxu0 %v9740_v54  ;;  %v9761_v38 = vld [vmem:[#allocation8 + $0xa6c] ss:$16 sps:$4 sm:$0xff]   ;;  %v9762_v41 = vld [vmem:[#allocation8 + $0x888] ss:$16 sps:$4 sm:$0xff]  }
 0x414   : > { %v9767_v40 = vld [vmem:[#allocation8 + $0xa8c] ss:$16 sps:$4 sm:$0xff]   ;;  %v9768_v52 = vld [vmem:[#allocation8 + $0x8a8] ss:$16 sps:$4 sm:$0xff]  }
 0x415   : > { %v9770_v34 = vld [vmem:[#allocation8 + $0x8ac] ss:$16 sps:$4 sm:$0xff]   ;;  %v9771_v47 = vld [vmem:[#allocation8 + $0xaa8] ss:$16 sps:$4 sm:$0xff]  }
 0x416   : > { %v9773_v45 = vld [vmem:[#allocation8 + $0xaac] ss:$16 sps:$4 sm:$0xff]   ;;  %v9777_v54 = vld [vmem:[#allocation8 + $0xac8] ss:$16 sps:$4 sm:$0xff]  }
 0x417   : > { %v9779_v11 = vld [vmem:[#allocation8 + $0xacc] ss:$16 sps:$4 sm:$0xff]  }
 0x48f   : > { %v4956_v33 = vpop.f32.mrb[24].mxu0 }
 0x490   : > { %v9127_v63 = vadd.f32 %v4956_v33, %v4224_v16  ;;  %v5038_v17 = vpop.f32.mrb[24].mxu1  ;;  %v4958_v0 = vpop.f32.mrb[25].mxu0  ;;  %v9780_v16 = vld [vmem:[#allocation8 + $0x8e8] ss:$16 sps:$4 sm:$0xff]  }
 0x491   : > { %v9129_v1 = vadd.f32 %v5038_v17, %v4232_v59  ;;  %v9128_v2 = vadd.f32 %v4958_v0, %v4228_v60  ;;  %v5040_v3 = vpop.f32.mrb[25].mxu1  ;;  %v4960_v4 = vpop.f32.mrb[26].mxu0  ;;  %v9783_v59 = vld [vmem:[#allocation8 + $0xae8] ss:$16 sps:$4 sm:$0xff]   ;;  %v9788_v60 = vld [vmem:[#allocation8 + $0x90c] ss:$16 sps:$4 sm:$0xff]  }
 0x492   : > { %v5045_v5 = vmax.f32 %v9127_v63, 0.0  ;;  %v9130_v6 = vadd.f32 %v5040_v3, %v4236_v29  ;;  %v5042_v7 = vpop.f32.mrb[26].mxu1  ;;  %v4961_v8 = vpop.f32.mrb[27].mxu0  ;;  %v9791_v29 = vld [vmem:[#allocation8 + $0xb0c] ss:$16 sps:$4 sm:$0xff]  }
 0x493   : > { %v5047_v9 = vmax.f32 %v9129_v1, 0.0  ;;  %v5046_v10 = vmax.f32 %v9128_v2, 0.0  ;;  %v5043_v13 = vpop.f32.mrb[27].mxu1  ;;  %v9786_v33 = vld [vmem:[#allocation8 + $0x908] ss:$16 sps:$4 sm:$0xff]  }
 0x494   : > { %v5048_v14 = vmax.f32 %v9130_v6, 0.0  ;;  %v10640_v19 = vpack.c.bf16 %v5045_v5, %v5045_v5  ;;  %v9789_v63 = vld [vmem:[#allocation8 + $0xb08] ss:$16 sps:$4 sm:$0xff]   ;;  %v9794_v17 = vld [vmem:[#allocation8 + $0x92c] ss:$16 sps:$4 sm:$0xff]  }
 0x495   : > { %v5050_v44 = vpack.c.bf16 %v5046_v10, %v5046_v10  ;;  %v10642_v22 = vpack.c.bf16 %v5047_v9, %v5047_v9  ;;  %v9797_v0 = vld [vmem:[#allocation8 + $0xb2c] ss:$16 sps:$4 sm:$0xff]   ;;  %v9792_v1 = vld [vmem:[#allocation8 + $0x928] ss:$16 sps:$4 sm:$0xff]  }
 0x496   : > { %v5052_v20 = vpack.c.bf16 %v5048_v14, %v5048_v14  ;;  %v9795_v2 = vld [vmem:[#allocation8 + $0xb28] ss:$16 sps:$4 sm:$0xff]   ;;  %v9800_v3 = vld [vmem:[#allocation8 + $0x94c] ss:$16 sps:$4 sm:$0xff]  }
 0x497   : > { %5853 = vmatprep.mubr.bf16.mxu0 %v5050_v44  ;;  %v9803_v4 = vld [vmem:[#allocation8 + $0xb4c] ss:$16 sps:$4 sm:$0xff]   ;;  %v9798_v5 = vld [vmem:[#allocation8 + $0x948] ss:$16 sps:$4 sm:$0xff]  }
 0x498   : > { %5894 = vmatprep.mubr.bf16.mxu1 %v5052_v20  ;;  %5854 = vmatmul.mubr.bf16.vlgmr.msra.gmra.mrb[28].mxu0 %v10640_v19  ;;  %v9801_v6 = vld [vmem:[#allocation8 + $0xb48] ss:$16 sps:$4 sm:$0xff]   ;;  %v9806_v7 = vld [vmem:[#allocation8 + $0x96c] ss:$16 sps:$4 sm:$0xff]  }
 0x499   : > { %5895 = vmatmul.mubr.bf16.vlgmr.msra.gmra.mrb[28].mxu1 %v10642_v22  ;;  %5904 = vmatpush1.bf16.msra.mxu0 %v9738_v18  ;;  %v9809_v8 = vld [vmem:[#allocation8 + $0xb6c] ss:$16 sps:$4 sm:$0xff]   ;;  %v9804_v9 = vld [vmem:[#allocation8 + $0x968] ss:$16 sps:$4 sm:$0xff]  }
 0x49a   : > { %5945 = vmatpush1.bf16.msra.mxu1 %v9741_v21  ;;  %5935 = vmatprep.mubr.bf16.mxu0 %v5050_v44  ;;  %v9807_v10 = vld [vmem:[#allocation8 + $0xb68] ss:$16 sps:$4 sm:$0xff]   ;;  %v9812_v13 = vld [vmem:[#allocation8 + $0x98c] ss:$16 sps:$4 sm:$0xff]  }
 0x49b   : > { %5976 = vmatprep.mubr.bf16.mxu1 %v5052_v20  ;;  %5905 = vmatprep.subr.bf16.mxu0 %v9746_v25  ;;  %v9815_v14 = vld [vmem:[#allocation8 + $0xb8c] ss:$16 sps:$4 sm:$0xff]   ;;  %v9810_v44 = vld [vmem:[#allocation8 + $0x988] ss:$16 sps:$4 sm:$0xff]  }
 0x49c   : > { %5946 = vmatprep.subr.bf16.mxu1 %v9749_v26  ;;  %v9813_v18 = vld [vmem:[#allocation8 + $0xb88] ss:$16 sps:$4 sm:$0xff]   ;;  %v9818_v20 = vld [vmem:[#allocation8 + $0x9ac] ss:$16 sps:$4 sm:$0xff]  }
 0x49d   : > { %5906 = vmatpush1.bf16.msra.mxu0 %v9744_v27  ;;  %v9821_v21 = vld [vmem:[#allocation8 + $0xbac] ss:$16 sps:$4 sm:$0xff]   ;;  %v9816_v25 = vld [vmem:[#allocation8 + $0x9a8] ss:$16 sps:$4 sm:$0xff]  }
 0x49e   : > { %5947 = vmatpush1.bf16.msra.mxu1 %v9747_v28  ;;  %5907 = vmatprep.subr.bf16.mxu0 %v9752_v30  ;;  %v9819_v26 = vld [vmem:[#allocation8 + $0xba8] ss:$16 sps:$4 sm:$0xff]   ;;  %v9824_v27 = vld [vmem:[#allocation8 + $0x9cc] ss:$16 sps:$4 sm:$0xff]  }
 0x49f   : > { %5948 = vmatprep.subr.bf16.mxu1 %v9755_v31  ;;  %v9827_v28 = vld [vmem:[#allocation8 + $0xbcc] ss:$16 sps:$4 sm:$0xff]   ;;  %v9822_v30 = vld [vmem:[#allocation8 + $0x9c8] ss:$16 sps:$4 sm:$0xff]  }
 0x4a0   : > { %v9825_v31 = vld [vmem:[#allocation8 + $0xbc8] ss:$16 sps:$4 sm:$0xff]  }
 0x4a1   : > { %5908 = vmatpush1.bf16.msra.mxu0 %v9750_v35  ;;  %v9830_v35 = vld [vmem:[#allocation8 + $0x9ec] ss:$16 sps:$4 sm:$0xff]  }
 0x4a2   : > { %5949 = vmatpush1.bf16.msra.mxu1 %v9753_v36  ;;  %5909 = vmatprep.subr.bf16.mxu0 %v9758_v37  ;;  %v9833_v36 = vld [vmem:[#allocation8 + $0xbec] ss:$16 sps:$4 sm:$0xff]   ;;  %v5989_v37 = vld [vmem:[#allocation5 + $0x30] sm:$0xff] }
 0x4a3   : > { %5950 = vmatprep.subr.bf16.mxu1 %v9761_v38  ;;  %v5991_v38 = vld [vmem:[#allocation5 + $0x70] sm:$0xff] }
 0x4a5   : > { %5910 = vmatpush1.bf16.msra.mxu0 %v9756_v39  ;;  %v5990_v39 = vld [vmem:[#allocation5 + $0x38] sm:$0xff] }
 0x4a6   : > { %5951 = vmatpush1.bf16.msra.mxu1 %v9759_v62  ;;  %5911 = vmatprep.subr.bf16.mxu0 %v9764_v32  ;;  %v5992_v62 = vld [vmem:[#allocation5 + $0x78] sm:$0xff] }
 0x4a7   : > { %5952 = vmatprep.subr.bf16.mxu1 %v9767_v40  ;;  %v9828_v32 = vld [vmem:[#allocation8 + $0x9e8] ss:$16 sps:$4 sm:$0xff]  }
 0x4a8   : > { %v9831_v40 = vld [vmem:[#allocation8 + $0xbe8] ss:$16 sps:$4 sm:$0xff]  }
 0x4a9   : > { %5912 = vmatpush1.bf16.msra.mxu0 %v9762_v41  ;;  %v8857_v41 = vcombine.high %v5989_v37, %v5991_v38 }
 0x4aa   : > { %5953 = vmatpush1.bf16.msra.mxu1 %v9765_v42  ;;  %5913 = vmatprep.subr.bf16.mxu0 %v9770_v34  ;;  %v8859_v42 = vcombine.high %v5990_v39, %v5992_v62  ;;  %v5993_v34 = vld [vmem:[#allocation5 + $0xb0] sm:$0xff] }
 0x4ab   : > { %5954 = vmatprep.subr.bf16.mxu1 %v9773_v45  ;;  %v5995_v45 = vld [vmem:[#allocation5 + $0xf0] sm:$0xff] }
 0x4ad   : > { %5914 = vmatpush1.bf16.msra.mxu0 %v9768_v52  ;;  %v5994_v52 = vld [vmem:[#allocation5 + $0xb8] sm:$0xff] }
 0x4ae   : > { %5955 = vmatpush1.bf16.msra.mxu1 %v9771_v47  ;;  %5915 = vmatprep.subr.bf16.mxu0 %v9776_v53  ;;  %v5996_v47 = vld [vmem:[#allocation5 + $0xf8] sm:$0xff]  ;;  %v8856_v53 = vcombine.low %v5989_v37, %v5991_v38 }
 0x4af   : > { %5956 = vmatprep.subr.bf16.mxu1 %v9779_v11  ;;  %v8858_v11 = vcombine.low %v5990_v39, %v5992_v62  ;;  %v6017_v62 = vld [vmem:[#allocation5 + $0x3b0] sm:$0xff] }
 0x4b1   : > { %5916 = vmatpush1.bf16.msra.mxu0 %v9774_v15  ;;  %v8861_v15 = vcombine.high %v5993_v34, %v5995_v45 }
 0x4b2   : > { %5957 = vmatpush1.bf16.msra.mxu1 %v9777_v54  ;;  %5917 = vmatprep.subr.bf16.mxu0 %v9782_v55  ;;  %v8863_v54 = vcombine.high %v5994_v52, %v5996_v47  ;;  %v5997_v55 = vld [vmem:[#allocation5 + $0x130] sm:$0xff] }
 0x4b3   : > { %5958 = vmatprep.subr.bf16.mxu1 %v9785_v58  ;;  %v5999_v58 = vld [vmem:[#allocation5 + $0x170] sm:$0xff] }
 0x4b5   : > { %5918 = vmatpush1.bf16.msra.mxu0 %v9780_v16  ;;  %v5998_v16 = vld [vmem:[#allocation5 + $0x138] sm:$0xff] }
 0x4b6   : > { %5959 = vmatpush1.bf16.msra.mxu1 %v9783_v59  ;;  %5919 = vmatprep.subr.bf16.mxu0 %v9788_v60  ;;  %v6000_v59 = vld [vmem:[#allocation5 + $0x178] sm:$0xff]  ;;  %v8860_v60 = vcombine.low %v5993_v34, %v5995_v45 }
 0x4b7   : > { %5960 = vmatprep.subr.bf16.mxu1 %v9791_v29  ;;  %v8862_v29 = vcombine.low %v5994_v52, %v5996_v47  ;;  %v6021_v47 = vld [vmem:[#allocation5 + $0x430] sm:$0xff] }
 0x4b9   : > { %5920 = vmatpush1.bf16.msra.mxu0 %v9786_v33  ;;  %v8865_v33 = vcombine.high %v5997_v55, %v5999_v58 }
 0x4ba   : > { %5961 = vmatpush1.bf16.msra.mxu1 %v9789_v63  ;;  %5921 = vmatprep.subr.bf16.mxu0 %v9794_v17  ;;  %v8867_v63 = vcombine.high %v5998_v16, %v6000_v59  ;;  %v6001_v17 = vld [vmem:[#allocation5 + $0x1b0] sm:$0xff] }
 0x4bb   : > { %5962 = vmatprep.subr.bf16.mxu1 %v9797_v0  ;;  %v6003_v0 = vld [vmem:[#allocation5 + $0x1f0] sm:$0xff] }
 0x4bd   : > { %5922 = vmatpush1.bf16.msra.mxu0 %v9792_v1  ;;  %v6002_v1 = vld [vmem:[#allocation5 + $0x1b8] sm:$0xff] }
 0x4be   : > { %5963 = vmatpush1.bf16.msra.mxu1 %v9795_v2  ;;  %5923 = vmatprep.subr.bf16.mxu0 %v9800_v3  ;;  %v6004_v2 = vld [vmem:[#allocation5 + $0x1f8] sm:$0xff]  ;;  %v8869_v3 = vcombine.high %v6001_v17, %v6003_v0 }
 0x4bf   : > { %5964 = vmatprep.subr.bf16.mxu1 %v9803_v4  ;;  %v8871_v4 = vcombine.high %v6002_v1, %v6004_v2 }
 0x4c1   : > { %5924 = vmatpush1.bf16.msra.mxu0 %v9798_v5  ;;  %v6005_v5 = vld [vmem:[#allocation5 + $0x230] sm:$0xff] }
 0x4c2   : > { %5965 = vmatpush1.bf16.msra.mxu1 %v9801_v6  ;;  %5925 = vmatprep.subr.bf16.mxu0 %v9806_v7  ;;  %v6007_v6 = vld [vmem:[#allocation5 + $0x270] sm:$0xff]  ;;  %v6006_v7 = vld [vmem:[#allocation5 + $0x238] sm:$0xff] }
 0x4c3   : > { %5966 = vmatprep.subr.bf16.mxu1 %v9809_v8  ;;  %v6008_v8 = vld [vmem:[#allocation5 + $0x278] sm:$0xff] }
 0x4c5   : > { %5926 = vmatpush1.bf16.msra.mxu0 %v9804_v9  ;;  %v8868_v9 = vcombine.low %v6001_v17, %v6003_v0 }
 0x4c6   : > { %5967 = vmatpush1.bf16.msra.mxu1 %v9807_v10  ;;  %5927 = vmatprep.subr.bf16.mxu0 %v9812_v13  ;;  %v8870_v10 = vcombine.low %v6002_v1, %v6004_v2  ;;  %v8873_v13 = vcombine.high %v6005_v5, %v6007_v6  ;;  %v6029_v2 = vld [vmem:[#allocation5 + $0x530] sm:$0xff] }
 0x4c7   : > { %5968 = vmatprep.subr.bf16.mxu1 %v9815_v14  ;;  %v6009_v14 = vld [vmem:[#allocation5 + $0x2b0] sm:$0xff] }
 0x4c9   : > { %5928 = vmatpush1.bf16.msra.mxu0 %v9810_v44  ;;  %v6011_v44 = vld [vmem:[#allocation5 + $0x2f0] sm:$0xff] }
 0x4ca   : > { %5969 = vmatpush1.bf16.msra.mxu1 %v9813_v18  ;;  %5929 = vmatprep.subr.bf16.mxu0 %v9818_v20  ;;  %v6010_v18 = vld [vmem:[#allocation5 + $0x2b8] sm:$0xff] }
 0x4cb   : > { %5970 = vmatprep.subr.bf16.mxu1 %v9821_v21  ;;  %v6012_v20 = vld [vmem:[#allocation5 + $0x2f8] sm:$0xff]  ;;  %v8872_v21 = vcombine.low %v6005_v5, %v6007_v6 }
 0x4cc   : > { %v8878_v37 = vcombine.low %v6010_v18, %v6012_v20 }
 0x4cd   : > { %5930 = vmatpush1.bf16.msra.mxu0 %v9816_v25  ;;  %v8874_v25 = vcombine.low %v6006_v7, %v6008_v8 }
 0x4ce   : > { %5971 = vmatpush1.bf16.msra.mxu1 %v9819_v26  ;;  %5931 = vmatprep.subr.bf16.mxu0 %v9824_v27  ;;  %v8877_v26 = vcombine.high %v6009_v14, %v6011_v44  ;;  %v8879_v27 = vcombine.high %v6010_v18, %v6012_v20  ;;  %v6037_v20 = vld [vmem:[#allocation5 + $0x630] sm:$0xff] }
 0x4cf   : > { %5972 = vmatprep.subr.bf16.mxu1 %v9827_v28  ;;  %v6013_v28 = vld [vmem:[#allocation5 + $0x330] sm:$0xff] }
 0x4d1   : > { %5932 = vmatpush1.bf16.msra.mxu0 %v9822_v30  ;;  %v6015_v30 = vld [vmem:[#allocation5 + $0x370] sm:$0xff] }
 0x4d2   : > { %5973 = vmatpush1.bf16.msra.mxu1 %v9825_v31  ;;  %5933 = vmatprep.subr.bf16.mxu0 %v9830_v35  ;;  %v6014_v31 = vld [vmem:[#allocation5 + $0x338] sm:$0xff]  ;;  %v8881_v38 = vcombine.high %v6013_v28, %v6015_v30 }
 0x4d3   : > { %5974 = vmatprep.subr.bf16.mxu1 %v9833_v36  ;;  %v6016_v35 = vld [vmem:[#allocation5 + $0x378] sm:$0xff]  ;;  %v8876_v36 = vcombine.low %v6009_v14, %v6011_v44 }
 0x4d4   : > { %v8883_v39 = vcombine.high %v6014_v31, %v6016_v35  ;;  %v8882_v34 = vcombine.low %v6014_v31, %v6016_v35  ;;  %v6041_v35 = vld [vmem:[#allocation5 + $0x6b0] sm:$0xff] }
 0x4d5   : > { %5934 = vmatpush1.bf16.msra.mxu0 %v9828_v32  ;;  %v6019_v32 = vld [vmem:[#allocation5 + $0x3f0] sm:$0xff] }
 0x4d6   : > { %5975 = vmatpush1.bf16.msra.mxu1 %v9831_v40  ;;  %6779 = vmatprep.subr.bf16.mxu0 %v8857_v41  ;;  %v6018_v40 = vld [vmem:[#allocation5 + $0x3b8] sm:$0xff]  ;;  %v8885_v45 = vcombine.high %v6017_v62, %v6019_v32 }
 0x4d7   : > { %6861 = vmatprep.subr.bf16.mxu1 %v8859_v42  ;;  %v6020_v41 = vld [vmem:[#allocation5 + $0x3f8] sm:$0xff]  ;;  %v8880_v42 = vcombine.low %v6013_v28, %v6015_v30 }
 0x4d8   : > { %5936 = vmatmul.mubr.bf16.vlgmr.msra.gmra.mrb[32].mxu0 %v10640_v19  ;;  %v8864_v19 = vcombine.low %v5997_v55, %v5999_v58  ;;  %v8887_v52 = vcombine.high %v6018_v40, %v6020_v41  ;;  %v8886_v55 = vcombine.low %v6018_v40, %v6020_v41  ;;  %v6045_v41 = vld [vmem:[#allocation5 + $0x730] sm:$0xff] }
 0x4d9   : > { %5977 = vmatmul.mubr.bf16.vlgmr.msra.gmra.mrb[32].mxu1 %v10642_v22  ;;  %6780 = vmatpush1.bf16.msra.mxu0 %v8856_v53  ;;  %v8866_v22 = vcombine.low %v5998_v16, %v6000_v59  ;;  %v6023_v53 = vld [vmem:[#allocation5 + $0x470] sm:$0xff] }
 0x4da   : > { %6862 = vmatpush1.bf16.msra.mxu1 %v8858_v11  ;;  %6781 = vmatprep.subr.bf16.mxu0 %v8861_v15  ;;  %v6022_v11 = vld [vmem:[#allocation5 + $0x438] sm:$0xff]  ;;  %v8889_v58 = vcombine.high %v6021_v47, %v6023_v53  ;;  %v6025_v59 = vld [vmem:[#allocation5 + $0x4b0] sm:$0xff] }
 0x4db   : > { %6863 = vmatprep.subr.bf16.mxu1 %v8863_v54  ;;  %6811 = vmatprep.mubr.bf16.mxu0 %v10523_v57  ;;  %v6024_v15 = vld [vmem:[#allocation5 + $0x478] sm:$0xff]  ;;  %v8884_v54 = vcombine.low %v6017_v62, %v6019_v32 }
 0x4dc   : > { %6893 = vmatprep.mubr.bf16.mxu1 %v10523_v57  ;;  %v8875_v57 = vcombine.high %v6006_v7, %v6008_v8  ;;  %v8891_v16 = vcombine.high %v6022_v11, %v6024_v15  ;;  %v8890_v17 = vcombine.low %v6022_v11, %v6024_v15  ;;  %v6033_v8 = vld [vmem:[#allocation5 + $0x5b0] sm:$0xff] }
 0x4dd   : > { %6782 = vmatpush1.bf16.msra.mxu0 %v8860_v60  ;;  %v6027_v60 = vld [vmem:[#allocation5 + $0x4f0] sm:$0xff] }
 0x4de   : > { %6864 = vmatpush1.bf16.msra.mxu1 %v8862_v29  ;;  %6783 = vmatprep.subr.bf16.mxu0 %v8865_v33  ;;  %v6026_v29 = vld [vmem:[#allocation5 + $0x4b8] sm:$0xff]  ;;  %v8893_v0 = vcombine.high %v6025_v59, %v6027_v60  ;;  %v6049_v15 = vld [vmem:[#allocation5 + $0x7b0] sm:$0xff] }
 0x4df   : > { %6865 = vmatprep.subr.bf16.mxu1 %v8867_v63  ;;  %v6028_v33 = vld [vmem:[#allocation5 + $0x4f8] sm:$0xff]  ;;  %v8888_v63 = vcombine.low %v6021_v47, %v6023_v53 }
 0x4e0   : > { %v8895_v1 = vcombine.high %v6026_v29, %v6028_v33  ;;  %v8894_v5 = vcombine.low %v6026_v29, %v6028_v33  ;;  %v6053_v33 = vld [vmem:[#allocation5 + $0x830] sm:$0xff] }
 0x4e1   : > { %6784 = vmatpush1.bf16.msra.mxu0 %v8864_v19  ;;  %v6031_v19 = vld [vmem:[#allocation5 + $0x570] sm:$0xff] }
 0x4e2   : > { %6866 = vmatpush1.bf16.msra.mxu1 %v8866_v22  ;;  %6785 = vmatprep.subr.bf16.mxu0 %v8869_v3  ;;  %v6030_v22 = vld [vmem:[#allocation5 + $0x538] sm:$0xff]  ;;  %v8897_v6 = vcombine.high %v6029_v2, %v6031_v19 }
 0x4e3   : > { %6867 = vmatprep.subr.bf16.mxu1 %v8871_v4  ;;  %v6032_v3 = vld [vmem:[#allocation5 + $0x578] sm:$0xff]  ;;  %v8892_v4 = vcombine.low %v6025_v59, %v6027_v60 }
 0x4e4   : > { %v8899_v7 = vcombine.high %v6030_v22, %v6032_v3  ;;  %v8898_v14 = vcombine.low %v6030_v22, %v6032_v3  ;;  %v6057_v3 = vld [vmem:[#allocation5 + $0x8b0] sm:$0xff] }
 0x4e5   : > { %6786 = vmatpush1.bf16.msra.mxu0 %v8868_v9  ;;  %v6035_v9 = vld [vmem:[#allocation5 + $0x5f0] sm:$0xff] }
 0x4e6   : > { %6868 = vmatpush1.bf16.msra.mxu1 %v8870_v10  ;;  %6787 = vmatprep.subr.bf16.mxu0 %v8873_v13  ;;  %v6034_v10 = vld [vmem:[#allocation5 + $0x5b8] sm:$0xff]  ;;  %v8901_v44 = vcombine.high %v6033_v8, %v6035_v9 }
 0x4e7   : > { %6869 = vmatprep.subr.bf16.mxu1 %v8875_v57  ;;  %v6036_v13 = vld [vmem:[#allocation5 + $0x5f8] sm:$0xff]  ;;  %v8896_v57 = vcombine.low %v6029_v2, %v6031_v19 }
 0x4e8   : > { %v8903_v18 = vcombine.high %v6034_v10, %v6036_v13  ;;  %v8902_v28 = vcombine.low %v6034_v10, %v6036_v13  ;;  %v6061_v13 = vld [vmem:[#allocation5 + $0x930] sm:$0xff] }
 0x4e9   : > { %6788 = vmatpush1.bf16.msra.mxu0 %v8872_v21  ;;  %v6039_v21 = vld [vmem:[#allocation5 + $0x670] sm:$0xff] }
 0x4ea   : > { %6870 = vmatpush1.bf16.msra.mxu1 %v8874_v25  ;;  %6789 = vmatprep.subr.bf16.mxu0 %v8877_v26  ;;  %v6038_v25 = vld [vmem:[#allocation5 + $0x638] sm:$0xff]  ;;  %v8905_v30 = vcombine.high %v6037_v20, %v6039_v21 }
 0x4eb   : > { %6871 = vmatprep.subr.bf16.mxu1 %v8879_v27  ;;  %v6040_v26 = vld [vmem:[#allocation5 + $0x678] sm:$0xff]  ;;  %v8900_v27 = vcombine.low %v6033_v8, %v6035_v9 }
 0x4ec   : > { %v8907_v31 = vcombine.high %v6038_v25, %v6040_v26  ;;  %v8906_v62 = vcombine.low %v6038_v25, %v6040_v26  ;;  %v6065_v26 = vld [vmem:[#allocation5 + $0x9b0] sm:$0xff] }
 0x4ed   : > { %6790 = vmatpush1.bf16.msra.mxu0 %v8876_v36  ;;  %v6043_v36 = vld [vmem:[#allocation5 + $0x6f0] sm:$0xff] }
 0x4ee   : > { %6872 = vmatpush1.bf16.msra.mxu1 %v8878_v37  ;;  %6791 = vmatprep.subr.bf16.mxu0 %v8881_v38  ;;  %v6042_v37 = vld [vmem:[#allocation5 + $0x6b8] sm:$0xff]  ;;  %v8909_v32 = vcombine.high %v6041_v35, %v6043_v36 }
 0x4ef   : > { %6873 = vmatprep.subr.bf16.mxu1 %v8883_v39  ;;  %v6044_v38 = vld [vmem:[#allocation5 + $0x6f8] sm:$0xff]  ;;  %v8904_v39 = vcombine.low %v6037_v20, %v6039_v21 }
 0x4f0   : > { %v8911_v40 = vcombine.high %v6042_v37, %v6044_v38  ;;  %v8910_v47 = vcombine.low %v6042_v37, %v6044_v38  ;;  %v6069_v37 = vld [vmem:[#allocation5 + $0xa30] sm:$0xff] }
 0x4f1   : > { %6792 = vmatpush1.bf16.msra.mxu0 %v8880_v42  ;;  %v6047_v42 = vld [vmem:[#allocation5 + $0x770] sm:$0xff] }
 0x4f2   : > { %6874 = vmatpush1.bf16.msra.mxu1 %v8882_v34  ;;  %6793 = vmatprep.subr.bf16.mxu0 %v8885_v45  ;;  %v6046_v34 = vld [vmem:[#allocation5 + $0x738] sm:$0xff]  ;;  %v8913_v53 = vcombine.high %v6045_v41, %v6047_v42  ;;  %v6071_v38 = vld [vmem:[#allocation5 + $0xa70] sm:$0xff] }
 0x4f3   : > { %6875 = vmatprep.subr.bf16.mxu1 %v8887_v52  ;;  %v6048_v45 = vld [vmem:[#allocation5 + $0x778] sm:$0xff]  ;;  %v8908_v52 = vcombine.low %v6041_v35, %v6043_v36 }
 0x4f4   : > { %v8915_v11 = vcombine.high %v6046_v34, %v6048_v45  ;;  %v8914_v59 = vcombine.low %v6046_v34, %v6048_v45  ;;  %v6075_v34 = vld [vmem:[#allocation5 + $0xaf0] sm:$0xff]  ;;  %v6074_v45 = vld [vmem:[#allocation5 + $0xab8] sm:$0xff] }
 0x4f5   : > { %6794 = vmatpush1.bf16.msra.mxu0 %v8884_v54  ;;  %v6051_v54 = vld [vmem:[#allocation5 + $0x7f0] sm:$0xff] }
 0x4f6   : > { %6876 = vmatpush1.bf16.msra.mxu1 %v8886_v55  ;;  %6795 = vmatprep.subr.bf16.mxu0 %v8889_v58  ;;  %v6050_v55 = vld [vmem:[#allocation5 + $0x7b8] sm:$0xff]  ;;  %v8917_v60 = vcombine.high %v6049_v15, %v6051_v54 }
 0x4f7   : > { %6877 = vmatprep.subr.bf16.mxu1 %v8891_v16  ;;  %v6052_v58 = vld [vmem:[#allocation5 + $0x7f8] sm:$0xff]  ;;  %v8912_v16 = vcombine.low %v6045_v41, %v6047_v42  ;;  %v8937_v41 = vcombine.high %v6069_v37, %v6071_v38  ;;  %v6073_v42 = vld [vmem:[#allocation5 + $0xab0] sm:$0xff] }
 0x4f8   : > { %v8919_v29 = vcombine.high %v6050_v55, %v6052_v58  ;;  %v8918_v2 = vcombine.low %v6050_v55, %v6052_v58  ;;  %v6079_v55 = vld [vmem:[#allocation5 + $0xb70] sm:$0xff]  ;;  %v6078_v58 = vld [vmem:[#allocation5 + $0xb38] sm:$0xff] }
 0x4f9   : > { %6796 = vmatpush1.bf16.msra.mxu0 %v8888_v63  ;;  %v6055_v63 = vld [vmem:[#allocation5 + $0x870] sm:$0xff] }
 0x4fa   : > { %6878 = vmatpush1.bf16.msra.mxu1 %v8890_v17  ;;  %6797 = vmatprep.subr.bf16.mxu0 %v8893_v0  ;;  %v6054_v17 = vld [vmem:[#allocation5 + $0x838] sm:$0xff]  ;;  %v8921_v19 = vcombine.high %v6053_v33, %v6055_v63 }
 0x4fb   : > { %6879 = vmatprep.subr.bf16.mxu1 %v8895_v1  ;;  %v6056_v0 = vld [vmem:[#allocation5 + $0x878] sm:$0xff]  ;;  %v8916_v1 = vcombine.low %v6049_v15, %v6051_v54  ;;  %v6077_v54 = vld [vmem:[#allocation5 + $0xb30] sm:$0xff] }
 0x4fc   : > { %v8923_v22 = vcombine.high %v6054_v17, %v6056_v0  ;;  %v8922_v8 = vcombine.low %v6054_v17, %v6056_v0  ;;  %v6083_v17 = vld [vmem:[#allocation5 + $0xbf0] sm:$0xff]  ;;  %v6082_v0 = vld [vmem:[#allocation5 + $0xbb8] sm:$0xff] }
 0x4fd   : > { %6798 = vmatpush1.bf16.msra.mxu0 %v8892_v4  ;;  %v6059_v4 = vld [vmem:[#allocation5 + $0x8f0] sm:$0xff] }
 0x4fe   : > { %6880 = vmatpush1.bf16.msra.mxu1 %v8894_v5  ;;  %6799 = vmatprep.subr.bf16.mxu0 %v8897_v6  ;;  %v6058_v5 = vld [vmem:[#allocation5 + $0x8b8] sm:$0xff]  ;;  %v8925_v9 = vcombine.high %v6057_v3, %v6059_v4 }
 0x4ff   : > { %6881 = vmatprep.subr.bf16.mxu1 %v8899_v7  ;;  %v6060_v6 = vld [vmem:[#allocation5 + $0x8f8] sm:$0xff]  ;;  %v8920_v7 = vcombine.low %v6053_v33, %v6055_v63  ;;  %v6081_v63 = vld [vmem:[#allocation5 + $0xbb0] sm:$0xff] }
 0x500   : > { %v8927_v10 = vcombine.high %v6058_v5, %v6060_v6  ;;  %v8926_v20 = vcombine.low %v6058_v5, %v6060_v6  ;;  %v6087_v5 = vld [vmem:[#allocation5 + $0xc70] sm:$0xff]  ;;  %v6086_v6 = vld [vmem:[#allocation5 + $0xc38] sm:$0xff] }
 0x501   : > { %6800 = vmatpush1.bf16.msra.mxu0 %v8896_v57  ;;  %v6063_v57 = vld [vmem:[#allocation5 + $0x970] sm:$0xff] }
 0x502   : > { %6882 = vmatpush1.bf16.msra.mxu1 %v8898_v14  ;;  %6801 = vmatprep.subr.bf16.mxu0 %v8901_v44  ;;  %v6062_v14 = vld [vmem:[#allocation5 + $0x938] sm:$0xff]  ;;  %v8929_v21 = vcombine.high %v6061_v13, %v6063_v57 }
 0x503   : > { %6883 = vmatprep.subr.bf16.mxu1 %v8903_v18  ;;  %v6064_v44 = vld [vmem:[#allocation5 + $0x978] sm:$0xff]  ;;  %v8924_v18 = vcombine.low %v6057_v3, %v6059_v4  ;;  %v6085_v4 = vld [vmem:[#allocation5 + $0xc30] sm:$0xff] }
 0x504   : > { %v8931_v25 = vcombine.high %v6062_v14, %v6064_v44 }
 0x505   : > { %6802 = vmatpush1.bf16.msra.mxu0 %v8900_v27  ;;  %v6067_v27 = vld [vmem:[#allocation5 + $0x9f0] sm:$0xff] }
 0x506   : > { %6884 = vmatpush1.bf16.msra.mxu1 %v8902_v28  ;;  %6803 = vmatprep.subr.bf16.mxu0 %v8905_v30  ;;  %v6066_v28 = vld [vmem:[#allocation5 + $0x9b8] sm:$0xff]  ;;  %v8933_v35 = vcombine.high %v6065_v26, %v6067_v27 }
 0x507   : > { %6885 = vmatprep.subr.bf16.mxu1 %v8907_v31  ;;  %v6068_v30 = vld [vmem:[#allocation5 + $0x9f8] sm:$0xff]  ;;  %v8928_v31 = vcombine.low %v6061_v13, %v6063_v57  ;;  %v6089_v57 = vld [vmem:[#allocation5 + $0xcb0] sm:$0xff] }
 0x508   : > { %v8935_v36 = vcombine.high %v6066_v28, %v6068_v30 }
 0x509   : > { %6804 = vmatpush1.bf16.msra.mxu0 %v8904_v39  ;;  %v6070_v39 = vld [vmem:[#allocation5 + $0xa38] sm:$0xff] }
 0x50a   : > { %6886 = vmatpush1.bf16.msra.mxu1 %v8906_v62  ;;  %6805 = vmatprep.subr.bf16.mxu0 %v8909_v32  ;;  %v6072_v62 = vld [vmem:[#allocation5 + $0xa78] sm:$0xff]  ;;  %v8932_v32 = vcombine.low %v6065_v26, %v6067_v27  ;;  %v6093_v27 = vld [vmem:[#allocation5 + $0xd30] sm:$0xff] }
 0x50b   : > { %6887 = vmatprep.subr.bf16.mxu1 %v8911_v40  ;;  %v8934_v40 = vcombine.low %v6066_v28, %v6068_v30  ;;  %v6095_v28 = vld [vmem:[#allocation5 + $0xd70] sm:$0xff]  ;;  %v6094_v30 = vld [vmem:[#allocation5 + $0xd38] sm:$0xff] }
 0x50d   : > { %6806 = vmatpush1.bf16.msra.mxu0 %v8908_v52  ;;  %v6076_v52 = vld [vmem:[#allocation5 + $0xaf8] sm:$0xff] }
 0x50e   : > { %6888 = vmatpush1.bf16.msra.mxu1 %v8910_v47  ;;  %6807 = vmatprep.subr.bf16.mxu0 %v8913_v53  ;;  %v8936_v47 = vcombine.low %v6069_v37, %v6071_v38  ;;  %v8938_v53 = vcombine.low %v6070_v39, %v6072_v62  ;;  %v8943_v15 = vcombine.high %v6074_v45, %v6076_v52  ;;  %v6097_v38 = vld [vmem:[#allocation5 + $0xdb0] sm:$0xff] }
 0x50f   : > { %6889 = vmatprep.subr.bf16.mxu1 %v8915_v11  ;;  %v8941_v11 = vcombine.high %v6073_v42, %v6075_v34 }
 0x511   : > { %6808 = vmatpush1.bf16.msra.mxu0 %v8912_v16  ;;  %v6080_v16 = vld [vmem:[#allocation5 + $0xb78] sm:$0xff] }
 0x512   : > { %6890 = vmatpush1.bf16.msra.mxu1 %v8914_v59  ;;  %6809 = vmatprep.subr.bf16.mxu0 %v8917_v60  ;;  %v8940_v59 = vcombine.low %v6073_v42, %v6075_v34  ;;  %v8942_v60 = vcombine.low %v6074_v45, %v6076_v52  ;;  %v8947_v33 = vcombine.high %v6078_v58, %v6080_v16  ;;  %v6101_v34 = vld [vmem:[#allocation5 + $0xe30] sm:$0xff]  ;;  %v6102_v52 = vld [vmem:[#allocation5 + $0xe38] sm:$0xff] }
 0x513   : > { %6891 = vmatprep.subr.bf16.mxu1 %v8919_v29  ;;  %v8945_v29 = vcombine.high %v6077_v54, %v6079_v55  ;;  %v6103_v45 = vld [vmem:[#allocation5 + $0xe70] sm:$0xff] }
 0x515   : > { %6810 = vmatpush1.bf16.msra.mxu0 %v8916_v1  ;;  %v6084_v1 = vld [vmem:[#allocation5 + $0xbf8] sm:$0xff] }
 0x516   : > { %6892 = vmatpush1.bf16.msra.mxu1 %v8918_v2  ;;  %6820 = vmatprep.subr.bf16.mxu0 %v8921_v19  ;;  %v8944_v2 = vcombine.low %v6077_v54, %v6079_v55  ;;  %v8946_v19 = vcombine.low %v6078_v58, %v6080_v16  ;;  %v8951_v3 = vcombine.high %v6082_v0, %v6084_v1  ;;  %v6105_v55 = vld [vmem:[#allocation5 + $0xeb0] sm:$0xff]  ;;  %v6106_v16 = vld [vmem:[#allocation5 + $0xeb8] sm:$0xff] }
 0x517   : > { %6902 = vmatprep.subr.bf16.mxu1 %v8923_v22  ;;  %v8949_v22 = vcombine.high %v6081_v63, %v6083_v17  ;;  %v6107_v58 = vld [vmem:[#allocation5 + $0xef0] sm:$0xff] }
 0x518   : > { %6812 = vmatmul.mubr.bf16.vlgmr.msra.gmra.mrb[36].mxu0 %v10528_v12 }
 0x519   : > { %6821 = vmatpush1.bf16.msra.mxu0 %v8920_v7  ;;  %6894 = vmatmul.mubr.bf16.vlgmr.msra.gmra.mrb[36].mxu1 %v10528_v12  ;;  %v8930_v12 = vcombine.low %v6062_v14, %v6064_v44  ;;  %v6088_v7 = vld [vmem:[#allocation5 + $0xc78] sm:$0xff]  ;;  %v6091_v14 = vld [vmem:[#allocation5 + $0xcf0] sm:$0xff] }
 0x51a   : > { %6903 = vmatpush1.bf16.msra.mxu1 %v8922_v8  ;;  %6822 = vmatprep.subr.bf16.mxu0 %v8925_v9  ;;  %v8948_v8 = vcombine.low %v6081_v63, %v6083_v17  ;;  %v8950_v9 = vcombine.low %v6082_v0, %v6084_v1  ;;  %v8955_v13 = vcombine.high %v6086_v6, %v6088_v7  ;;  %v6090_v44 = vld [vmem:[#allocation5 + $0xcb8] sm:$0xff]  ;;  %v6109_v17 = vld [vmem:[#allocation5 + $0xf30] sm:$0xff] }
 0x51b   : > { %6904 = vmatprep.subr.bf16.mxu1 %v8927_v10  ;;  %6852 = vmatprep.mubr.bf16.mxu0 %v10531_v24  ;;  %v8953_v10 = vcombine.high %v6085_v4, %v6087_v5  ;;  %v6111_v0 = vld [vmem:[#allocation5 + $0xf70] sm:$0xff]  ;;  %v6110_v1 = vld [vmem:[#allocation5 + $0xf38] sm:$0xff] }
 0x51c   : > { %6934 = vmatprep.mubr.bf16.mxu1 %v10531_v24  ;;  %v8939_v24 = vcombine.high %v6070_v39, %v6072_v62  ;;  %v6099_v39 = vld [vmem:[#allocation5 + $0xdf0] sm:$0xff]  ;;  %v6098_v62 = vld [vmem:[#allocation5 + $0xdb8] sm:$0xff] }
 0x51d   : > { %6823 = vmatpush1.bf16.msra.mxu0 %v8924_v18  ;;  %v6092_v18 = vld [vmem:[#allocation5 + $0xcf8] sm:$0xff] }
 0x51e   : > { %6905 = vmatpush1.bf16.msra.mxu1 %v8926_v20  ;;  %6824 = vmatprep.subr.bf16.mxu0 %v8929_v21  ;;  %v8952_v20 = vcombine.low %v6085_v4, %v6087_v5  ;;  %v8954_v21 = vcombine.low %v6086_v6, %v6088_v7  ;;  %v8959_v26 = vcombine.high %v6090_v44, %v6092_v18  ;;  %v6113_v5 = vld [vmem:[#allocation5 + $0xfb0] sm:$0xff]  ;;  %v6114_v7 = vld [vmem:[#allocation5 + $0xfb8] sm:$0xff] }
 0x51f   : > { %6906 = vmatprep.subr.bf16.mxu1 %v8931_v25  ;;  %v8957_v25 = vcombine.high %v6089_v57, %v6091_v14  ;;  %v6115_v6 = vld [vmem:[#allocation5 + $0xff0] sm:$0xff] }
 0x521   : > { %6825 = vmatpush1.bf16.msra.mxu0 %v8928_v31  ;;  %v6096_v31 = vld [vmem:[#allocation5 + $0xd78] sm:$0xff] }
 0x522   : > { %6907 = vmatpush1.bf16.msra.mxu1 %v8930_v12  ;;  %6826 = vmatprep.subr.bf16.mxu0 %v8933_v35  ;;  %v8956_v12 = vcombine.low %v6089_v57, %v6091_v14  ;;  %v8958_v35 = vcombine.low %v6090_v44, %v6092_v18  ;;  %v8963_v37 = vcombine.high %v6094_v30, %v6096_v31  ;;  %v9836_v18 = vld [vmem:[#allocation8 + $0xc04] ss:$16 sps:$4 sm:$0xff]  }
 0x523   : > { %6908 = vmatprep.subr.bf16.mxu1 %v8935_v36  ;;  %v8961_v36 = vcombine.high %v6093_v27, %v6095_v28  ;;  %v8980_v14 = vcombine.low %v6113_v5, %v6115_v6 }
 0x525   : > { %6827 = vmatpush1.bf16.msra.mxu0 %v8932_v32  ;;  %v6100_v32 = vld [vmem:[#allocation5 + $0xdf8] sm:$0xff] }
 0x526   : > { %6909 = vmatpush1.bf16.msra.mxu1 %v8934_v40  ;;  %6828 = vmatprep.subr.bf16.mxu0 %v8937_v41  ;;  %v8960_v40 = vcombine.low %v6093_v27, %v6095_v28  ;;  %v8962_v41 = vcombine.low %v6094_v30, %v6096_v31  ;;  %v8967_v42 = vcombine.high %v6098_v62, %v6100_v32  ;;  %v9845_v27 = vld [vmem:[#allocation8 + $0xe24] ss:$16 sps:$4 sm:$0xff]   ;;  %v9840_v28 = vld [vmem:[#allocation8 + $0xc20] ss:$16 sps:$4 sm:$0xff]  }
 0x527   : > { %6910 = vmatprep.subr.bf16.mxu1 %v8939_v24  ;;  %v8965_v24 = vcombine.high %v6097_v38, %v6099_v39  ;;  %v9843_v30 = vld [vmem:[#allocation8 + $0xe20] ss:$16 sps:$4 sm:$0xff]   ;;  %v9848_v31 = vld [vmem:[#allocation8 + $0xc44] ss:$16 sps:$4 sm:$0xff]  }
 0x529   : > { %6829 = vmatpush1.bf16.msra.mxu0 %v8936_v47  ;;  %v6104_v47 = vld [vmem:[#allocation5 + $0xe78] sm:$0xff] }
 0x52a   : > { %6911 = vmatpush1.bf16.msra.mxu1 %v8938_v53  ;;  %6830 = vmatprep.subr.bf16.mxu0 %v8941_v11  ;;  %v8964_v53 = vcombine.low %v6097_v38, %v6099_v39  ;;  %v8966_v11 = vcombine.low %v6098_v62, %v6100_v32  ;;  %v8971_v54 = vcombine.high %v6102_v52, %v6104_v47  ;;  %v9857_v38 = vld [vmem:[#allocation8 + $0xe64] ss:$16 sps:$4 sm:$0xff]   ;;  %v9852_v39 = vld [vmem:[#allocation8 + $0xc60] ss:$16 sps:$4 sm:$0xff]  }
 0x52b   : > { %6912 = vmatprep.subr.bf16.mxu1 %v8943_v15  ;;  %v8969_v15 = vcombine.high %v6101_v34, %v6103_v45  ;;  %v9860_v62 = vld [vmem:[#allocation8 + $0xc84] ss:$16 sps:$4 sm:$0xff]  }
 0x52c   : > { %v9863_v32 = vld [vmem:[#allocation8 + $0xe84] ss:$16 sps:$4 sm:$0xff]  }
 0x52d   : > { %6831 = vmatpush1.bf16.msra.mxu0 %v8940_v59  ;;  %v6108_v59 = vld [vmem:[#allocation5 + $0xef8] sm:$0xff] }
 0x52e   : > { %6913 = vmatpush1.bf16.msra.mxu1 %v8942_v60  ;;  %6832 = vmatprep.subr.bf16.mxu0 %v8945_v29  ;;  %v8968_v60 = vcombine.low %v6101_v34, %v6103_v45  ;;  %v8970_v29 = vcombine.low %v6102_v52, %v6104_v47  ;;  %v8975_v63 = vcombine.high %v6106_v16, %v6108_v59  ;;  %v9864_v34 = vld [vmem:[#allocation8 + $0xca0] ss:$16 sps:$4 sm:$0xff]   ;;  %v9872_v52 = vld [vmem:[#allocation8 + $0xcc4] ss:$16 sps:$4 sm:$0xff]  }
 0x52f   : > { %6914 = vmatprep.subr.bf16.mxu1 %v8947_v33  ;;  %v8973_v33 = vcombine.high %v6105_v55, %v6107_v58  ;;  %v9867_v45 = vld [vmem:[#allocation8 + $0xea0] ss:$16 sps:$4 sm:$0xff]  }
 0x531   : > { %6833 = vmatpush1.bf16.msra.mxu0 %v8944_v2  ;;  %v6112_v2 = vld [vmem:[#allocation5 + $0xf78] sm:$0xff] }
 0x532   : > { %6915 = vmatpush1.bf16.msra.mxu1 %v8946_v19  ;;  %6834 = vmatprep.subr.bf16.mxu0 %v8949_v22  ;;  %v8972_v19 = vcombine.low %v6105_v55, %v6107_v58  ;;  %v8974_v22 = vcombine.low %v6106_v16, %v6108_v59  ;;  %v8979_v4 = vcombine.high %v6110_v1, %v6112_v2  ;;  %v9870_v16 = vld [vmem:[#allocation8 + $0xcc0] ss:$16 sps:$4 sm:$0xff]  }
 0x533   : > { %6916 = vmatprep.subr.bf16.mxu1 %v8951_v3  ;;  %v8977_v3 = vcombine.high %v6109_v17, %v6111_v0 }
 0x535   : > { %6835 = vmatpush1.bf16.msra.mxu0 %v8948_v8  ;;  %v6116_v8 = vld [vmem:[#allocation5 + $0xff8] sm:$0xff] }
 0x536   : > { %6917 = vmatpush1.bf16.msra.mxu1 %v8950_v9  ;;  %6836 = vmatprep.subr.bf16.mxu0 %v8953_v10  ;;  %v8976_v9 = vcombine.low %v6109_v17, %v6111_v0  ;;  %v8978_v10 = vcombine.low %v6110_v1, %v6112_v2  ;;  %v8983_v57 = vcombine.high %v6114_v7, %v6116_v8  ;;  %v9881_v1 = vld [vmem:[#allocation8 + $0xee4] ss:$16 sps:$4 sm:$0xff]  }
 0x537   : > { %6918 = vmatprep.subr.bf16.mxu1 %v8955_v13  ;;  %v8981_v13 = vcombine.high %v6113_v5, %v6115_v6  ;;  %v8982_v44 = vcombine.low %v6114_v7, %v6116_v8  ;;  %v9882_v5 = vld [vmem:[#allocation8 + $0xd00] ss:$16 sps:$4 sm:$0xff]   ;;  %v9890_v6 = vld [vmem:[#allocation8 + $0xd24] ss:$16 sps:$4 sm:$0xff]  }
 0x538   : > { %v9893_v7 = vld [vmem:[#allocation8 + $0xf24] ss:$16 sps:$4 sm:$0xff]   ;;  %v9888_v8 = vld [vmem:[#allocation8 + $0xd20] ss:$16 sps:$4 sm:$0xff]  }
 0x539   : > { %6837 = vmatpush1.bf16.msra.mxu0 %v8952_v20  ;;  %v9839_v20 = vld [vmem:[#allocation8 + $0xe04] ss:$16 sps:$4 sm:$0xff]  }
 0x53a   : > { %6919 = vmatpush1.bf16.msra.mxu1 %v8954_v21  ;;  %6838 = vmatprep.subr.bf16.mxu0 %v8957_v25  ;;  %v9834_v21 = vld [vmem:[#allocation8 + $0xc00] ss:$16 sps:$4 sm:$0xff]  }
 0x53b   : > { %6920 = vmatprep.subr.bf16.mxu1 %v8959_v26  ;;  %v9837_v25 = vld [vmem:[#allocation8 + $0xe00] ss:$16 sps:$4 sm:$0xff]   ;;  %v9842_v26 = vld [vmem:[#allocation8 + $0xc24] ss:$16 sps:$4 sm:$0xff]  }
 0x53d   : > { %6839 = vmatpush1.bf16.msra.mxu0 %v8956_v12  ;;  %v9851_v12 = vld [vmem:[#allocation8 + $0xe44] ss:$16 sps:$4 sm:$0xff]  }
 0x53e   : > { %6921 = vmatpush1.bf16.msra.mxu1 %v8958_v35  ;;  %6840 = vmatprep.subr.bf16.mxu0 %v8961_v36  ;;  %v9846_v35 = vld [vmem:[#allocation8 + $0xc40] ss:$16 sps:$4 sm:$0xff]  }
 0x53f   : > { %6922 = vmatprep.subr.bf16.mxu1 %v8963_v37  ;;  %v9849_v36 = vld [vmem:[#allocation8 + $0xe40] ss:$16 sps:$4 sm:$0xff]   ;;  %v9854_v37 = vld [vmem:[#allocation8 + $0xc64] ss:$16 sps:$4 sm:$0xff]  }
 0x541   : > { %6841 = vmatpush1.bf16.msra.mxu0 %v8960_v40  ;;  %v9858_v40 = vld [vmem:[#allocation8 + $0xc80] ss:$16 sps:$4 sm:$0xff]  }
 0x542   : > { %6923 = vmatpush1.bf16.msra.mxu1 %v8962_v41  ;;  %6842 = vmatprep.subr.bf16.mxu0 %v8965_v24  ;;  %v9861_v41 = vld [vmem:[#allocation8 + $0xe80] ss:$16 sps:$4 sm:$0xff]   ;;  %v9866_v24 = vld [vmem:[#allocation8 + $0xca4] ss:$16 sps:$4 sm:$0xff]  }
 0x543   : > { %6924 = vmatprep.subr.bf16.mxu1 %v8967_v42  ;;  %v9869_v42 = vld [vmem:[#allocation8 + $0xea4] ss:$16 sps:$4 sm:$0xff]  }
 0x545   : > { %6843 = vmatpush1.bf16.msra.mxu0 %v8964_v53  ;;  %v9875_v53 = vld [vmem:[#allocation8 + $0xec4] ss:$16 sps:$4 sm:$0xff]  }
 0x546   : > { %6925 = vmatpush1.bf16.msra.mxu1 %v8966_v11  ;;  %6844 = vmatprep.subr.bf16.mxu0 %v8969_v15 }
 0x547   : > { %6926 = vmatprep.subr.bf16.mxu1 %v8971_v54 }
 0x549   : > { %6845 = vmatpush1.bf16.msra.mxu0 %v8968_v60 }
 0x54a   : > { %6927 = vmatpush1.bf16.msra.mxu1 %v8970_v29  ;;  %6846 = vmatprep.subr.bf16.mxu0 %v8973_v33  ;;  %v9873_v33 = vld [vmem:[#allocation8 + $0xec0] ss:$16 sps:$4 sm:$0xff]  }
 0x54b   : > { %6928 = vmatprep.subr.bf16.mxu1 %v8975_v63  ;;  %v9878_v63 = vld [vmem:[#allocation8 + $0xce4] ss:$16 sps:$4 sm:$0xff]  }
 0x54d   : > { %6847 = vmatpush1.bf16.msra.mxu0 %v8972_v19  ;;  %v9876_v19 = vld [vmem:[#allocation8 + $0xce0] ss:$16 sps:$4 sm:$0xff]  }
 0x54e   : > { %6929 = vmatpush1.bf16.msra.mxu1 %v8974_v22  ;;  %6848 = vmatprep.subr.bf16.mxu0 %v8977_v3  ;;  %v9879_v22 = vld [vmem:[#allocation8 + $0xee0] ss:$16 sps:$4 sm:$0xff]   ;;  %v9884_v3 = vld [vmem:[#allocation8 + $0xd04] ss:$16 sps:$4 sm:$0xff]  }
 0x54f   : > { %6930 = vmatprep.subr.bf16.mxu1 %v8979_v4  ;;  %v9887_v4 = vld [vmem:[#allocation8 + $0xf04] ss:$16 sps:$4 sm:$0xff]  }
 0x551   : > { %6849 = vmatpush1.bf16.msra.mxu0 %v8976_v9  ;;  %v9896_v9 = vld [vmem:[#allocation8 + $0xd44] ss:$16 sps:$4 sm:$0xff]  }
 0x552   : > { %6931 = vmatpush1.bf16.msra.mxu1 %v8978_v10  ;;  %6850 = vmatprep.subr.bf16.mxu0 %v8981_v13  ;;  %v9899_v10 = vld [vmem:[#allocation8 + $0xf44] ss:$16 sps:$4 sm:$0xff]   ;;  %v9894_v13 = vld [vmem:[#allocation8 + $0xd40] ss:$16 sps:$4 sm:$0xff]  }
 0x553   : > { %6932 = vmatprep.subr.bf16.mxu1 %v8983_v57  ;;  %v9897_v57 = vld [vmem:[#allocation8 + $0xf40] ss:$16 sps:$4 sm:$0xff]  }
 0x555   : > { %6851 = vmatpush1.bf16.msra.mxu0 %v8980_v14  ;;  %v9902_v14 = vld [vmem:[#allocation8 + $0xd64] ss:$16 sps:$4 sm:$0xff]  }
 0x556   : > { %6933 = vmatpush1.bf16.msra.mxu1 %v8982_v44  ;;  %7719 = vmatprep.subr.bf16.mxu0 %v9836_v18  ;;  %v9905_v44 = vld [vmem:[#allocation8 + $0xf64] ss:$16 sps:$4 sm:$0xff]   ;;  %v9900_v18 = vld [vmem:[#allocation8 + $0xd60] ss:$16 sps:$4 sm:$0xff]  }
 0x557   : > { %7760 = vmatprep.subr.bf16.mxu1 %v9839_v20  ;;  %v9903_v20 = vld [vmem:[#allocation8 + $0xf60] ss:$16 sps:$4 sm:$0xff]  }
 0x558   : > { %6853 = vmatmul.mubr.bf16.vlgmr.msra.gmra.mrb[36].mxu0 %v10538_v23 }
 0x559   : > { %6935 = vmatmul.mubr.bf16.vlgmr.msra.gmra.mrb[36].mxu1 %v10538_v23  ;;  %7720 = vmatpush1.bf16.msra.mxu0 %v9834_v21  ;;  %v9855_v23 = vld [vmem:[#allocation8 + $0xe60] ss:$16 sps:$4 sm:$0xff]   ;;  %v9908_v21 = vld [vmem:[#allocation8 + $0xd84] ss:$16 sps:$4 sm:$0xff]  }
 0x55a   : > { %7761 = vmatpush1.bf16.msra.mxu1 %v9837_v25  ;;  %7721 = vmatprep.subr.bf16.mxu0 %v9842_v26  ;;  %v9911_v25 = vld [vmem:[#allocation8 + $0xf84] ss:$16 sps:$4 sm:$0xff]   ;;  %v9906_v26 = vld [vmem:[#allocation8 + $0xd80] ss:$16 sps:$4 sm:$0xff]  }
 0x55b   : > { %7762 = vmatprep.subr.bf16.mxu1 %v9845_v27  ;;  %v9909_v27 = vld [vmem:[#allocation8 + $0xf80] ss:$16 sps:$4 sm:$0xff]  }
 0x55d   : > { %7722 = vmatpush1.bf16.msra.mxu0 %v9840_v28  ;;  %v9914_v28 = vld [vmem:[#allocation8 + $0xda4] ss:$16 sps:$4 sm:$0xff]  }
 0x55e   : > { %7763 = vmatpush1.bf16.msra.mxu1 %v9843_v30  ;;  %7723 = vmatprep.subr.bf16.mxu0 %v9848_v31  ;;  %v9917_v30 = vld [vmem:[#allocation8 + $0xfa4] ss:$16 sps:$4 sm:$0xff]   ;;  %v9912_v31 = vld [vmem:[#allocation8 + $0xda0] ss:$16 sps:$4 sm:$0xff]  }
 0x55f   : > { %7764 = vmatprep.subr.bf16.mxu1 %v9851_v12  ;;  %v9915_v12 = vld [vmem:[#allocation8 + $0xfa0] ss:$16 sps:$4 sm:$0xff]  }
 0x561   : > { %7724 = vmatpush1.bf16.msra.mxu0 %v9846_v35  ;;  %v9920_v35 = vld [vmem:[#allocation8 + $0xdc4] ss:$16 sps:$4 sm:$0xff]  }
 0x562   : > { %7765 = vmatpush1.bf16.msra.mxu1 %v9849_v36  ;;  %7725 = vmatprep.subr.bf16.mxu0 %v9854_v37  ;;  %v9923_v36 = vld [vmem:[#allocation8 + $0xfc4] ss:$16 sps:$4 sm:$0xff]  }
 0x563   : > { %7766 = vmatprep.subr.bf16.mxu1 %v9857_v38  ;;  %v9918_v38 = vld [vmem:[#allocation8 + $0xdc0] ss:$16 sps:$4 sm:$0xff]  }
 0x565   : > { %7726 = vmatpush1.bf16.msra.mxu0 %v9852_v39  ;;  %v9921_v39 = vld [vmem:[#allocation8 + $0xfc0] ss:$16 sps:$4 sm:$0xff]  }
 0x566   : > { %7767 = vmatpush1.bf16.msra.mxu1 %v9855_v23  ;;  %7727 = vmatprep.subr.bf16.mxu0 %v9860_v62 }
 0x567   : > { %7768 = vmatprep.subr.bf16.mxu1 %v9863_v32 }
 0x569   : > { %7728 = vmatpush1.bf16.msra.mxu0 %v9858_v40 }
 0x56a   : > { %7769 = vmatpush1.bf16.msra.mxu1 %v9861_v41  ;;  %7729 = vmatprep.subr.bf16.mxu0 %v9866_v24 }
 0x56b   : > { %v5855_v47 = vpop.f32.mrb[28].mxu0  ;;  %7770 = vmatprep.subr.bf16.mxu1 %v9869_v42 }
 0x56c   : > { %v5896_v11 = vpop.f32.mrb[28].mxu1  ;;  %v5857_v15 = vpop.f32.mrb[29].mxu0 }
 0x56d   : > { %v5897_v54 = vadd.f32 %v5896_v11, %v5855_v47  ;;  %v5898_v55 = vpop.f32.mrb[29].mxu1  ;;  %v5859_v58 = vpop.f32.mrb[30].mxu0  ;;  %7730 = vmatpush1.bf16.msra.mxu0 %v9864_v34  ;;  %v9924_v11 = vld [vmem:[#allocation8 + $0xde0] ss:$16 sps:$4 sm:$0xff]  }
 0x56e   : > { %v5899_v59 = vadd.f32 %v5898_v55, %v5857_v15  ;;  %v5900_v60 = vpop.f32.mrb[30].mxu1  ;;  %v5860_v29 = vpop.f32.mrb[31].mxu0  ;;  %7771 = vmatpush1.bf16.msra.mxu1 %v9867_v45  ;;  %7731 = vmatprep.subr.bf16.mxu0 %v9872_v52  ;;  %v9926_v45 = vld [vmem:[#allocation8 + $0xde4] ss:$16 sps:$4 sm:$0xff]   ;;  %v9927_v15 = vld [vmem:[#allocation8 + $0xfe0] ss:$16 sps:$4 sm:$0xff]  }
 0x56f   : > { %v10657_v17 = vadd.f32 %v5897_v54, %v10626_v56  ;;  %v5901_v0 = vpop.f32.mrb[31].mxu1  ;;  %7772 = vmatprep.subr.bf16.mxu1 %v9875_v53  ;;  %v9885_v56 = vld [vmem:[#allocation8 + $0xf00] ss:$16 sps:$4 sm:$0xff]   ;;  %v9929_v52 = vld [vmem:[#allocation8 + $0xfe4] ss:$16 sps:$4 sm:$0xff]  }
 0x570   : > { %v10660_v2 = vadd.f32 %v5899_v59, %v10628_v61  ;;  %v9891_v61 = vld [vmem:[#allocation8 + $0xf20] ss:$16 sps:$4 sm:$0xff]   ;;  %v9932_v55 = vld [vmem:[#allocation8 + $0xc0c] ss:$16 sps:$4 sm:$0xff]  }
 0x571   : > { %7732 = vmatpush1.bf16.msra.mxu0 %v9870_v16  ;;  %v9935_v58 = vld [vmem:[#allocation8 + $0xe0c] ss:$16 sps:$4 sm:$0xff]  }
 0x572   : > { %7773 = vmatpush1.bf16.msra.mxu1 %v9873_v33  ;;  %7733 = vmatprep.subr.bf16.mxu0 %v9878_v63  ;;  %v6117_v16 = vld [vmem:[#allocation7 + $0xc] sm:$0xf] }
 0x573   : > { %7774 = vmatprep.subr.bf16.mxu1 %v9881_v1  ;;  %v6122_v59 = vrot.slane %v6117_v16, %v10558_v48  ;;  %v6126_v60 = vrot.slane %v6117_v16, %v10562_v50  ;;  %v6134_v29 = vrot.slane %v6117_v16, %v10564_v51 }
 0x575   : > { %7734 = vmatpush1.bf16.msra.mxu0 %v9876_v19 }
 0x576   : > { %7775 = vmatpush1.bf16.msra.mxu1 %v9879_v22  ;;  %7735 = vmatprep.subr.bf16.mxu0 %v9884_v3 }
 0x577   : > { %7776 = vmatprep.subr.bf16.mxu1 %v9887_v4 }
 0x579   : > { %7736 = vmatpush1.bf16.msra.mxu0 %v9882_v5 }
 0x57a   : > { %7777 = vmatpush1.bf16.msra.mxu1 %v9885_v56  ;;  %7737 = vmatprep.subr.bf16.mxu0 %v9890_v6 }
 0x57b   : > { %7778 = vmatprep.subr.bf16.mxu1 %v9893_v7 }
 0x57d   : > { %7738 = vmatpush1.bf16.msra.mxu0 %v9888_v8 }
 0x57e   : > { %7779 = vmatpush1.bf16.msra.mxu1 %v9891_v61  ;;  %7739 = vmatprep.subr.bf16.mxu0 %v9896_v9 }
 0x57f   : > { %7780 = vmatprep.subr.bf16.mxu1 %v9899_v10 }
 0x581   : > { %7740 = vmatpush1.bf16.msra.mxu0 %v9894_v13  ;;  %v9930_v13 = vld [vmem:[#allocation8 + $0xc08] ss:$16 sps:$4 sm:$0xff]  }
 0x582   : > { %7781 = vmatpush1.bf16.msra.mxu1 %v9897_v57  ;;  %7741 = vmatprep.subr.bf16.mxu0 %v9902_v14 }
 0x583   : > { %7782 = vmatprep.subr.bf16.mxu1 %v9905_v44  ;;  %v9933_v44 = vld [vmem:[#allocation8 + $0xe08] ss:$16 sps:$4 sm:$0xff]  }
 0x585   : > { %7742 = vmatpush1.bf16.msra.mxu0 %v9900_v18 }
 0x586   : > { %7783 = vmatpush1.bf16.msra.mxu1 %v9903_v20  ;;  %7743 = vmatprep.subr.bf16.mxu0 %v9908_v21  ;;  %v9938_v20 = vld [vmem:[#allocation8 + $0xc2c] ss:$16 sps:$4 sm:$0xff]  }
 0x587   : > { %7784 = vmatprep.subr.bf16.mxu1 %v9911_v25  ;;  %v9941_v21 = vld [vmem:[#allocation8 + $0xe2c] ss:$16 sps:$4 sm:$0xff]   ;;  %v9936_v25 = vld [vmem:[#allocation8 + $0xc28] ss:$16 sps:$4 sm:$0xff]  }
 0x589   : > { %7744 = vmatpush1.bf16.msra.mxu0 %v9906_v26  ;;  %v9939_v26 = vld [vmem:[#allocation8 + $0xe28] ss:$16 sps:$4 sm:$0xff]  }
 0x58a   : > { %7785 = vmatpush1.bf16.msra.mxu1 %v9909_v27  ;;  %7745 = vmatprep.subr.bf16.mxu0 %v9914_v28  ;;  %v9944_v27 = vld [vmem:[#allocation8 + $0xc4c] ss:$16 sps:$4 sm:$0xff]  }
 0x58b   : > { %7786 = vmatprep.subr.bf16.mxu1 %v9917_v30  ;;  %v9947_v28 = vld [vmem:[#allocation8 + $0xe4c] ss:$16 sps:$4 sm:$0xff]   ;;  %v9942_v30 = vld [vmem:[#allocation8 + $0xc48] ss:$16 sps:$4 sm:$0xff]  }
 0x58d   : > { %7746 = vmatpush1.bf16.msra.mxu0 %v9912_v31  ;;  %v9945_v31 = vld [vmem:[#allocation8 + $0xe48] ss:$16 sps:$4 sm:$0xff]  }
 0x58e   : > { %7787 = vmatpush1.bf16.msra.mxu1 %v9915_v12  ;;  %7747 = vmatprep.subr.bf16.mxu0 %v9920_v35  ;;  %v9950_v12 = vld [vmem:[#allocation8 + $0xc6c] ss:$16 sps:$4 sm:$0xff]  }
 0x58f   : > { %7788 = vmatprep.subr.bf16.mxu1 %v9923_v36  ;;  %v9953_v35 = vld [vmem:[#allocation8 + $0xe6c] ss:$16 sps:$4 sm:$0xff]   ;;  %v9948_v36 = vld [vmem:[#allocation8 + $0xc68] ss:$16 sps:$4 sm:$0xff]  }
 0x591   : > { %7748 = vmatpush1.bf16.msra.mxu0 %v9918_v38  ;;  %v9956_v38 = vld [vmem:[#allocation8 + $0xc8c] ss:$16 sps:$4 sm:$0xff]  }
 0x592   : > { %7789 = vmatpush1.bf16.msra.mxu1 %v9921_v39  ;;  %7749 = vmatprep.subr.bf16.mxu0 %v9926_v45  ;;  %v9959_v39 = vld [vmem:[#allocation8 + $0xe8c] ss:$16 sps:$4 sm:$0xff]   ;;  %v9966_v45 = vld [vmem:[#allocation8 + $0xcc8] ss:$16 sps:$4 sm:$0xff]  }
 0x593   : > { %7790 = vmatprep.subr.bf16.mxu1 %v9929_v52  ;;  %v9969_v52 = vld [vmem:[#allocation8 + $0xec8] ss:$16 sps:$4 sm:$0xff]  }
 0x595   : > { %7750 = vmatpush1.bf16.msra.mxu0 %v9924_v11  ;;  %v9977_v11 = vld [vmem:[#allocation8 + $0xeec] ss:$16 sps:$4 sm:$0xff]  }
 0x596   : > { %7791 = vmatpush1.bf16.msra.mxu1 %v9927_v15  ;;  %7801 = vmatprep.subr.bf16.mxu0 %v9932_v55  ;;  %v9972_v15 = vld [vmem:[#allocation8 + $0xce8] ss:$16 sps:$4 sm:$0xff]  }
 0x597   : > { %7842 = vmatprep.subr.bf16.mxu1 %v9935_v58  ;;  %v9975_v55 = vld [vmem:[#allocation8 + $0xee8] ss:$16 sps:$4 sm:$0xff]   ;;  %v9980_v58 = vld [vmem:[#allocation8 + $0xd0c] ss:$16 sps:$4 sm:$0xff]  }
 0x5ab   : > { %v5937_v37 = vpop.f32.mrb[32].mxu0 }
 0x5ac   : > { %v5978_v23 = vpop.f32.mrb[32].mxu1  ;;  %v5939_v62 = vpop.f32.mrb[33].mxu0 }
 0x5ad   : > { %v5979_v32 = vadd.f32 %v5978_v23, %v5937_v37  ;;  %v5980_v40 = vpop.f32.mrb[33].mxu1  ;;  %v5941_v41 = vpop.f32.mrb[34].mxu0  ;;  %v9951_v37 = vld [vmem:[#allocation8 + $0xe68] ss:$16 sps:$4 sm:$0xff]  }
 0x5ae   : > { %v5981_v24 = vadd.f32 %v5980_v40, %v5939_v62  ;;  %v5982_v42 = vpop.f32.mrb[34].mxu1  ;;  %v5942_v34 = vpop.f32.mrb[35].mxu0  ;;  %v9954_v23 = vld [vmem:[#allocation8 + $0xc88] ss:$16 sps:$4 sm:$0xff]   ;;  %v9965_v40 = vld [vmem:[#allocation8 + $0xeac] ss:$16 sps:$4 sm:$0xff]  }
 0x5af   : > { %v10663_v47 = vadd.f32 %v5979_v32, %v10632_v43  ;;  %v5983_v53 = vpop.f32.mrb[35].mxu1  ;;  %v6130_v43 = vrot.slane %v6117_v16, %v10560_v49  ;;  %v9957_v62 = vld [vmem:[#allocation8 + $0xe88] ss:$16 sps:$4 sm:$0xff]   ;;  %v9962_v32 = vld [vmem:[#allocation8 + $0xcac] ss:$16 sps:$4 sm:$0xff]  }
 0x5b0   : > { %v10666_v54 = vadd.f32 %v5981_v24, %v10634_v46  ;;  %v9960_v41 = vld [vmem:[#allocation8 + $0xca8] ss:$16 sps:$4 sm:$0xff]   ;;  %v9968_v42 = vld [vmem:[#allocation8 + $0xccc] ss:$16 sps:$4 sm:$0xff]  }
 0x5b1   : > { %v9963_v24 = vld [vmem:[#allocation8 + $0xea8] ss:$16 sps:$4 sm:$0xff]   ;;  %v9971_v34 = vld [vmem:[#allocation8 + $0xecc] ss:$16 sps:$4 sm:$0xff]  }
 0x5b2   : > { %v9974_v53 = vld [vmem:[#allocation8 + $0xcec] ss:$16 sps:$4 sm:$0xff]  }
 0x5b3   : > { %v9983_v16 = vld [vmem:[#allocation8 + $0xf0c] ss:$16 sps:$4 sm:$0xff]  }
 0x62b   : > { %v6854_v33 = vpop.f32.mrb[36].mxu0 }
 0x62c   : > { %v9131_v46 = vadd.f32 %v6854_v33, %v6122_v59  ;;  %v6936_v63 = vpop.f32.mrb[36].mxu1  ;;  %v6856_v0 = vpop.f32.mrb[37].mxu0  ;;  %v9978_v59 = vld [vmem:[#allocation8 + $0xd08] ss:$16 sps:$4 sm:$0xff]  }
 0x62d   : > { %v9133_v1 = vadd.f32 %v6936_v63, %v6130_v43  ;;  %v9132_v19 = vadd.f32 %v6856_v0, %v6126_v60  ;;  %v6938_v22 = vpop.f32.mrb[37].mxu1  ;;  %v6858_v3 = vpop.f32.mrb[38].mxu0  ;;  %v9981_v43 = vld [vmem:[#allocation8 + $0xf08] ss:$16 sps:$4 sm:$0xff]   ;;  %v9986_v60 = vld [vmem:[#allocation8 + $0xd2c] ss:$16 sps:$4 sm:$0xff]  }
 0x62e   : > { %v6943_v4 = vmax.f32 %v9131_v46, 0.0  ;;  %v9134_v5 = vadd.f32 %v6938_v22, %v6134_v29  ;;  %v6940_v56 = vpop.f32.mrb[38].mxu1  ;;  %v6859_v6 = vpop.f32.mrb[39].mxu0  ;;  %v9989_v29 = vld [vmem:[#allocation8 + $0xf2c] ss:$16 sps:$4 sm:$0xff]  }
 0x62f   : > { %v6945_v7 = vmax.f32 %v9133_v1, 0.0  ;;  %v6944_v8 = vmax.f32 %v9132_v19, 0.0  ;;  %v6941_v61 = vpop.f32.mrb[39].mxu1  ;;  %v9984_v33 = vld [vmem:[#allocation8 + $0xd28] ss:$16 sps:$4 sm:$0xff]  }
 0x630   : > { %v6946_v9 = vmax.f32 %v9134_v5, 0.0  ;;  %v10672_v57 = vpack.c.bf16 %v6943_v4, %v6943_v4  ;;  %v9987_v46 = vld [vmem:[#allocation8 + $0xf28] ss:$16 sps:$4 sm:$0xff]   ;;  %v9992_v63 = vld [vmem:[#allocation8 + $0xd4c] ss:$16 sps:$4 sm:$0xff]  }
 0x631   : > { %v6948_v10 = vpack.c.bf16 %v6944_v8, %v6944_v8  ;;  %v10674_v18 = vpack.c.bf16 %v6945_v7, %v6945_v7  ;;  %v9995_v0 = vld [vmem:[#allocation8 + $0xf4c] ss:$16 sps:$4 sm:$0xff]   ;;  %v9990_v1 = vld [vmem:[#allocation8 + $0xd48] ss:$16 sps:$4 sm:$0xff]  }
 0x632   : > { %v6950_v14 = vpack.c.bf16 %v6946_v9, %v6946_v9  ;;  %v9993_v19 = vld [vmem:[#allocation8 + $0xf48] ss:$16 sps:$4 sm:$0xff]   ;;  %v9998_v22 = vld [vmem:[#allocation8 + $0xd6c] ss:$16 sps:$4 sm:$0xff]  }
 0x633   : > { %7751 = vmatprep.mubr.bf16.mxu0 %v6948_v10  ;;  %v10001_v3 = vld [vmem:[#allocation8 + $0xf6c] ss:$16 sps:$4 sm:$0xff]   ;;  %v9996_v4 = vld [vmem:[#allocation8 + $0xd68] ss:$16 sps:$4 sm:$0xff]  }
 0x634   : > { %7792 = vmatprep.mubr.bf16.mxu1 %v6950_v14  ;;  %7752 = vmatmul.mubr.bf16.vlgmr.msra.gmra.mrb[40].mxu0 %v10672_v57  ;;  %v9999_v5 = vld [vmem:[#allocation8 + $0xf68] ss:$16 sps:$4 sm:$0xff]   ;;  %v10004_v56 = vld [vmem:[#allocation8 + $0xd8c] ss:$16 sps:$4 sm:$0xff]  }
 0x635   : > { %7793 = vmatmul.mubr.bf16.vlgmr.msra.gmra.mrb[40].mxu1 %v10674_v18  ;;  %7802 = vmatpush1.bf16.msra.mxu0 %v9930_v13  ;;  %v10007_v6 = vld [vmem:[#allocation8 + $0xf8c] ss:$16 sps:$4 sm:$0xff]   ;;  %v10002_v7 = vld [vmem:[#allocation8 + $0xd88] ss:$16 sps:$4 sm:$0xff]  }
 0x636   : > { %7843 = vmatpush1.bf16.msra.mxu1 %v9933_v44  ;;  %7833 = vmatprep.mubr.bf16.mxu0 %v6948_v10  ;;  %v10005_v8 = vld [vmem:[#allocation8 + $0xf88] ss:$16 sps:$4 sm:$0xff]   ;;  %v10010_v61 = vld [vmem:[#allocation8 + $0xdac] ss:$16 sps:$4 sm:$0xff]  }
 0x637   : > { %7874 = vmatprep.mubr.bf16.mxu1 %v6950_v14  ;;  %7803 = vmatprep.subr.bf16.mxu0 %v9938_v20  ;;  %v10013_v9 = vld [vmem:[#allocation8 + $0xfac] ss:$16 sps:$4 sm:$0xff]   ;;  %v10008_v10 = vld [vmem:[#allocation8 + $0xda8] ss:$16 sps:$4 sm:$0xff]  }
 0x638   : > { %7844 = vmatprep.subr.bf16.mxu1 %v9941_v21  ;;  %v10011_v13 = vld [vmem:[#allocation8 + $0xfa8] ss:$16 sps:$4 sm:$0xff]   ;;  %v10016_v14 = vld [vmem:[#allocation8 + $0xdcc] ss:$16 sps:$4 sm:$0xff]  }
 0x639   : > { %7804 = vmatpush1.bf16.msra.mxu0 %v9936_v25  ;;  %v10019_v44 = vld [vmem:[#allocation8 + $0xfcc] ss:$16 sps:$4 sm:$0xff]   ;;  %v10014_v20 = vld [vmem:[#allocation8 + $0xdc8] ss:$16 sps:$4 sm:$0xff]  }
 0x63a   : > { %7845 = vmatpush1.bf16.msra.mxu1 %v9939_v26  ;;  %7805 = vmatprep.subr.bf16.mxu0 %v9944_v27  ;;  %v10017_v21 = vld [vmem:[#allocation8 + $0xfc8] ss:$16 sps:$4 sm:$0xff]   ;;  %v10022_v25 = vld [vmem:[#allocation8 + $0xdec] ss:$16 sps:$4 sm:$0xff]  }
 0x63b   : > { %7846 = vmatprep.subr.bf16.mxu1 %v9947_v28  ;;  %v10025_v26 = vld [vmem:[#allocation8 + $0xfec] ss:$16 sps:$4 sm:$0xff]   ;;  %v10020_v27 = vld [vmem:[#allocation8 + $0xde8] ss:$16 sps:$4 sm:$0xff]  }
 0x63c   : > { %v10023_v28 = vld [vmem:[#allocation8 + $0xfe8] ss:$16 sps:$4 sm:$0xff]  }
 0x63d   : > { %7806 = vmatpush1.bf16.msra.mxu0 %v9942_v30 }
 0x63e   : > { %7847 = vmatpush1.bf16.msra.mxu1 %v9945_v31  ;;  %7807 = vmatprep.subr.bf16.mxu0 %v9950_v12 }
 0x63f   : > { %7848 = vmatprep.subr.bf16.mxu1 %v9953_v35 }
 0x641   : > { %7808 = vmatpush1.bf16.msra.mxu0 %v9948_v36 }
 0x642   : > { %7849 = vmatpush1.bf16.msra.mxu1 %v9951_v37  ;;  %7809 = vmatprep.subr.bf16.mxu0 %v9956_v38 }
 0x643   : > { %7850 = vmatprep.subr.bf16.mxu1 %v9959_v39 }
 0x645   : > { %7810 = vmatpush1.bf16.msra.mxu0 %v9954_v23 }
 0x646   : > { %7851 = vmatpush1.bf16.msra.mxu1 %v9957_v62  ;;  %7811 = vmatprep.subr.bf16.mxu0 %v9962_v32 }
 0x647   : > { %7852 = vmatprep.subr.bf16.mxu1 %v9965_v40 }
 0x649   : > { %7812 = vmatpush1.bf16.msra.mxu0 %v9960_v41  ;;  %v7887_v41 = vld [vmem:[#allocation10] sm:$0xf] }
 0x64a   : > { %7853 = vmatpush1.bf16.msra.mxu1 %v9963_v24  ;;  %7813 = vmatprep.subr.bf16.mxu0 %v9968_v42  ;;  %v7892_v24 = vrot.slane %v7887_v41, %v10558_v48  ;;  %v7904_v48 = vrot.slane %v7887_v41, %v10564_v51 }
 0x64b   : > { %7854 = vmatprep.subr.bf16.mxu1 %v9971_v34 }
 0x64d   : > { %7814 = vmatpush1.bf16.msra.mxu0 %v9966_v45 }
 0x64e   : > { %7855 = vmatpush1.bf16.msra.mxu1 %v9969_v52  ;;  %7815 = vmatprep.subr.bf16.mxu0 %v9974_v53 }
 0x64f   : > { %7856 = vmatprep.subr.bf16.mxu1 %v9977_v11  ;;  %v7900_v11 = vrot.slane %v7887_v41, %v10560_v49 }
 0x651   : > { %7816 = vmatpush1.bf16.msra.mxu0 %v9972_v15 }
 0x652   : > { %7857 = vmatpush1.bf16.msra.mxu1 %v9975_v55  ;;  %7817 = vmatprep.subr.bf16.mxu0 %v9980_v58 }
 0x653   : > { %7858 = vmatprep.subr.bf16.mxu1 %v9983_v16 }
 0x655   : > { %7818 = vmatpush1.bf16.msra.mxu0 %v9978_v59  ;;  %v10028_v59 = vld [vmem:[%s10508_s13] sm:$0xff] }
 0x656   : > { %7859 = vmatpush1.bf16.msra.mxu1 %v9981_v43  ;;  %7819 = vmatprep.subr.bf16.mxu0 %v9986_v60  ;;  %v10029_v60 = vld [vmem:[%s10508_s13 + $0x8] sm:$0xff] }
 0x657   : > { %7860 = vmatprep.subr.bf16.mxu1 %v9989_v29 }
 0x659   : > { %7820 = vmatpush1.bf16.msra.mxu0 %v9984_v33 }
 0x65a   : > { %7861 = vmatpush1.bf16.msra.mxu1 %v9987_v46  ;;  %7821 = vmatprep.subr.bf16.mxu0 %v9992_v63  ;;  %v10030_v63 = vld [vmem:[%s10508_s13 + $0x10] sm:$0xff] }
 0x65b   : > { %7862 = vmatprep.subr.bf16.mxu1 %v9995_v0 }
 0x65d   : > { %7822 = vmatpush1.bf16.msra.mxu0 %v9990_v1 }
 0x65e   : > { %7863 = vmatpush1.bf16.msra.mxu1 %v9993_v19  ;;  %7823 = vmatprep.subr.bf16.mxu0 %v9998_v22  ;;  %v10031_v19 = vld [vmem:[%s10508_s13 + $0x18] sm:$0xff] }
 0x65f   : > { %7864 = vmatprep.subr.bf16.mxu1 %v10001_v3 }
 0x661   : > { %7824 = vmatpush1.bf16.msra.mxu0 %v9996_v4 }
 0x662   : > { %7865 = vmatpush1.bf16.msra.mxu1 %v9999_v5  ;;  %7825 = vmatprep.subr.bf16.mxu0 %v10004_v56 }
 0x663   : > { %7866 = vmatprep.subr.bf16.mxu1 %v10007_v6 }
 0x665   : > { %7826 = vmatpush1.bf16.msra.mxu0 %v10002_v7 }
 0x666   : > { %7867 = vmatpush1.bf16.msra.mxu1 %v10005_v8  ;;  %7827 = vmatprep.subr.bf16.mxu0 %v10010_v61 }
 0x667   : > { %7868 = vmatprep.subr.bf16.mxu1 %v10013_v9 }
 0x669   : > { %7828 = vmatpush1.bf16.msra.mxu0 %v10008_v10 }
 0x66a   : > { %7869 = vmatpush1.bf16.msra.mxu1 %v10011_v13  ;;  %7829 = vmatprep.subr.bf16.mxu0 %v10016_v14 }
 0x66b   : > { %7870 = vmatprep.subr.bf16.mxu1 %v10019_v44 }
 0x66d   : > { %7830 = vmatpush1.bf16.msra.mxu0 %v10014_v20 }
 0x66e   : > { %7871 = vmatpush1.bf16.msra.mxu1 %v10017_v21  ;;  %7831 = vmatprep.subr.bf16.mxu0 %v10022_v25 }
 0x66f   : > { %7872 = vmatprep.subr.bf16.mxu1 %v10025_v26 }
 0x671   : > { %7832 = vmatpush1.bf16.msra.mxu0 %v10020_v27 }
 0x672   : > { %7873 = vmatpush1.bf16.msra.mxu1 %v10023_v28 }
 0x674   : > { %7834 = vmatmul.mubr.bf16.vlgmr.msra.gmra.mrb[44].mxu0 %v10672_v57  ;;  %v7896_v57 = vrot.slane %v7887_v41, %v10562_v50 }
 0x675   : > { %7875 = vmatmul.mubr.bf16.vlgmr.msra.gmra.mrb[44].mxu1 %v10674_v18 }
 0x707   : > { %v7753_v30 = vpop.f32.mrb[40].mxu0 }
 0x708   : > { %v7794_v31 = vpop.f32.mrb[40].mxu1  ;;  %v7755_v12 = vpop.f32.mrb[41].mxu0 }
 0x709   : > { %v7795_v35 = vadd.f32 %v7794_v31, %v7753_v30  ;;  %v7796_v36 = vpop.f32.mrb[41].mxu1  ;;  %v7757_v37 = vpop.f32.mrb[42].mxu0 }
 0x70a   : > { %v7797_v38 = vadd.f32 %v7796_v36, %v7755_v12  ;;  %v7798_v39 = vpop.f32.mrb[42].mxu1  ;;  %v7758_v23 = vpop.f32.mrb[43].mxu0 }
 0x70b   : > { %v7883_v62 = vadd.f32 %v7795_v35, %v10657_v17  ;;  %v7799_v32 = vpop.f32.mrb[43].mxu1 }
 0x70c   : > { %v7884_v40 = vadd.f32 %v7797_v38, %v10660_v2 }
 0x70d   : > { %v7909_v18 = vadd.f32 %v7892_v24, %v7883_v62 }
 0x70e   : > { %v7910_v42 = vadd.f32 %v7896_v57, %v7884_v40 }
 0x70f   : > { %v7913_v43 = vadd.f32 %v10028_v59, %v7909_v18 }
 0x710   : > { %v7914_v29 = vadd.f32 %v10029_v60, %v7910_v42 }
 0x712   : > { %v7917_v1 = vadd.f32 %v7914_v29, %v7913_v43 }
 0x747   : > { %v7835_v34 = vpop.f32.mrb[44].mxu0 }
 0x748   : > { %v7876_v45 = vpop.f32.mrb[44].mxu1  ;;  %v7837_v52 = vpop.f32.mrb[45].mxu0 }
 0x749   : > { %v7877_v53 = vadd.f32 %v7876_v45, %v7835_v34  ;;  %v7878_v17 = vpop.f32.mrb[45].mxu1  ;;  %v7839_v15 = vpop.f32.mrb[46].mxu0 }
 0x74a   : > { %v7879_v55 = vadd.f32 %v7878_v17, %v7837_v52  ;;  %v7880_v2 = vpop.f32.mrb[46].mxu1  ;;  %v7840_v58 = vpop.f32.mrb[47].mxu0 }
 0x74b   : > { %v7885_v50 = vadd.f32 %v7877_v53, %v10663_v47  ;;  %v7881_v16 = vpop.f32.mrb[47].mxu1 }
 0x74c   : > { %v7886_v33 = vadd.f32 %v7879_v55, %v10666_v54 }
 0x74d   : > { %v7911_v46 = vadd.f32 %v7900_v11, %v7885_v50 }
 0x74e   : > { %v7912_v49 = vadd.f32 %v7904_v48, %v7886_v33 }
 0x74f   : > { %v7915_v0 = vadd.f32 %v10030_v63, %v7911_v46 }
 0x750   : > { %v7916_v22 = vadd.f32 %v10031_v19, %v7912_v49 }
 0x751   : > { %v7918_v3 = vadd.f32 %v7917_v1, %v7915_v0 }
 0x753   : > { %v7919_v4 = vadd.f32 %v7918_v3, %v7916_v22 }
 0x755   : > { %7920 = vadd.xlane.f32.xlu0 %v7919_v4 }
 0x7e2   : > { %v7921_v51 = vpop.xlane.xlu0 %7920 }
 0x7e3   : > { %v7923_v5 = vmul.f32 0.001953125, %v7921_v51 }
 0x7e5   : > { %v7924_v47 = vsub.f32 %v7913_v43, %v7923_v5  ;;  %v7925_v56 = vsub.f32 %v7914_v29, %v7923_v5  ;;  %v7926_v6 = vsub.f32 %v7915_v0, %v7923_v5  ;;  %v7927_v7 = vsub.f32 %v7916_v22, %v7923_v5 }
 0x7e7   : > { %v7928_v8 = vmul.f32 %v7924_v47, %v7924_v47  ;;  %v7929_v54 = vmul.f32 %v7925_v56, %v7925_v56  ;;  %v7930_v61 = vmul.f32 %v7926_v6, %v7926_v6  ;;  %v7931_v10 = vmul.f32 %v7927_v7, %v7927_v7 }
 0x7e9   : > { %v7932_v9 = vadd.f32 %v7929_v54, %v7928_v8 }
 0x7eb   : > { %v7933_v13 = vadd.f32 %v7932_v9, %v7930_v61 }
 0x7ed   : > { %v7934_v14 = vadd.f32 %v7933_v13, %v7931_v10 }
 0x7ef   : > { %7935 = vadd.xlane.f32.xlu0 %v7934_v14 }
 0x87c   : > { %v7936_v44 = vpop.xlane.xlu0 %7935 }
 0x87d   : > { %v7937_v20 = vmul.f32 0.001953125, %v7936_v44 }
 0x87f   : > { %v7938_v21 = vadd.f32 1e-05, %v7937_v20 }
 0x881   : > { %10026 = vrsqrt.f32 %v7938_v21 }
 0x88b   : > { %v10027_v25 = vpop.eup %10026 }
 0x88c   : > { %v7940_v26 = vmul.f32 %v10027_v25, %v7924_v47  ;;  %v7941_v27 = vmul.f32 %v10027_v25, %v7925_v56  ;;  %v7942_v28 = vmul.f32 %v10027_v25, %v7926_v6  ;;  %v7943_v30 = vmul.f32 %v10027_v25, %v7927_v7 }
 0x88e   : > { %7944 = vst [vmem:[%s294_s9] sm:$0xff] %v7940_v26  ;;  %7945 = vst [vmem:[%s294_s9 + $0x8] sm:$0xff] %v7941_v27 }
 0x88f   : > { %7946 = vst [vmem:[%s294_s9 + $0x10] sm:$0xff] %v7942_v28  ;;  %7947 = vst [vmem:[%s294_s9 + $0x18] sm:$0xff] %v7943_v30 }
 0x890   : > { %10187 = shalt.err (!%p10184_p12)
}
 0x891   : > { %s10188_s16 = scalar_lea.hbm %s10698_s29, 512  ;;  %s10192_s6 = scalar_lea.hbm %s10747_s5, 1024 }
 0x892   : > { %p10189_p13 = scmp.ne.s32.totalorder %s10698_s29, %s10188_s16  ;;  %p10193_p9 = scmp.lt.u32.totalorder %s10698_s29, %s10747_s5 }
 0x893   : > { %p10194_p4 = scmp.lt.u32.totalorder %s10192_s6, %s10188_s16  ;;  %p10196_p6 = scmp.lt.u32.totalorder %s10188_s16, %s10698_s29 }
 0x894   : > { %p10190_p1 = pnand %p10189_p13, %p10765_p0 }
 0x895   : > { %p10195_p8 = por %p10194_p4, %p10193_p9 }
 0x896   : > { %p10191_p7 = pneg %p10190_p1 }
 0x897   : > { %p10197_p2 = por %p10196_p6, %p10195_p8 }
 0x899   : > { %p10198_p5 = pnand %p10197_p2, %p10191_p7 }
 0x89b   : > { %10201 = shalt.err (!%p10198_p5)
}
 0x89c   : > { %9185 = dma.vmem_to_hbm [thread:$0]  (%p10765_p0), %s10700_s17, 512, %s10698_s29, %s7949_s24  }
 0x89d PF: > { %s7975_s25 = sand.u32 1, %s10236_s18   ;;  %p10766_p10 = scmp.ne.s32.totalorder %s10758_s12, 0 }
 0x89e   : > { %p10767_p11 = scmp.ge.s32.totalorder %s10248_s21, 2  ;;  %s7976_s9 = scalar_lea.sflag [#allocation4], %s7975_s25 }
 0x8a0   : > { %p9205_p3 = pnand %p10767_p11, %p10766_p10 }
 0x8a2   : > { %10231 = dma.done.wait (!%p9205_p3), %s7976_s9, 512  }
 0x8a3   : > { %10233 = vsyncadd (!%p9205_p3), %s7976_s9, 4294966784  ;;  %p20_p12 = scmp.ge.s32.totalorder %s10426_s28, 4   ;;  %s10768_s18 = smov %s10240_s19 }
 0x8a4   : > { %s10769_s19 = smov %s10244_s20  ;;  %s10770_s20 = smov %s10437_s8 }
 0x8a5   : > { %s10771_s21 = smov %s10426_s28  ;;  %22 = sbr.rel (!%p20_p12) target bundleno = 7 (0x7), region = 101 }
 0x8ac   :  { %7981 = vsyncpa [#allocation3], 1 }
 0x8ad   :  { %7983 = vsyncpa [#allocation3 + $0x1], 1 }
 0x8ae   :  { %7984 = vsyncpa [#allocation6], 1 }
 0x8af   :  { %7985 = vsyncpa [#allocation9], 1 }
 0x8b0   :  { %7986 = vsyncpa [#allocation4], 1 }
 0x8b1   :  { %7988 = vsyncpa [#allocation4 + $0x1], 1 }

</bundles_post_ra>
